<compile_context>
chip_gen: v5e
topology: v5e:2x2
jax: 0.10.0
libtpu: 0.0.40
codegen_flags: <defaults>
</compile_context>

<pallas_src>
import functools

import numpy as np
import jax
import jax.numpy as jnp
from jax.experimental import pallas as pl
from jax.experimental.pallas import tpu as pltpu

LEAKY_SLOPE = 0.01                    # torch.nn.LeakyReLU default negative_slope
_LANE = 128                           # TPU lane width
_SUBLANE = 8                          # TPU sublane count
_MB = 1024 * 1024


def _round_up(x, m):
    return ((x + m - 1) // m) * m


def _device_defaults():
    """(tn, vmem_limit_bytes) per TPU generation; conservative fallback."""
    kind = ""
    try:
        kind = jax.devices()[0].device_kind.lower()
    except Exception:
        pass
    if "v5" in kind:                     # v5e / v5p: 128-wide MXU, 128 MiB VMEM
        return 128, 64 * _MB
    if "v6" in kind:                     # v6e: 256-wide MXU, 128 MiB VMEM
        return 256, 96 * _MB
    if "v2" in kind or "v3" in kind or "v4" in kind:
        return 128, 48 * _MB
    # v7x / unknown: 2 TCs, only 64 MiB VMEM per core -> stay conservative.
    return 256, 48 * _MB


# ----------------------------------------------------------------------------
# Parameter preparation (runs ONCE, outside the jitted forward)
# ----------------------------------------------------------------------------
def prepare_params(conv_params, lin_params, out_c, dtype=jnp.bfloat16):
    """Pack conv weights into tap-major (4, K4, Coutp) bf16 form and fold the
    EqualLinear gain into a padded, pre-transposed bf16 weight."""
    packed = []
    cin_pad = conv_params[0][0].shape[1]          # layer-0 input channels (unpadded)
    for (w, b) in conv_params:                    # w: (Cout, Cin, 3, 3)
        cout, cin = w.shape[0], w.shape[1]
        coutp = _round_up(cout, _LANE)
        k4 = _round_up(4 * cin_pad, _LANE)
        # Pad (Cin -> cin_pad, 3x3 -> 4x4), then a single reshape/transpose gives
        # tap-major weights: wpk[(dh,dw), (p,q,c), o] = W[o, c, 2*dh+p, 2*dw+q].
        w4 = jnp.pad(w.astype(jnp.float32),
                     ((0, 0), (0, cin_pad - cin), (0, 1), (0, 1)))
        w4 = w4.reshape(cout, cin_pad, 2, 2, 2, 2)          # (o, c, dh, p, dw, q)
        wpk = jnp.transpose(w4, (2, 4, 3, 5, 1, 0))          # (dh, dw, p, q, c, o)
        wpk = wpk.reshape(4, 4 * cin_pad, cout)
        wpk = jnp.pad(wpk, ((0, 0), (0, k4 - 4 * cin_pad), (0, coutp - cout)))
        bp = jnp.pad(b, (0, coutp - cout)).reshape(1, coutp)
        packed.append((wpk.astype(dtype), bp.astype(jnp.float32)))
        cin_pad = coutp                           # next layer consumes padded channels

    lw, lb = lin_params                           # lw: (out_c, out_c)
    npad = _round_up(out_c, _LANE)
    gain = 1.0 / np.sqrt(out_c)                   # lr_multiplier = 1
    w_eff = jnp.zeros((npad, npad), jnp.float32).at[:out_c, :out_c].set(
        jnp.transpose(lw).astype(jnp.float32) * gain)
    b_eff = jnp.pad(lb, (0, npad - out_c)).reshape(1, npad)
    return packed, (w_eff.astype(dtype), b_eff.astype(jnp.float32))


# ----------------------------------------------------------------------------
# Kernel 1: fused stride-2 3x3 conv (space-to-depth form) + bias + LeakyReLU
# ----------------------------------------------------------------------------
def _conv_s2d_kernel(xs_ref, w_ref, b_ref, o_ref, *, ho, wo, ws_p):
    """One batch element x one Cout tile.

    xs_ref: (1, ho+1, ws_p, K4)  padded space-to-depth input (bf16, VMEM)
    w_ref : (4, K4, tn)          tap-major packed weights (bf16)
    b_ref : (1, tn)              bias (f32)
    o_ref : (1, ho, wo, tn)      NHWC output tile (bf16)
    """
    tn = o_ref.shape[-1]
    acc = jnp.zeros((ho, wo, tn), jnp.float32)
    for t in range(4):
        dh, dw = divmod(t, 2)
        # Full-width contiguous slab: ws_p % 8 == 0 so this reshape is layout-free
        # (no big-input VMEM relayout; ~3-25% extra MXU columns instead).
        x_slab = xs_ref[0, dh:dh + ho, :, :].reshape(ho * ws_p, -1)
        # Load one weight tap at a time (bounded vreg live ranges).
        r = jnp.dot(x_slab, w_ref[t], preferred_element_type=jnp.float32)
        r = r.reshape(ho, ws_p, tn)
        acc = acc + r[:, dw:dw + wo, :]           # only the small fp32 result shifts
    out = acc + b_ref[...]                        # (1, tn) broadcasts over (ho, wo, tn)
    out = jnp.where(out >= 0.0, out, LEAKY_SLOPE * out)
    o_ref[0] = out.astype(o_ref.dtype)


def conv3x3_s2_lrelu(x_nhwc, wpk, bp, *, tn, vmem_limit):
    """Conv2d(k=3, s=2, p=1) + LeakyReLU on a lane-padded NHWC activation.

    Returns y of shape (N, Ho, Wo, Coutp); padded channels are exactly zero."""
    n, h, w, cinp = x_nhwc.shape
    assert h % 2 == 0 and w % 2 == 0
    k4, coutp = wpk.shape[1], wpk.shape[2]
    assert k4 == _round_up(4 * cinp, _LANE)
    ho, wo = h // 2, w // 2
    hs, ws = ho + 1, wo + 1
    ws_p = _round_up(ws, _SUBLANE)
    tn = min(tn, coutp)
    assert coutp % tn == 0

    # 1x-traffic XLA glue: spatial zero-pad + 2x2 space-to-depth + sublane/lane pad.
    xp = jnp.pad(x_nhwc, ((0, 0), (1, 1), (1, 1), (0, 0)))
    xs = xp.reshape(n, hs, 2, ws, 2, cinp).transpose(0, 1, 3, 2, 4, 5)
    xs = xs.reshape(n, hs, ws, 4 * cinp)
    if ws_p > ws or k4 > 4 * cinp:
        xs = jnp.pad(xs, ((0, 0), (0, 0), (0, ws_p - ws), (0, k4 - 4 * cinp)))

    flops = 2 * n * (ho * ws_p) * k4 * coutp * 4
    bytes_accessed = (xs.size * xs.dtype.itemsize
                      + wpk.size * wpk.dtype.itemsize
                      + bp.size * bp.dtype.itemsize
                      + n * ho * wo * coutp * x_nhwc.dtype.itemsize)

    return pl.pallas_call(
        functools.partial(_conv_s2d_kernel, ho=ho, wo=wo, ws_p=ws_p),
        out_shape=jax.ShapeDtypeStruct((n, ho, wo, coutp), x_nhwc.dtype),
        grid=(n, coutp // tn),
        in_specs=[
            pl.BlockSpec((1, hs, ws_p, k4), lambda nb, j: (nb, 0, 0, 0)),
            pl.BlockSpec((4, k4, tn), lambda nb, j: (0, 0, j)),
            pl.BlockSpec((1, tn), lambda nb, j: (0, j)),
        ],
        out_specs=pl.BlockSpec((1, ho, wo, tn), lambda nb, j: (nb, 0, 0, j)),
        compiler_params=pltpu.CompilerParams(
            dimension_semantics=("parallel", "parallel"),
            vmem_limit_bytes=vmem_limit),
        cost_estimate=pl.CostEstimate(flops=flops, transcendentals=0,
                                      bytes_accessed=bytes_accessed),
    )(xs, wpk, bp)


# ----------------------------------------------------------------------------
# Kernel 2: EqualLinear as a single-step GEMM + bias (gain pre-folded into W)
# ----------------------------------------------------------------------------
def _equal_linear_kernel(x_ref, w_ref, b_ref, o_ref):
    acc = jnp.dot(x_ref[...], w_ref[...], preferred_element_type=jnp.float32)
    o_ref[...] = (acc + b_ref[...]).astype(o_ref.dtype)


def equal_linear(feat, w_eff, b_eff, *, tn, vmem_limit):
    """y = feat @ w_eff + b_eff, with w_eff = (W * 1/sqrt(in_features)).T padded."""
    m, kp = feat.shape
    assert kp == w_eff.shape[0]
    npad = w_eff.shape[1]
    tn = min(tn, npad)
    assert npad % tn == 0

    flops = 2 * m * kp * npad
    bytes_accessed = (feat.size * feat.dtype.itemsize
                      + w_eff.size * w_eff.dtype.itemsize
                      + b_eff.size * b_eff.dtype.itemsize + m * npad * 4)

    return pl.pallas_call(
        _equal_linear_kernel,
        out_shape=jax.ShapeDtypeStruct((m, npad), jnp.float32),
        grid=(npad // tn,),
        in_specs=[
            pl.BlockSpec((m, kp), lambda j: (0, 0)),
            pl.BlockSpec((kp, tn), lambda j: (0, j)),
            pl.BlockSpec((1, tn), lambda j: (0, j)),
        ],
        out_specs=pl.BlockSpec((m, tn), lambda j: (0, j)),
        compiler_params=pltpu.CompilerParams(
            dimension_semantics=("parallel",),
            vmem_limit_bytes=vmem_limit),
        cost_estimate=pl.CostEstimate(flops=flops, transcendentals=0,
                                      bytes_accessed=bytes_accessed),
    )(feat, w_eff, b_eff)


# ----------------------------------------------------------------------------
# GradualStyleBlock forward (Pallas path)
# ----------------------------------------------------------------------------
def gradual_style_block_forward(x_nchw, packed_conv, packed_lin, *, out_c,
                                tn, vmem_limit, compute_dtype=jnp.bfloat16):
    x = jnp.transpose(x_nchw, (0, 2, 3, 1)).astype(compute_dtype)   # NCHW -> NHWC
    for (wpk, bp) in packed_conv:
        # Activations stay lane-padded between layers (padded channels are zero,
        # and the next layer's weights were packed with matching zero rows).
        x = conv3x3_s2_lrelu(x, wpk, bp, tn=tn, vmem_limit=vmem_limit)
    n = x.shape[0]
    feat = x.reshape(n, -1)                       # spatial is 1x1 -> (n, coutp)
    w_eff, b_eff = packed_lin
    out = equal_linear(feat, w_eff, b_eff, tn=tn, vmem_limit=vmem_limit)
    return out[:, :out_c]


# ----------------------------------------------------------------------------
# Pure-JAX fp32 reference (module semantics, for verification)
# ----------------------------------------------------------------------------
def reference_forward(x_nchw, conv_params, lin_params, out_c):
    x = x_nchw
    for (w, b) in conv_params:
        x = jax.lax.conv_general_dilated(
            x, w, window_strides=(2, 2), padding=((1, 1), (1, 1)),
            dimension_numbers=("NCHW", "OIHW", "NCHW"))
        x = x + b.reshape(1, -1, 1, 1)
        x = jnp.where(x >= 0, x, LEAKY_SLOPE * x)
    feat = x.reshape(-1, out_c)
    lw, lb = lin_params
    w_eff = lw * (1.0 / np.sqrt(out_c))
    return jnp.dot(feat, w_eff.T) + lb


# ----------------------------------------------------------------------------
# Deterministic parameter init (shapes follow the module's __init__)
# ----------------------------------------------------------------------------
def init_params(key, in_c, out_c, spatial):
    num_pools = int(np.log2(spatial))
    conv_params = []
    cin = in_c
    for _ in range(num_pools):
        key, kw_, kb_ = jax.random.split(key, 3)
        fan_in = cin * 9
        w = jax.random.normal(kw_, (out_c, cin, 3, 3), jnp.float32) / np.sqrt(fan_in)
        b = jax.random.normal(kb_, (out_c,), jnp.float32) * 0.01
        conv_params.append((w, b))
        cin = out_c
    key, kl = jax.random.split(key)
    lin_w = jax.random.normal(kl, (out_c, out_c), jnp.float32)   # randn / lr_mul(=1)
    lin_b = jnp.zeros((out_c,), jnp.float32)                     # bias_init = 0
    return conv_params, (lin_w, lin_b)


if __name__ == "__main__":
    batch, in_c, out_c, spatial = 2, 4, 32, 16   # num_pools = log2(16) = 4 convs

    key = jax.random.PRNGKey(0)
    key, kx = jax.random.split(key)
    x = jax.random.normal(kx, (batch, in_c, spatial, spatial), jnp.float32)  # NCHW

    conv_params, lin_params = init_params(key, in_c, out_c, spatial)
    # Pack/pad weights ONCE (outside the per-forward path).
    packed_conv, packed_lin = prepare_params(conv_params, lin_params, out_c)

    tn, vmem_limit = _device_defaults()
    fwd = jax.jit(functools.partial(gradual_style_block_forward,
                                    out_c=out_c, tn=tn, vmem_limit=vmem_limit))
    out = jax.block_until_ready(fwd(x, packed_conv, packed_lin))

    ref = jax.block_until_ready(
        reference_forward(x, conv_params, lin_params, out_c))

    assert out.shape == (batch, out_c), out.shape
    # Kernel path uses bf16 activations/weights with fp32 accumulation.
    np.testing.assert_allclose(np.asarray(out), np.asarray(ref),
                               rtol=4e-2, atol=4e-2)

    print("KERNEL_OK")
</pallas_src>

<mosaic_0001>
module attributes {stable_mosaic.version = 11 : i64} {
  func.func @_conv_s2d_kernel(%arg0: i32, %arg1: i32, %arg2: memref<1x9x16x128xbf16, #tpu.memory_space<vmem>>, %arg3: memref<4x128x128xbf16, #tpu.memory_space<vmem>>, %arg4: memref<1x128xf32, #tpu.memory_space<vmem>>, %arg5: memref<1x8x8x128xbf16, #tpu.memory_space<vmem>>) attributes {dimension_semantics = [#tpu.dimension_semantics<parallel>, #tpu.dimension_semantics<parallel>], iteration_bounds = array<i64: 2, 1>, scalar_prefetch = 0 : i64, scratch_operands = 0 : i64, tpu.core_type = #tpu.core_type<tc>, window_params = [{transform_indices = @transform_0, window_bounds = array<i64: 1, 9, 16, 128>}, {transform_indices = @transform_1, window_bounds = array<i64: 4, 128, 128>}, {transform_indices = @transform_2, window_bounds = array<i64: 1, 128>}, {transform_indices = @transform_3, window_bounds = array<i64: 1, 8, 8, 128>}]} {
    %cst = arith.constant 0.000000e+00 : f32
    %0 = vector.broadcast %cst : f32 to vector<8x8x128xf32>
    %c0 = arith.constant 0 : index
    %c0_0 = arith.constant 0 : index
    %c0_1 = arith.constant 0 : index
    %c0_2 = arith.constant 0 : index
    %1 = vector.load %arg2[%c0, %c0_0, %c0_1, %c0_2] : memref<1x9x16x128xbf16, #tpu.memory_space<vmem>>, vector<1x8x16x128xbf16>
    %2 = vector.shape_cast %1 : vector<1x8x16x128xbf16> to vector<8x16x128xbf16>
    %3 = vector.shape_cast %2 : vector<8x16x128xbf16> to vector<128x128xbf16>
    %c0_3 = arith.constant 0 : index
    %c0_4 = arith.constant 0 : index
    %c0_5 = arith.constant 0 : index
    %4 = vector.load %arg3[%c0_3, %c0_4, %c0_5] : memref<4x128x128xbf16, #tpu.memory_space<vmem>>, vector<1x128x128xbf16>
    %5 = vector.shape_cast %4 : vector<1x128x128xbf16> to vector<128x128xbf16>
    %cst_6 = arith.constant dense<0.000000e+00> : vector<128x128xf32>
    %6 = tpu.matmul %3, %5, %cst_6 {dimension_numbers = #tpu.dot_dimension_numbers<[1], [0], [0], [1], [0, 0, 1, 1], [], []>} : vector<128x128xbf16>, vector<128x128xbf16>, vector<128x128xf32> -> vector<128x128xf32>
    %7 = vector.shape_cast %6 : vector<128x128xf32> to vector<8x16x128xf32>
    %8 = vector.extract_strided_slice %7 {offsets = [0, 0, 0], sizes = [8, 8, 128], strides = [1, 1, 1]} : vector<8x16x128xf32> to vector<8x8x128xf32>
    %9 = arith.addf %0, %8 : vector<8x8x128xf32>
    %c0_7 = arith.constant 0 : index
    %c0_8 = arith.constant 0 : index
    %c0_9 = arith.constant 0 : index
    %c0_10 = arith.constant 0 : index
    %10 = vector.load %arg2[%c0_7, %c0_8, %c0_9, %c0_10] : memref<1x9x16x128xbf16, #tpu.memory_space<vmem>>, vector<1x8x16x128xbf16>
    %11 = vector.shape_cast %10 : vector<1x8x16x128xbf16> to vector<8x16x128xbf16>
    %12 = vector.shape_cast %11 : vector<8x16x128xbf16> to vector<128x128xbf16>
    %c1 = arith.constant 1 : index
    %c0_11 = arith.constant 0 : index
    %c0_12 = arith.constant 0 : index
    %13 = vector.load %arg3[%c1, %c0_11, %c0_12] : memref<4x128x128xbf16, #tpu.memory_space<vmem>>, vector<1x128x128xbf16>
    %14 = vector.shape_cast %13 : vector<1x128x128xbf16> to vector<128x128xbf16>
    %cst_13 = arith.constant dense<0.000000e+00> : vector<128x128xf32>
    %15 = tpu.matmul %12, %14, %cst_13 {dimension_numbers = #tpu.dot_dimension_numbers<[1], [0], [0], [1], [0, 0, 1, 1], [], []>} : vector<128x128xbf16>, vector<128x128xbf16>, vector<128x128xf32> -> vector<128x128xf32>
    %16 = vector.shape_cast %15 : vector<128x128xf32> to vector<8x16x128xf32>
    %17 = vector.extract_strided_slice %16 {offsets = [0, 1, 0], sizes = [8, 8, 128], strides = [1, 1, 1]} : vector<8x16x128xf32> to vector<8x8x128xf32>
    %18 = arith.addf %9, %17 : vector<8x8x128xf32>
    %c0_14 = arith.constant 0 : index
    %c1_15 = arith.constant 1 : index
    %c0_16 = arith.constant 0 : index
    %c0_17 = arith.constant 0 : index
    %19 = vector.load %arg2[%c0_14, %c1_15, %c0_16, %c0_17] : memref<1x9x16x128xbf16, #tpu.memory_space<vmem>>, vector<1x8x16x128xbf16>
    %20 = vector.shape_cast %19 : vector<1x8x16x128xbf16> to vector<8x16x128xbf16>
    %21 = vector.shape_cast %20 : vector<8x16x128xbf16> to vector<128x128xbf16>
    %c2 = arith.constant 2 : index
    %c0_18 = arith.constant 0 : index
    %c0_19 = arith.constant 0 : index
    %22 = vector.load %arg3[%c2, %c0_18, %c0_19] : memref<4x128x128xbf16, #tpu.memory_space<vmem>>, vector<1x128x128xbf16>
    %23 = vector.shape_cast %22 : vector<1x128x128xbf16> to vector<128x128xbf16>
    %cst_20 = arith.constant dense<0.000000e+00> : vector<128x128xf32>
    %24 = tpu.matmul %21, %23, %cst_20 {dimension_numbers = #tpu.dot_dimension_numbers<[1], [0], [0], [1], [0, 0, 1, 1], [], []>} : vector<128x128xbf16>, vector<128x128xbf16>, vector<128x128xf32> -> vector<128x128xf32>
    %25 = vector.shape_cast %24 : vector<128x128xf32> to vector<8x16x128xf32>
    %26 = vector.extract_strided_slice %25 {offsets = [0, 0, 0], sizes = [8, 8, 128], strides = [1, 1, 1]} : vector<8x16x128xf32> to vector<8x8x128xf32>
    %27 = arith.addf %18, %26 : vector<8x8x128xf32>
    %c0_21 = arith.constant 0 : index
    %c1_22 = arith.constant 1 : index
    %c0_23 = arith.constant 0 : index
    %c0_24 = arith.constant 0 : index
    %28 = vector.load %arg2[%c0_21, %c1_22, %c0_23, %c0_24] : memref<1x9x16x128xbf16, #tpu.memory_space<vmem>>, vector<1x8x16x128xbf16>
    %29 = vector.shape_cast %28 : vector<1x8x16x128xbf16> to vector<8x16x128xbf16>
    %30 = vector.shape_cast %29 : vector<8x16x128xbf16> to vector<128x128xbf16>
    %c3 = arith.constant 3 : index
    %c0_25 = arith.constant 0 : index
    %c0_26 = arith.constant 0 : index
    %31 = vector.load %arg3[%c3, %c0_25, %c0_26] : memref<4x128x128xbf16, #tpu.memory_space<vmem>>, vector<1x128x128xbf16>
    %32 = vector.shape_cast %31 : vector<1x128x128xbf16> to vector<128x128xbf16>
    %cst_27 = arith.constant dense<0.000000e+00> : vector<128x128xf32>
    %33 = tpu.matmul %30, %32, %cst_27 {dimension_numbers = #tpu.dot_dimension_numbers<[1], [0], [0], [1], [0, 0, 1, 1], [], []>} : vector<128x128xbf16>, vector<128x128xbf16>, vector<128x128xf32> -> vector<128x128xf32>
    %34 = vector.shape_cast %33 : vector<128x128xf32> to vector<8x16x128xf32>
    %35 = vector.extract_strided_slice %34 {offsets = [0, 1, 0], sizes = [8, 8, 128], strides = [1, 1, 1]} : vector<8x16x128xf32> to vector<8x8x128xf32>
    %36 = arith.addf %27, %35 : vector<8x8x128xf32>
    %c0_28 = arith.constant 0 : index
    %c0_29 = arith.constant 0 : index
    %37 = vector.load %arg4[%c0_28, %c0_29] : memref<1x128xf32, #tpu.memory_space<vmem>>, vector<1x128xf32>
    %38 = vector.shape_cast %37 : vector<1x128xf32> to vector<1x1x128xf32>
    %39 = vector.broadcast %38 : vector<1x1x128xf32> to vector<8x8x128xf32>
    %40 = arith.addf %36, %39 : vector<8x8x128xf32>
    %cst_30 = arith.constant 0.000000e+00 : f32
    %41 = vector.broadcast %cst_30 : f32 to vector<8x8x128xf32>
    %42 = arith.cmpf oge, %40, %41 : vector<8x8x128xf32>
    %cst_31 = arith.constant 0.00999999977 : f32
    %43 = vector.broadcast %cst_31 : f32 to vector<8x8x128xf32>
    %44 = arith.mulf %43, %40 : vector<8x8x128xf32>
    %45 = arith.select %42, %40, %44 : vector<8x8x128xi1>, vector<8x8x128xf32>
    %46 = arith.truncf %45 : vector<8x8x128xf32> to vector<8x8x128xbf16>
    %c0_32 = arith.constant 0 : index
    %c0_33 = arith.constant 0 : index
    %c0_34 = arith.constant 0 : index
    %c0_35 = arith.constant 0 : index
    %47 = vector.load %arg5[%c0_32, %c0_33, %c0_34, %c0_35] : memref<1x8x8x128xbf16, #tpu.memory_space<vmem>>, vector<1x8x8x128xbf16>
    %48 = vector.shape_cast %47 : vector<1x8x8x128xbf16> to vector<8x8x128xbf16>
    %49 = vector.shape_cast %46 : vector<8x8x128xbf16> to vector<1x8x8x128xbf16>
    tpu.vector_store %arg5[%c0_32, %c0_33, %c0_34, %c0_35], %49 {strides = array<i32>} : memref<1x8x8x128xbf16, #tpu.memory_space<vmem>>, vector<1x8x8x128xbf16>,
    return
  }
  func.func @transform_0(%arg0: i32, %arg1: i32) -> (i32, i32, i32, i32) {
    %c0_i32 = arith.constant 0 : i32
    %c0_i32_0 = arith.constant 0 : i32
    %c0_i32_1 = arith.constant 0 : i32
    %c0_i32_2 = arith.constant 0 : i32
    return %arg0, %c0_i32, %c0_i32_0, %c0_i32_1 : i32, i32, i32, i32
  }
  func.func @transform_1(%arg0: i32, %arg1: i32) -> (i32, i32, i32) {
    %c0_i32 = arith.constant 0 : i32
    %c0_i32_0 = arith.constant 0 : i32
    %c0_i32_1 = arith.constant 0 : i32
    return %c0_i32, %c0_i32_0, %arg1 : i32, i32, i32
  }
  func.func @transform_2(%arg0: i32, %arg1: i32) -> (i32, i32) {
    %c0_i32 = arith.constant 0 : i32
    %c0_i32_0 = arith.constant 0 : i32
    return %c0_i32, %arg1 : i32, i32
  }
  func.func @transform_3(%arg0: i32, %arg1: i32) -> (i32, i32, i32, i32) {
    %c0_i32 = arith.constant 0 : i32
    %c0_i32_0 = arith.constant 0 : i32
    %c0_i32_1 = arith.constant 0 : i32
    return %arg0, %c0_i32, %c0_i32_0, %arg1 : i32, i32, i32, i32
  }
}

module attributes {stable_mosaic.version = 11 : i64} {
  func.func @_conv_s2d_kernel(%arg0: i32, %arg1: i32, %arg2: memref<1x5x8x512xbf16, #tpu.memory_space<vmem>>, %arg3: memref<4x512x128xbf16, #tpu.memory_space<vmem>>, %arg4: memref<1x128xf32, #tpu.memory_space<vmem>>, %arg5: memref<1x4x4x128xbf16, #tpu.memory_space<vmem>>) attributes {dimension_semantics = [#tpu.dimension_semantics<parallel>, #tpu.dimension_semantics<parallel>], iteration_bounds = array<i64: 2, 1>, scalar_prefetch = 0 : i64, scratch_operands = 0 : i64, tpu.core_type = #tpu.core_type<tc>, window_params = [{transform_indices = @transform_0, window_bounds = array<i64: 1, 5, 8, 512>}, {transform_indices = @transform_1, window_bounds = array<i64: 4, 512, 128>}, {transform_indices = @transform_2, window_bounds = array<i64: 1, 128>}, {transform_indices = @transform_3, window_bounds = array<i64: 1, 4, 4, 128>}]} {
    %cst = arith.constant 0.000000e+00 : f32
    %0 = vector.broadcast %cst : f32 to vector<4x4x128xf32>
    %c0 = arith.constant 0 : index
    %c0_0 = arith.constant 0 : index
    %c0_1 = arith.constant 0 : index
    %c0_2 = arith.constant 0 : index
    %1 = vector.load %arg2[%c0, %c0_0, %c0_1, %c0_2] : memref<1x5x8x512xbf16, #tpu.memory_space<vmem>>, vector<1x4x8x512xbf16>
    %2 = vector.shape_cast %1 : vector<1x4x8x512xbf16> to vector<4x8x512xbf16>
    %3 = vector.shape_cast %2 : vector<4x8x512xbf16> to vector<32x512xbf16>
    %c0_3 = arith.constant 0 : index
    %c0_4 = arith.constant 0 : index
    %c0_5 = arith.constant 0 : index
    %4 = vector.load %arg3[%c0_3, %c0_4, %c0_5] : memref<4x512x128xbf16, #tpu.memory_space<vmem>>, vector<1x512x128xbf16>
    %5 = vector.shape_cast %4 : vector<1x512x128xbf16> to vector<512x128xbf16>
    %cst_6 = arith.constant dense<0.000000e+00> : vector<32x128xf32>
    %6 = tpu.matmul %3, %5, %cst_6 {dimension_numbers = #tpu.dot_dimension_numbers<[1], [0], [0], [1], [0, 0, 1, 1], [], []>} : vector<32x512xbf16>, vector<512x128xbf16>, vector<32x128xf32> -> vector<32x128xf32>
    %7 = vector.shape_cast %6 : vector<32x128xf32> to vector<4x8x128xf32>
    %8 = vector.extract_strided_slice %7 {offsets = [0, 0, 0], sizes = [4, 4, 128], strides = [1, 1, 1]} : vector<4x8x128xf32> to vector<4x4x128xf32>
    %9 = arith.addf %0, %8 : vector<4x4x128xf32>
    %c0_7 = arith.constant 0 : index
    %c0_8 = arith.constant 0 : index
    %c0_9 = arith.constant 0 : index
    %c0_10 = arith.constant 0 : index
    %10 = vector.load %arg2[%c0_7, %c0_8, %c0_9, %c0_10] : memref<1x5x8x512xbf16, #tpu.memory_space<vmem>>, vector<1x4x8x512xbf16>
    %11 = vector.shape_cast %10 : vector<1x4x8x512xbf16> to vector<4x8x512xbf16>
    %12 = vector.shape_cast %11 : vector<4x8x512xbf16> to vector<32x512xbf16>
    %c1 = arith.constant 1 : index
    %c0_11 = arith.constant 0 : index
    %c0_12 = arith.constant 0 : index
    %13 = vector.load %arg3[%c1, %c0_11, %c0_12] : memref<4x512x128xbf16, #tpu.memory_space<vmem>>, vector<1x512x128xbf16>
    %14 = vector.shape_cast %13 : vector<1x512x128xbf16> to vector<512x128xbf16>
    %cst_13 = arith.constant dense<0.000000e+00> : vector<32x128xf32>
    %15 = tpu.matmul %12, %14, %cst_13 {dimension_numbers = #tpu.dot_dimension_numbers<[1], [0], [0], [1], [0, 0, 1, 1], [], []>} : vector<32x512xbf16>, vector<512x128xbf16>, vector<32x128xf32> -> vector<32x128xf32>
    %16 = vector.shape_cast %15 : vector<32x128xf32> to vector<4x8x128xf32>
    %17 = vector.extract_strided_slice %16 {offsets = [0, 1, 0], sizes = [4, 4, 128], strides = [1, 1, 1]} : vector<4x8x128xf32> to vector<4x4x128xf32>
    %18 = arith.addf %9, %17 : vector<4x4x128xf32>
    %c0_14 = arith.constant 0 : index
    %c1_15 = arith.constant 1 : index
    %c0_16 = arith.constant 0 : index
    %c0_17 = arith.constant 0 : index
    %19 = vector.load %arg2[%c0_14, %c1_15, %c0_16, %c0_17] : memref<1x5x8x512xbf16, #tpu.memory_space<vmem>>, vector<1x4x8x512xbf16>
    %20 = vector.shape_cast %19 : vector<1x4x8x512xbf16> to vector<4x8x512xbf16>
    %21 = vector.shape_cast %20 : vector<4x8x512xbf16> to vector<32x512xbf16>
    %c2 = arith.constant 2 : index
    %c0_18 = arith.constant 0 : index
    %c0_19 = arith.constant 0 : index
    %22 = vector.load %arg3[%c2, %c0_18, %c0_19] : memref<4x512x128xbf16, #tpu.memory_space<vmem>>, vector<1x512x128xbf16>
    %23 = vector.shape_cast %22 : vector<1x512x128xbf16> to vector<512x128xbf16>
    %cst_20 = arith.constant dense<0.000000e+00> : vector<32x128xf32>
    %24 = tpu.matmul %21, %23, %cst_20 {dimension_numbers = #tpu.dot_dimension_numbers<[1], [0], [0], [1], [0, 0, 1, 1], [], []>} : vector<32x512xbf16>, vector<512x128xbf16>, vector<32x128xf32> -> vector<32x128xf32>
    %25 = vector.shape_cast %24 : vector<32x128xf32> to vector<4x8x128xf32>
    %26 = vector.extract_strided_slice %25 {offsets = [0, 0, 0], sizes = [4, 4, 128], strides = [1, 1, 1]} : vector<4x8x128xf32> to vector<4x4x128xf32>
    %27 = arith.addf %18, %26 : vector<4x4x128xf32>
    %c0_21 = arith.constant 0 : index
    %c1_22 = arith.constant 1 : index
    %c0_23 = arith.constant 0 : index
    %c0_24 = arith.constant 0 : index
    %28 = vector.load %arg2[%c0_21, %c1_22, %c0_23, %c0_24] : memref<1x5x8x512xbf16, #tpu.memory_space<vmem>>, vector<1x4x8x512xbf16>
    %29 = vector.shape_cast %28 : vector<1x4x8x512xbf16> to vector<4x8x512xbf16>
    %30 = vector.shape_cast %29 : vector<4x8x512xbf16> to vector<32x512xbf16>
    %c3 = arith.constant 3 : index
    %c0_25 = arith.constant 0 : index
    %c0_26 = arith.constant 0 : index
    %31 = vector.load %arg3[%c3, %c0_25, %c0_26] : memref<4x512x128xbf16, #tpu.memory_space<vmem>>, vector<1x512x128xbf16>
    %32 = vector.shape_cast %31 : vector<1x512x128xbf16> to vector<512x128xbf16>
    %cst_27 = arith.constant dense<0.000000e+00> : vector<32x128xf32>
    %33 = tpu.matmul %30, %32, %cst_27 {dimension_numbers = #tpu.dot_dimension_numbers<[1], [0], [0], [1], [0, 0, 1, 1], [], []>} : vector<32x512xbf16>, vector<512x128xbf16>, vector<32x128xf32> -> vector<32x128xf32>
    %34 = vector.shape_cast %33 : vector<32x128xf32> to vector<4x8x128xf32>
    %35 = vector.extract_strided_slice %34 {offsets = [0, 1, 0], sizes = [4, 4, 128], strides = [1, 1, 1]} : vector<4x8x128xf32> to vector<4x4x128xf32>
    %36 = arith.addf %27, %35 : vector<4x4x128xf32>
    %c0_28 = arith.constant 0 : index
    %c0_29 = arith.constant 0 : index
    %37 = vector.load %arg4[%c0_28, %c0_29] : memref<1x128xf32, #tpu.memory_space<vmem>>, vector<1x128xf32>
    %38 = vector.shape_cast %37 : vector<1x128xf32> to vector<1x1x128xf32>
    %39 = vector.broadcast %38 : vector<1x1x128xf32> to vector<4x4x128xf32>
    %40 = arith.addf %36, %39 : vector<4x4x128xf32>
    %cst_30 = arith.constant 0.000000e+00 : f32
    %41 = vector.broadcast %cst_30 : f32 to vector<4x4x128xf32>
    %42 = arith.cmpf oge, %40, %41 : vector<4x4x128xf32>
    %cst_31 = arith.constant 0.00999999977 : f32
    %43 = vector.broadcast %cst_31 : f32 to vector<4x4x128xf32>
    %44 = arith.mulf %43, %40 : vector<4x4x128xf32>
    %45 = arith.select %42, %40, %44 : vector<4x4x128xi1>, vector<4x4x128xf32>
    %46 = arith.truncf %45 : vector<4x4x128xf32> to vector<4x4x128xbf16>
    %c0_32 = arith.constant 0 : index
    %c0_33 = arith.constant 0 : index
    %c0_34 = arith.constant 0 : index
    %c0_35 = arith.constant 0 : index
    %47 = vector.load %arg5[%c0_32, %c0_33, %c0_34, %c0_35] : memref<1x4x4x128xbf16, #tpu.memory_space<vmem>>, vector<1x4x4x128xbf16>
    %48 = vector.shape_cast %47 : vector<1x4x4x128xbf16> to vector<4x4x128xbf16>
    %49 = vector.shape_cast %46 : vector<4x4x128xbf16> to vector<1x4x4x128xbf16>
    tpu.vector_store %arg5[%c0_32, %c0_33, %c0_34, %c0_35], %49 {strides = array<i32>} : memref<1x4x4x128xbf16, #tpu.memory_space<vmem>>, vector<1x4x4x128xbf16>,
    return
  }
  func.func @transform_0(%arg0: i32, %arg1: i32) -> (i32, i32, i32, i32) {
    %c0_i32 = arith.constant 0 : i32
    %c0_i32_0 = arith.constant 0 : i32
    %c0_i32_1 = arith.constant 0 : i32
    %c0_i32_2 = arith.constant 0 : i32
    return %arg0, %c0_i32, %c0_i32_0, %c0_i32_1 : i32, i32, i32, i32
  }
  func.func @transform_1(%arg0: i32, %arg1: i32) -> (i32, i32, i32) {
    %c0_i32 = arith.constant 0 : i32
    %c0_i32_0 = arith.constant 0 : i32
    %c0_i32_1 = arith.constant 0 : i32
    return %c0_i32, %c0_i32_0, %arg1 : i32, i32, i32
  }
  func.func @transform_2(%arg0: i32, %arg1: i32) -> (i32, i32) {
    %c0_i32 = arith.constant 0 : i32
    %c0_i32_0 = arith.constant 0 : i32
    return %c0_i32, %arg1 : i32, i32
  }
  func.func @transform_3(%arg0: i32, %arg1: i32) -> (i32, i32, i32, i32) {
    %c0_i32 = arith.constant 0 : i32
    %c0_i32_0 = arith.constant 0 : i32
    %c0_i32_1 = arith.constant 0 : i32
    return %arg0, %c0_i32, %c0_i32_0, %arg1 : i32, i32, i32, i32
  }
}

module attributes {stable_mosaic.version = 11 : i64} {
  func.func @_conv_s2d_kernel(%arg0: i32, %arg1: i32, %arg2: memref<1x3x8x512xbf16, #tpu.memory_space<vmem>>, %arg3: memref<4x512x128xbf16, #tpu.memory_space<vmem>>, %arg4: memref<1x128xf32, #tpu.memory_space<vmem>>, %arg5: memref<1x2x2x128xbf16, #tpu.memory_space<vmem>>) attributes {dimension_semantics = [#tpu.dimension_semantics<parallel>, #tpu.dimension_semantics<parallel>], iteration_bounds = array<i64: 2, 1>, scalar_prefetch = 0 : i64, scratch_operands = 0 : i64, tpu.core_type = #tpu.core_type<tc>, window_params = [{transform_indices = @transform_0, window_bounds = array<i64: 1, 3, 8, 512>}, {transform_indices = @transform_1, window_bounds = array<i64: 4, 512, 128>}, {transform_indices = @transform_2, window_bounds = array<i64: 1, 128>}, {transform_indices = @transform_3, window_bounds = array<i64: 1, 2, 2, 128>}]} {
    %cst = arith.constant 0.000000e+00 : f32
    %0 = vector.broadcast %cst : f32 to vector<2x2x128xf32>
    %c0 = arith.constant 0 : index
    %c0_0 = arith.constant 0 : index
    %c0_1 = arith.constant 0 : index
    %c0_2 = arith.constant 0 : index
    %1 = vector.load %arg2[%c0, %c0_0, %c0_1, %c0_2] : memref<1x3x8x512xbf16, #tpu.memory_space<vmem>>, vector<1x2x8x512xbf16>
    %2 = vector.shape_cast %1 : vector<1x2x8x512xbf16> to vector<2x8x512xbf16>
    %3 = vector.shape_cast %2 : vector<2x8x512xbf16> to vector<16x512xbf16>
    %c0_3 = arith.constant 0 : index
    %c0_4 = arith.constant 0 : index
    %c0_5 = arith.constant 0 : index
    %4 = vector.load %arg3[%c0_3, %c0_4, %c0_5] : memref<4x512x128xbf16, #tpu.memory_space<vmem>>, vector<1x512x128xbf16>
    %5 = vector.shape_cast %4 : vector<1x512x128xbf16> to vector<512x128xbf16>
    %cst_6 = arith.constant dense<0.000000e+00> : vector<16x128xf32>
    %6 = tpu.matmul %3, %5, %cst_6 {dimension_numbers = #tpu.dot_dimension_numbers<[1], [0], [0], [1], [0, 0, 1, 1], [], []>} : vector<16x512xbf16>, vector<512x128xbf16>, vector<16x128xf32> -> vector<16x128xf32>
    %7 = vector.shape_cast %6 : vector<16x128xf32> to vector<2x8x128xf32>
    %8 = vector.extract_strided_slice %7 {offsets = [0, 0, 0], sizes = [2, 2, 128], strides = [1, 1, 1]} : vector<2x8x128xf32> to vector<2x2x128xf32>
    %9 = arith.addf %0, %8 : vector<2x2x128xf32>
    %c0_7 = arith.constant 0 : index
    %c0_8 = arith.constant 0 : index
    %c0_9 = arith.constant 0 : index
    %c0_10 = arith.constant 0 : index
    %10 = vector.load %arg2[%c0_7, %c0_8, %c0_9, %c0_10] : memref<1x3x8x512xbf16, #tpu.memory_space<vmem>>, vector<1x2x8x512xbf16>
    %11 = vector.shape_cast %10 : vector<1x2x8x512xbf16> to vector<2x8x512xbf16>
    %12 = vector.shape_cast %11 : vector<2x8x512xbf16> to vector<16x512xbf16>
    %c1 = arith.constant 1 : index
    %c0_11 = arith.constant 0 : index
    %c0_12 = arith.constant 0 : index
    %13 = vector.load %arg3[%c1, %c0_11, %c0_12] : memref<4x512x128xbf16, #tpu.memory_space<vmem>>, vector<1x512x128xbf16>
    %14 = vector.shape_cast %13 : vector<1x512x128xbf16> to vector<512x128xbf16>
    %cst_13 = arith.constant dense<0.000000e+00> : vector<16x128xf32>
    %15 = tpu.matmul %12, %14, %cst_13 {dimension_numbers = #tpu.dot_dimension_numbers<[1], [0], [0], [1], [0, 0, 1, 1], [], []>} : vector<16x512xbf16>, vector<512x128xbf16>, vector<16x128xf32> -> vector<16x128xf32>
    %16 = vector.shape_cast %15 : vector<16x128xf32> to vector<2x8x128xf32>
    %17 = vector.extract_strided_slice %16 {offsets = [0, 1, 0], sizes = [2, 2, 128], strides = [1, 1, 1]} : vector<2x8x128xf32> to vector<2x2x128xf32>
    %18 = arith.addf %9, %17 : vector<2x2x128xf32>
    %c0_14 = arith.constant 0 : index
    %c1_15 = arith.constant 1 : index
    %c0_16 = arith.constant 0 : index
    %c0_17 = arith.constant 0 : index
    %19 = vector.load %arg2[%c0_14, %c1_15, %c0_16, %c0_17] : memref<1x3x8x512xbf16, #tpu.memory_space<vmem>>, vector<1x2x8x512xbf16>
    %20 = vector.shape_cast %19 : vector<1x2x8x512xbf16> to vector<2x8x512xbf16>
    %21 = vector.shape_cast %20 : vector<2x8x512xbf16> to vector<16x512xbf16>
    %c2 = arith.constant 2 : index
    %c0_18 = arith.constant 0 : index
    %c0_19 = arith.constant 0 : index
    %22 = vector.load %arg3[%c2, %c0_18, %c0_19] : memref<4x512x128xbf16, #tpu.memory_space<vmem>>, vector<1x512x128xbf16>
    %23 = vector.shape_cast %22 : vector<1x512x128xbf16> to vector<512x128xbf16>
    %cst_20 = arith.constant dense<0.000000e+00> : vector<16x128xf32>
    %24 = tpu.matmul %21, %23, %cst_20 {dimension_numbers = #tpu.dot_dimension_numbers<[1], [0], [0], [1], [0, 0, 1, 1], [], []>} : vector<16x512xbf16>, vector<512x128xbf16>, vector<16x128xf32> -> vector<16x128xf32>
    %25 = vector.shape_cast %24 : vector<16x128xf32> to vector<2x8x128xf32>
    %26 = vector.extract_strided_slice %25 {offsets = [0, 0, 0], sizes = [2, 2, 128], strides = [1, 1, 1]} : vector<2x8x128xf32> to vector<2x2x128xf32>
    %27 = arith.addf %18, %26 : vector<2x2x128xf32>
    %c0_21 = arith.constant 0 : index
    %c1_22 = arith.constant 1 : index
    %c0_23 = arith.constant 0 : index
    %c0_24 = arith.constant 0 : index
    %28 = vector.load %arg2[%c0_21, %c1_22, %c0_23, %c0_24] : memref<1x3x8x512xbf16, #tpu.memory_space<vmem>>, vector<1x2x8x512xbf16>
    %29 = vector.shape_cast %28 : vector<1x2x8x512xbf16> to vector<2x8x512xbf16>
    %30 = vector.shape_cast %29 : vector<2x8x512xbf16> to vector<16x512xbf16>
    %c3 = arith.constant 3 : index
    %c0_25 = arith.constant 0 : index
    %c0_26 = arith.constant 0 : index
    %31 = vector.load %arg3[%c3, %c0_25, %c0_26] : memref<4x512x128xbf16, #tpu.memory_space<vmem>>, vector<1x512x128xbf16>
    %32 = vector.shape_cast %31 : vector<1x512x128xbf16> to vector<512x128xbf16>
    %cst_27 = arith.constant dense<0.000000e+00> : vector<16x128xf32>
    %33 = tpu.matmul %30, %32, %cst_27 {dimension_numbers = #tpu.dot_dimension_numbers<[1], [0], [0], [1], [0, 0, 1, 1], [], []>} : vector<16x512xbf16>, vector<512x128xbf16>, vector<16x128xf32> -> vector<16x128xf32>
    %34 = vector.shape_cast %33 : vector<16x128xf32> to vector<2x8x128xf32>
    %35 = vector.extract_strided_slice %34 {offsets = [0, 1, 0], sizes = [2, 2, 128], strides = [1, 1, 1]} : vector<2x8x128xf32> to vector<2x2x128xf32>
    %36 = arith.addf %27, %35 : vector<2x2x128xf32>
    %c0_28 = arith.constant 0 : index
    %c0_29 = arith.constant 0 : index
    %37 = vector.load %arg4[%c0_28, %c0_29] : memref<1x128xf32, #tpu.memory_space<vmem>>, vector<1x128xf32>
    %38 = vector.shape_cast %37 : vector<1x128xf32> to vector<1x1x128xf32>
    %39 = vector.broadcast %38 : vector<1x1x128xf32> to vector<2x2x128xf32>
    %40 = arith.addf %36, %39 : vector<2x2x128xf32>
    %cst_30 = arith.constant 0.000000e+00 : f32
    %41 = vector.broadcast %cst_30 : f32 to vector<2x2x128xf32>
    %42 = arith.cmpf oge, %40, %41 : vector<2x2x128xf32>
    %cst_31 = arith.constant 0.00999999977 : f32
    %43 = vector.broadcast %cst_31 : f32 to vector<2x2x128xf32>
    %44 = arith.mulf %43, %40 : vector<2x2x128xf32>
    %45 = arith.select %42, %40, %44 : vector<2x2x128xi1>, vector<2x2x128xf32>
    %46 = arith.truncf %45 : vector<2x2x128xf32> to vector<2x2x128xbf16>
    %c0_32 = arith.constant 0 : index
    %c0_33 = arith.constant 0 : index
    %c0_34 = arith.constant 0 : index
    %c0_35 = arith.constant 0 : index
    %47 = vector.load %arg5[%c0_32, %c0_33, %c0_34, %c0_35] : memref<1x2x2x128xbf16, #tpu.memory_space<vmem>>, vector<1x2x2x128xbf16>
    %48 = vector.shape_cast %47 : vector<1x2x2x128xbf16> to vector<2x2x128xbf16>
    %49 = vector.shape_cast %46 : vector<2x2x128xbf16> to vector<1x2x2x128xbf16>
    tpu.vector_store %arg5[%c0_32, %c0_33, %c0_34, %c0_35], %49 {strides = array<i32>} : memref<1x2x2x128xbf16, #tpu.memory_space<vmem>>, vector<1x2x2x128xbf16>,
    return
  }
  func.func @transform_0(%arg0: i32, %arg1: i32) -> (i32, i32, i32, i32) {
    %c0_i32 = arith.constant 0 : i32
    %c0_i32_0 = arith.constant 0 : i32
    %c0_i32_1 = arith.constant 0 : i32
    %c0_i32_2 = arith.constant 0 : i32
    return %arg0, %c0_i32, %c0_i32_0, %c0_i32_1 : i32, i32, i32, i32
  }
  func.func @transform_1(%arg0: i32, %arg1: i32) -> (i32, i32, i32) {
    %c0_i32 = arith.constant 0 : i32
    %c0_i32_0 = arith.constant 0 : i32
    %c0_i32_1 = arith.constant 0 : i32
    return %c0_i32, %c0_i32_0, %arg1 : i32, i32, i32
  }
  func.func @transform_2(%arg0: i32, %arg1: i32) -> (i32, i32) {
    %c0_i32 = arith.constant 0 : i32
    %c0_i32_0 = arith.constant 0 : i32
    return %c0_i32, %arg1 : i32, i32
  }
  func.func @transform_3(%arg0: i32, %arg1: i32) -> (i32, i32, i32, i32) {
    %c0_i32 = arith.constant 0 : i32
    %c0_i32_0 = arith.constant 0 : i32
    %c0_i32_1 = arith.constant 0 : i32
    return %arg0, %c0_i32, %c0_i32_0, %arg1 : i32, i32, i32, i32
  }
}

module attributes {stable_mosaic.version = 11 : i64} {
  func.func @_equal_linear_kernel(%arg0: i32, %arg1: memref<2x128xbf16, #tpu.memory_space<vmem>>, %arg2: memref<128x128xbf16, #tpu.memory_space<vmem>>, %arg3: memref<1x128xf32, #tpu.memory_space<vmem>>, %arg4: memref<2x128xf32, #tpu.memory_space<vmem>>) attributes {dimension_semantics = [#tpu.dimension_semantics<parallel>], iteration_bounds = array<i64: 1>, scalar_prefetch = 0 : i64, scratch_operands = 0 : i64, tpu.core_type = #tpu.core_type<tc>, window_params = [{pipeline_mode = #tpu.pipeline_mode<synchronous>, transform_indices = @transform_0, window_bounds = array<i64: 2, 128>}, {transform_indices = @transform_1, window_bounds = array<i64: 128, 128>}, {transform_indices = @transform_2, window_bounds = array<i64: 1, 128>}, {transform_indices = @transform_3, window_bounds = array<i64: 2, 128>}]} {
    %c0 = arith.constant 0 : index
    %c0_0 = arith.constant 0 : index
    %0 = vector.load %arg1[%c0, %c0_0] : memref<2x128xbf16, #tpu.memory_space<vmem>>, vector<2x128xbf16>
    %c0_1 = arith.constant 0 : index
    %c0_2 = arith.constant 0 : index
    %1 = vector.load %arg2[%c0_1, %c0_2] : memref<128x128xbf16, #tpu.memory_space<vmem>>, vector<128x128xbf16>
    %cst = arith.constant dense<0.000000e+00> : vector<2x128xf32>
    %2 = tpu.matmul %0, %1, %cst {dimension_numbers = #tpu.dot_dimension_numbers<[1], [0], [0], [1], [0, 0, 1, 1], [], []>} : vector<2x128xbf16>, vector<128x128xbf16>, vector<2x128xf32> -> vector<2x128xf32>
    %c0_3 = arith.constant 0 : index
    %c0_4 = arith.constant 0 : index
    %3 = vector.load %arg3[%c0_3, %c0_4] : memref<1x128xf32, #tpu.memory_space<vmem>>, vector<1x128xf32>
    %4 = vector.broadcast %3 : vector<1x128xf32> to vector<2x128xf32>
    %5 = arith.addf %2, %4 : vector<2x128xf32>
    %c0_5 = arith.constant 0 : index
    %c0_6 = arith.constant 0 : index
    %6 = vector.load %arg4[%c0_5, %c0_6] : memref<2x128xf32, #tpu.memory_space<vmem>>, vector<2x128xf32>
    tpu.vector_store %arg4[%c0_5, %c0_6], %5 {strides = array<i32>} : memref<2x128xf32, #tpu.memory_space<vmem>>, vector<2x128xf32>,
    return
  }
  func.func @transform_0(%arg0: i32) -> (i32, i32) {
    %c0_i32 = arith.constant 0 : i32
    %c0_i32_0 = arith.constant 0 : i32
    %c0_i32_1 = arith.constant 0 : i32
    return %c0_i32, %c0_i32_0 : i32, i32
  }
  func.func @transform_1(%arg0: i32) -> (i32, i32) {
    %c0_i32 = arith.constant 0 : i32
    %c0_i32_0 = arith.constant 0 : i32
    return %c0_i32, %arg0 : i32, i32
  }
  func.func @transform_2(%arg0: i32) -> (i32, i32) {
    %c0_i32 = arith.constant 0 : i32
    %c0_i32_0 = arith.constant 0 : i32
    return %c0_i32, %arg0 : i32, i32
  }
  func.func @transform_3(%arg0: i32) -> (i32, i32) {
    %c0_i32 = arith.constant 0 : i32
    %c0_i32_0 = arith.constant 0 : i32
    return %c0_i32, %arg0 : i32, i32
  }
}

module attributes {stable_mosaic.version = 11 : i64} {
  func.func @_conv_s2d_kernel(%arg0: i32, %arg1: i32, %arg2: memref<1x2x8x512xbf16, #tpu.memory_space<vmem>>, %arg3: memref<4x512x128xbf16, #tpu.memory_space<vmem>>, %arg4: memref<1x128xf32, #tpu.memory_space<vmem>>, %arg5: memref<1x1x1x128xbf16, #tpu.memory_space<vmem>>) attributes {dimension_semantics = [#tpu.dimension_semantics<parallel>, #tpu.dimension_semantics<parallel>], iteration_bounds = array<i64: 2, 1>, scalar_prefetch = 0 : i64, scratch_operands = 0 : i64, tpu.core_type = #tpu.core_type<tc>, window_params = [{transform_indices = @transform_0, window_bounds = array<i64: 1, 2, 8, 512>}, {transform_indices = @transform_1, window_bounds = array<i64: 4, 512, 128>}, {transform_indices = @transform_2, window_bounds = array<i64: 1, 128>}, {transform_indices = @transform_3, window_bounds = array<i64: 1, 1, 1, 128>}]} {
    %cst = arith.constant 0.000000e+00 : f32
    %0 = vector.broadcast %cst : f32 to vector<1x1x128xf32>
    %c0 = arith.constant 0 : index
    %c0_0 = arith.constant 0 : index
    %c0_1 = arith.constant 0 : index
    %c0_2 = arith.constant 0 : index
    %1 = vector.load %arg2[%c0, %c0_0, %c0_1, %c0_2] : memref<1x2x8x512xbf16, #tpu.memory_space<vmem>>, vector<1x1x8x512xbf16>
    %2 = vector.shape_cast %1 : vector<1x1x8x512xbf16> to vector<1x8x512xbf16>
    %3 = vector.shape_cast %2 : vector<1x8x512xbf16> to vector<8x512xbf16>
    %c0_3 = arith.constant 0 : index
    %c0_4 = arith.constant 0 : index
    %c0_5 = arith.constant 0 : index
    %4 = vector.load %arg3[%c0_3, %c0_4, %c0_5] : memref<4x512x128xbf16, #tpu.memory_space<vmem>>, vector<1x512x128xbf16>
    %5 = vector.shape_cast %4 : vector<1x512x128xbf16> to vector<512x128xbf16>
    %cst_6 = arith.constant dense<0.000000e+00> : vector<8x128xf32>
    %6 = tpu.matmul %3, %5, %cst_6 {dimension_numbers = #tpu.dot_dimension_numbers<[1], [0], [0], [1], [0, 0, 1, 1], [], []>} : vector<8x512xbf16>, vector<512x128xbf16>, vector<8x128xf32> -> vector<8x128xf32>
    %7 = vector.shape_cast %6 : vector<8x128xf32> to vector<1x8x128xf32>
    %8 = vector.extract_strided_slice %7 {offsets = [0, 0, 0], sizes = [1, 1, 128], strides = [1, 1, 1]} : vector<1x8x128xf32> to vector<1x1x128xf32>
    %9 = arith.addf %0, %8 : vector<1x1x128xf32>
    %c0_7 = arith.constant 0 : index
    %c0_8 = arith.constant 0 : index
    %c0_9 = arith.constant 0 : index
    %c0_10 = arith.constant 0 : index
    %10 = vector.load %arg2[%c0_7, %c0_8, %c0_9, %c0_10] : memref<1x2x8x512xbf16, #tpu.memory_space<vmem>>, vector<1x1x8x512xbf16>
    %11 = vector.shape_cast %10 : vector<1x1x8x512xbf16> to vector<1x8x512xbf16>
    %12 = vector.shape_cast %11 : vector<1x8x512xbf16> to vector<8x512xbf16>
    %c1 = arith.constant 1 : index
    %c0_11 = arith.constant 0 : index
    %c0_12 = arith.constant 0 : index
    %13 = vector.load %arg3[%c1, %c0_11, %c0_12] : memref<4x512x128xbf16, #tpu.memory_space<vmem>>, vector<1x512x128xbf16>
    %14 = vector.shape_cast %13 : vector<1x512x128xbf16> to vector<512x128xbf16>
    %cst_13 = arith.constant dense<0.000000e+00> : vector<8x128xf32>
    %15 = tpu.matmul %12, %14, %cst_13 {dimension_numbers = #tpu.dot_dimension_numbers<[1], [0], [0], [1], [0, 0, 1, 1], [], []>} : vector<8x512xbf16>, vector<512x128xbf16>, vector<8x128xf32> -> vector<8x128xf32>
    %16 = vector.shape_cast %15 : vector<8x128xf32> to vector<1x8x128xf32>
    %17 = vector.extract_strided_slice %16 {offsets = [0, 1, 0], sizes = [1, 1, 128], strides = [1, 1, 1]} : vector<1x8x128xf32> to vector<1x1x128xf32>
    %18 = arith.addf %9, %17 : vector<1x1x128xf32>
    %c0_14 = arith.constant 0 : index
    %c1_15 = arith.constant 1 : index
    %c0_16 = arith.constant 0 : index
    %c0_17 = arith.constant 0 : index
    %19 = vector.load %arg2[%c0_14, %c1_15, %c0_16, %c0_17] : memref<1x2x8x512xbf16, #tpu.memory_space<vmem>>, vector<1x1x8x512xbf16>
    %20 = vector.shape_cast %19 : vector<1x1x8x512xbf16> to vector<1x8x512xbf16>
    %21 = vector.shape_cast %20 : vector<1x8x512xbf16> to vector<8x512xbf16>
    %c2 = arith.constant 2 : index
    %c0_18 = arith.constant 0 : index
    %c0_19 = arith.constant 0 : index
    %22 = vector.load %arg3[%c2, %c0_18, %c0_19] : memref<4x512x128xbf16, #tpu.memory_space<vmem>>, vector<1x512x128xbf16>
    %23 = vector.shape_cast %22 : vector<1x512x128xbf16> to vector<512x128xbf16>
    %cst_20 = arith.constant dense<0.000000e+00> : vector<8x128xf32>
    %24 = tpu.matmul %21, %23, %cst_20 {dimension_numbers = #tpu.dot_dimension_numbers<[1], [0], [0], [1], [0, 0, 1, 1], [], []>} : vector<8x512xbf16>, vector<512x128xbf16>, vector<8x128xf32> -> vector<8x128xf32>
    %25 = vector.shape_cast %24 : vector<8x128xf32> to vector<1x8x128xf32>
    %26 = vector.extract_strided_slice %25 {offsets = [0, 0, 0], sizes = [1, 1, 128], strides = [1, 1, 1]} : vector<1x8x128xf32> to vector<1x1x128xf32>
    %27 = arith.addf %18, %26 : vector<1x1x128xf32>
    %c0_21 = arith.constant 0 : index
    %c1_22 = arith.constant 1 : index
    %c0_23 = arith.constant 0 : index
    %c0_24 = arith.constant 0 : index
    %28 = vector.load %arg2[%c0_21, %c1_22, %c0_23, %c0_24] : memref<1x2x8x512xbf16, #tpu.memory_space<vmem>>, vector<1x1x8x512xbf16>
    %29 = vector.shape_cast %28 : vector<1x1x8x512xbf16> to vector<1x8x512xbf16>
    %30 = vector.shape_cast %29 : vector<1x8x512xbf16> to vector<8x512xbf16>
    %c3 = arith.constant 3 : index
    %c0_25 = arith.constant 0 : index
    %c0_26 = arith.constant 0 : index
    %31 = vector.load %arg3[%c3, %c0_25, %c0_26] : memref<4x512x128xbf16, #tpu.memory_space<vmem>>, vector<1x512x128xbf16>
    %32 = vector.shape_cast %31 : vector<1x512x128xbf16> to vector<512x128xbf16>
    %cst_27 = arith.constant dense<0.000000e+00> : vector<8x128xf32>
    %33 = tpu.matmul %30, %32, %cst_27 {dimension_numbers = #tpu.dot_dimension_numbers<[1], [0], [0], [1], [0, 0, 1, 1], [], []>} : vector<8x512xbf16>, vector<512x128xbf16>, vector<8x128xf32> -> vector<8x128xf32>
    %34 = vector.shape_cast %33 : vector<8x128xf32> to vector<1x8x128xf32>
    %35 = vector.extract_strided_slice %34 {offsets = [0, 1, 0], sizes = [1, 1, 128], strides = [1, 1, 1]} : vector<1x8x128xf32> to vector<1x1x128xf32>
    %36 = arith.addf %27, %35 : vector<1x1x128xf32>
    %c0_28 = arith.constant 0 : index
    %c0_29 = arith.constant 0 : index
    %37 = vector.load %arg4[%c0_28, %c0_29] : memref<1x128xf32, #tpu.memory_space<vmem>>, vector<1x128xf32>
    %38 = vector.shape_cast %37 : vector<1x128xf32> to vector<1x1x128xf32>
    %39 = arith.addf %36, %38 : vector<1x1x128xf32>
    %cst_30 = arith.constant 0.000000e+00 : f32
    %40 = vector.broadcast %cst_30 : f32 to vector<1x1x128xf32>
    %41 = arith.cmpf oge, %39, %40 : vector<1x1x128xf32>
    %cst_31 = arith.constant 0.00999999977 : f32
    %42 = vector.broadcast %cst_31 : f32 to vector<1x1x128xf32>
    %43 = arith.mulf %42, %39 : vector<1x1x128xf32>
    %44 = arith.select %41, %39, %43 : vector<1x1x128xi1>, vector<1x1x128xf32>
    %45 = arith.truncf %44 : vector<1x1x128xf32> to vector<1x1x128xbf16>
    %c0_32 = arith.constant 0 : index
    %c0_33 = arith.constant 0 : index
    %c0_34 = arith.constant 0 : index
    %c0_35 = arith.constant 0 : index
    %46 = vector.load %arg5[%c0_32, %c0_33, %c0_34, %c0_35] : memref<1x1x1x128xbf16, #tpu.memory_space<vmem>>, vector<1x1x1x128xbf16>
    %47 = vector.shape_cast %46 : vector<1x1x1x128xbf16> to vector<1x1x128xbf16>
    %48 = vector.shape_cast %45 : vector<1x1x128xbf16> to vector<1x1x1x128xbf16>
    tpu.vector_store %arg5[%c0_32, %c0_33, %c0_34, %c0_35], %48 {strides = array<i32>} : memref<1x1x1x128xbf16, #tpu.memory_space<vmem>>, vector<1x1x1x128xbf16>,
    return
  }
  func.func @transform_0(%arg0: i32, %arg1: i32) -> (i32, i32, i32, i32) {
    %c0_i32 = arith.constant 0 : i32
    %c0_i32_0 = arith.constant 0 : i32
    %c0_i32_1 = arith.constant 0 : i32
    %c0_i32_2 = arith.constant 0 : i32
    return %arg0, %c0_i32, %c0_i32_0, %c0_i32_1 : i32, i32, i32, i32
  }
  func.func @transform_1(%arg0: i32, %arg1: i32) -> (i32, i32, i32) {
    %c0_i32 = arith.constant 0 : i32
    %c0_i32_0 = arith.constant 0 : i32
    %c0_i32_1 = arith.constant 0 : i32
    return %c0_i32, %c0_i32_0, %arg1 : i32, i32, i32
  }
  func.func @transform_2(%arg0: i32, %arg1: i32) -> (i32, i32) {
    %c0_i32 = arith.constant 0 : i32
    %c0_i32_0 = arith.constant 0 : i32
    return %c0_i32, %arg1 : i32, i32
  }
  func.func @transform_3(%arg0: i32, %arg1: i32) -> (i32, i32, i32, i32) {
    %c0_i32 = arith.constant 0 : i32
    %c0_i32_0 = arith.constant 0 : i32
    %c0_i32_1 = arith.constant 0 : i32
    return %arg0, %c0_i32, %c0_i32_0, %arg1 : i32, i32, i32, i32
  }
}

</mosaic_0001>

<bundles_post_ra>
// kernel: gradual_style_block_forward.5
= control target key start
LH: loop header
LB: loop body
LE: loop exit
PB: predicated region body
PF: predicated region fallthrough
CT: control target
= control target key end

     0   :  { %s1486_s12 = smov 0   ;;  %s1488_s13 = smov 0   ;;  %s1676_s0 = inlined_call_operand.vmem [shape: bf16[2,9,16,128], index: 0, kind: input, shape index: {}]   ;;  %s1677_s1 = inlined_call_operand.vmem [shape: bf16[4,128,128], index: 1, kind: input, shape index: {}]   ;;  %s1678_s2 = inlined_call_operand.vmem [shape: f32[1,128], index: 2, kind: input, shape index: {}]   ;;  %s1679_s3 = inlined_call_operand.vmem [shape: bf16[2,8,8,128], index: 3, kind: output, shape index: {}]  }
   0x1   :  { %s1490_s14 = smov 0  }
   0x2 LB: > { %s25_s15 = sadd.s32 1, %s1460_s13  ;;  %p1082_p0 = scmp.ge.s32.totalorder %s1464_s14, 1  ;;  %s1464_s14 = sphi %s1490_s14, %s13_s14   ;;  %s1460_s13 = sphi %s1488_s13, %s1681_s13   ;;  %s1456_s12 = sphi %s1486_s12, %s1680_s12  }
   0x3   : > { %p27_p1 = scmp.ge.s32.totalorder %s25_s15, 2  ;;  %p168_p2 = scmp.lt.s32.totalorder %s1464_s14, 3 }
   0x5   : > { %s1683_s15 = smov (%p27_p1, %s25_s15), 0  ;;  %p169_p3 = pnand %p1082_p0, %p168_p2 }
   0x6   : > { %p202_p4 = scmp.lt.s32.totalorder (!%p169_p3), %s1456_s12, 1 }
   0x7   : > { %172 = sbr.rel (%p169_p3) target bundleno = 310 (0x136), region = 32 }
   0xc   : > { %v1368_v0 = vld [vmem:[%s1677_s1 + $0x78] sm:$0xff]  ;;  %v1367_v4 = vld [vmem:[%s1677_s1 + $0x70] sm:$0xff]  ;;  %v1366_v8 = vld [vmem:[%s1677_s1 + $0x68] sm:$0xff]  ;;  %s1685_s12 = smov (!%p202_p4, %s1456_s12), 1  ;;  %vm529_vm0 = vcmask 1046528  }
   0xd   : > { %v1392_v1 = vld [vmem:[%s1677_s1 + $0xf8] sm:$0xff]  ;;  %464 = vmatpush.bf16.msra.mxu1 %v1368_v0  ;;  %v1391_v5 = vld [vmem:[%s1677_s1 + $0xf0] sm:$0xff]  ;;  %v1390_v9 = vld [vmem:[%s1677_s1 + $0xe8] sm:$0xff]  ;;  %s1416_s22 = smul.u32 72, %s1685_s12  ;;  %s1344_s17 = sshll.u32 %s1685_s12, 5 }
   0xe   : > { %v1384_v2 = vld [vmem:[%s1677_s1 + $0xb8] sm:$0xff]  ;;  %814 = vmatpush.bf16.msra.mxu3 %v1392_v1  ;;  %v1383_v6 = vld [vmem:[%s1677_s1 + $0xb0] sm:$0xff]  ;;  %v1382_v10 = vld [vmem:[%s1677_s1 + $0xa8] sm:$0xff]  ;;  %s1643_s20 = scalar_lea.vmem %s1679_s3, %s1344_s17 }
   0xf   : > { %v1360_v3 = vld [vmem:[%s1677_s1 + $0x38] sm:$0xff]  ;;  %700 = vmatpush.bf16.msra.mxu2 %v1384_v2  ;;  %v1359_v7 = vld [vmem:[%s1677_s1 + $0x30] sm:$0xff]  ;;  %v1358_v11 = vld [vmem:[%s1677_s1 + $0x28] sm:$0xff]  ;;  %s1604_s6 = scalar_lea.vmem %s1676_s0, %s1416_s22 }
  0x10   : > { %350 = vmatpush.bf16.msra.mxu0 %v1360_v3  ;;  %v1365_v12 = vld [vmem:[%s1677_s1 + $0x60] sm:$0xff]  ;;  %v1364_v16 = vld [vmem:[%s1677_s1 + $0x58] sm:$0xff]  ;;  %v1363_v20 = vld [vmem:[%s1677_s1 + $0x50] sm:$0xff] }
  0x11   : > { %465 = vmatpush.bf16.msra.mxu1 %v1367_v4  ;;  %v1389_v13 = vld [vmem:[%s1677_s1 + $0xe0] sm:$0xff]  ;;  %v1388_v17 = vld [vmem:[%s1677_s1 + $0xd8] sm:$0xff]  ;;  %v1387_v21 = vld [vmem:[%s1677_s1 + $0xd0] sm:$0xff] }
  0x12   : > { %815 = vmatpush.bf16.msra.mxu3 %v1391_v5  ;;  %v1381_v14 = vld [vmem:[%s1677_s1 + $0xa0] sm:$0xff]  ;;  %v1380_v18 = vld [vmem:[%s1677_s1 + $0x98] sm:$0xff]  ;;  %v1379_v22 = vld [vmem:[%s1677_s1 + $0x90] sm:$0xff] }
  0x13   : > { %701 = vmatpush.bf16.msra.mxu2 %v1383_v6  ;;  %v1357_v15 = vld [vmem:[%s1677_s1 + $0x20] sm:$0xff]  ;;  %v1356_v19 = vld [vmem:[%s1677_s1 + $0x18] sm:$0xff]  ;;  %v1355_v23 = vld [vmem:[%s1677_s1 + $0x10] sm:$0xff] }
  0x14   : > { %351 = vmatpush.bf16.msra.mxu0 %v1359_v7  ;;  %v1362_v24 = vld [vmem:[%s1677_s1 + $0x48] sm:$0xff]  ;;  %v1361_v28 = vld [vmem:[%s1677_s1 + $0x40] sm:$0xff]  ;;  %v1370_v35 = vld [vmem:[%s1604_s6 + $0x10] sm:$0xff] }
  0x15   : > { %466 = vmatpush.bf16.msra.mxu1 %v1366_v8  ;;  %v1386_v25 = vld [vmem:[%s1677_s1 + $0xc8] sm:$0xff]  ;;  %v1385_v29 = vld [vmem:[%s1677_s1 + $0xc0] sm:$0xff]  ;;  %v1347_v36 = vld [vmem:[%s1604_s6 + $0x10] sm:$0xff] }
  0x16   : > { %816 = vmatpush.bf16.msra.mxu3 %v1390_v9  ;;  %v1378_v26 = vld [vmem:[%s1677_s1 + $0x88] sm:$0xff]  ;;  %v1377_v30 = vld [vmem:[%s1677_s1 + $0x80] sm:$0xff]  ;;  %v1371_v37 = vld [vmem:[%s1604_s6 + $0x18] sm:$0xff] }
  0x17   : > { %702 = vmatpush.bf16.msra.mxu2 %v1382_v10  ;;  %v1354_v27 = vld [vmem:[%s1677_s1 + $0x8] sm:$0xff]  ;;  %v1353_v31 = vld [vmem:[%s1677_s1] sm:$0xff]  ;;  %v1348_v38 = vld [vmem:[%s1604_s6 + $0x18] sm:$0xff] }
  0x18   : > { %352 = vmatpush.bf16.msra.mxu0 %v1358_v11  ;;  %v1345_v32 = vld [vmem:[%s1604_s6] sm:$0xff]  ;;  %v1369_v33 = vld [vmem:[%s1604_s6 + $0x8] sm:$0xff]  ;;  %v1374_v43 = vld [vmem:[%s1604_s6 + $0x30] sm:$0xff] }
  0x19   : > { %467 = vmatpush.bf16.msra.mxu1 %v1365_v12  ;;  %v1346_v34 = vld [vmem:[%s1604_s6 + $0x8] sm:$0xff]  ;;  %v1372_v39 = vld [vmem:[%s1604_s6 + $0x20] sm:$0xff]  ;;  %v1351_v44 = vld [vmem:[%s1604_s6 + $0x30] sm:$0xff] }
  0x1a   : > { %817 = vmatpush.bf16.msra.mxu3 %v1389_v13  ;;  %v1349_v40 = vld [vmem:[%s1604_s6 + $0x20] sm:$0xff]  ;;  %v1373_v41 = vld [vmem:[%s1604_s6 + $0x28] sm:$0xff]  ;;  %v1375_v45 = vld [vmem:[%s1604_s6 + $0x38] sm:$0xff] }
  0x1b   : > { %703 = vmatpush.bf16.msra.mxu2 %v1381_v14  ;;  %v1350_v42 = vld [vmem:[%s1604_s6 + $0x28] sm:$0xff]  ;;  %v1352_v46 = vld [vmem:[%s1604_s6 + $0x38] sm:$0xff]  ;;  %v1376_v47 = vld [vmem:[%s1604_s6 + $0x40] sm:$0xff] }
  0x1c   : > { %353 = vmatpush.bf16.msra.mxu0 %v1357_v15  ;;  %v1634_v10 = vld [vmem:[%s1678_s2] ss:$0 sm:$0xff] }
  0x1d   : > { %468 = vmatpush.bf16.msra.mxu1 %v1364_v16 }
  0x1e   : > { %818 = vmatpush.bf16.msra.mxu3 %v1388_v17 }
  0x1f   : > { %704 = vmatpush.bf16.msra.mxu2 %v1380_v18 }
  0x20   : > { %354 = vmatpush.bf16.msra.mxu0 %v1356_v19 }
  0x21   : > { %469 = vmatpush.bf16.msra.mxu1 %v1363_v20 }
  0x22   : > { %819 = vmatpush.bf16.msra.mxu3 %v1387_v21 }
  0x23   : > { %705 = vmatpush.bf16.msra.mxu2 %v1379_v22 }
  0x24   : > { %355 = vmatpush.bf16.msra.mxu0 %v1355_v23 }
  0x25   : > { %470 = vmatpush.bf16.msra.mxu1 %v1362_v24 }
  0x26   : > { %820 = vmatpush.bf16.msra.mxu3 %v1386_v25 }
  0x27   : > { %706 = vmatpush.bf16.msra.mxu2 %v1378_v26 }
  0x28   : > { %356 = vmatpush.bf16.msra.mxu0 %v1354_v27 }
  0x29   : > { %471 = vmatpush.bf16.msra.mxu1 %v1361_v28 }
  0x2a   : > { %821 = vmatpush.bf16.msra.mxu3 %v1385_v29 }
  0x2b   : > { %707 = vmatpush.bf16.msra.mxu2 %v1377_v30 }
  0x2c   : > { %357 = vmatpush.bf16.msra.mxu0 %v1353_v31  ;;  %472 = vmatmul.bf16.vlgmr.msra.gmra.mxu1 %v1345_v32 }
  0x2d   : > { %822 = vmatmul.bf16.vlgmr.msra.gmra.mxu3 %v1369_v33 }
  0x2e   : > { %708 = vmatmul.bf16.vlgmr.msra.gmra.mxu2 %v1369_v33 }
  0x2f   : > { %358 = vmatmul.bf16.vlgmr.msra.gmra.mxu0 %v1345_v32 }
  0x3c   : > { %477 = vmatmul.bf16.gmra.mxu1 %v1346_v34 }
  0x3d   : > { %827 = vmatmul.bf16.gmra.mxu3 %v1370_v35 }
  0x3e   : > { %712 = vmatmul.bf16.gmra.mxu2 %v1370_v35 }
  0x3f   : > { %362 = vmatmul.bf16.gmra.mxu0 %v1346_v34 }
  0x4c   : > { %482 = vmatmul.bf16.gmra.mxu1 %v1347_v36 }
  0x4d   : > { %832 = vmatmul.bf16.gmra.mxu3 %v1371_v37 }
  0x4e   : > { %716 = vmatmul.bf16.gmra.mxu2 %v1371_v37 }
  0x4f   : > { %366 = vmatmul.bf16.gmra.mxu0 %v1347_v36 }
  0x5c   : > { %487 = vmatmul.bf16.gmra.mxu1 %v1348_v38 }
  0x5d   : > { %837 = vmatmul.bf16.gmra.mxu3 %v1372_v39 }
  0x5e   : > { %720 = vmatmul.bf16.gmra.mxu2 %v1372_v39 }
  0x5f   : > { %370 = vmatmul.bf16.gmra.mxu0 %v1348_v38 }
  0x6c   : > { %492 = vmatmul.bf16.gmra.mxu1 %v1349_v40 }
  0x6d   : > { %842 = vmatmul.bf16.gmra.mxu3 %v1373_v41 }
  0x6e   : > { %724 = vmatmul.bf16.gmra.mxu2 %v1373_v41 }
  0x6f   : > { %374 = vmatmul.bf16.gmra.mxu0 %v1349_v40 }
  0x7c   : > { %497 = vmatmul.bf16.gmra.mxu1 %v1350_v42 }
  0x7d   : > { %847 = vmatmul.bf16.gmra.mxu3 %v1374_v43 }
  0x7e   : > { %728 = vmatmul.bf16.gmra.mxu2 %v1374_v43 }
  0x7f   : > { %378 = vmatmul.bf16.gmra.mxu0 %v1350_v42 }
  0x8c   : > { %502 = vmatmul.bf16.gmra.mxu1 %v1351_v44 }
  0x8d   : > { %852 = vmatmul.bf16.gmra.mxu3 %v1375_v45 }
  0x8e   : > { %732 = vmatmul.bf16.gmra.mxu2 %v1375_v45 }
  0x8f   : > { %382 = vmatmul.bf16.gmra.mxu0 %v1351_v44 }
  0x9c   : > { %507 = vmatmul.bf16.gmra.mxu1 %v1352_v46 }
  0x9d   : > { %857 = vmatmul.bf16.gmra.mxu3 %v1376_v47 }
  0x9e   : > { %736 = vmatmul.bf16.gmra.mxu2 %v1376_v47 }
  0x9f   : > { %386 = vmatmul.bf16.gmra.mxu0 %v1352_v46 }
  0xa9   : > { %v473_v48 = vpop.f32.mrf.mxu1 }
  0xaa   : > { %v530_v58 = vrot.slane %v473_v48, 1 }
  0xac   : > { %v359_v49 = vpop.f32.mrf.mxu0 }
  0xb0   : > { %v823_v50 = vpop.f32.mrf.mxu3 }
  0xb1   : > { %v709_v51 = vpop.f32.mrf.mxu2  ;;  %v475_v52 = vpop.f32.mrf.mxu1  ;;  %v879_v0 = vrot.slane %v823_v50, 1 }
  0xb2   : > { %v531_v55 = vrot.slane %v475_v52, 1 }
  0xb4   : > { %v361_v53 = vpop.f32.mrf.mxu0  ;;  %v532_v60 = vsel %vm529_vm0, %v530_v58, %v531_v55 }
  0xb5   : > { %v562_v62 = vadd.f32 %v532_v60, %v359_v49 }
  0xb7   : > { %v741_v7 = vadd.f32 %v709_v51, %v562_v62 }
  0xb8   : > { %v825_v54 = vpop.f32.mrf.mxu3 }
  0xb9   : > { %v711_v56 = vpop.f32.mrf.mxu2  ;;  %v478_v57 = vpop.f32.mrf.mxu1  ;;  %v880_v61 = vrot.slane %v825_v54, 1 }
  0xba   : > { %v533_v4 = vrot.slane %v478_v57, 1 }
  0xbb   : > { %v881_v3 = vsel %vm529_vm0, %v879_v0, %v880_v61 }
  0xbc   : > { %v363_v59 = vpop.f32.mrf.mxu0  ;;  %v911_v9 = vadd.f32 %v881_v3, %v741_v7 }
  0xbe   : > { %v923_v16 = vadd.f32 %v1634_v10, %v911_v9 }
  0xc0   : > { %v828_v63 = vpop.f32.mrf.mxu3  ;;  %v939_v22 = vmul.f32 0.01, %v923_v16  ;;  %vm931_vm1 = vcmp.ge.f32.partialorder %v923_v16, 0.0 }
  0xc1   : > { %v713_v1 = vpop.f32.mrf.mxu2  ;;  %v480_v2 = vpop.f32.mrf.mxu1  ;;  %v882_v13 = vrot.slane %v828_v63, 1 }
  0xc2   : > { %v534_v5 = vrot.slane %v480_v2, 1  ;;  %v947_v27 = vsel %vm931_vm1, %v923_v16, %v939_v22 }
  0xc4   : > { %v365_v6 = vpop.f32.mrf.mxu0  ;;  %v535_v8 = vsel %vm529_vm0, %v533_v4, %v534_v5 }
  0xc5   : > { %v563_v11 = vadd.f32 %v535_v8, %v363_v59 }
  0xc7   : > { %v742_v17 = vadd.f32 %v713_v1, %v563_v11 }
  0xc8   : > { %v830_v12 = vpop.f32.mrf.mxu3 }
  0xc9   : > { %v883_v14 = vrot.slane %v830_v12, 1  ;;  %v715_v15 = vpop.f32.mrf.mxu2  ;;  %v483_v18 = vpop.f32.mrf.mxu1 }
  0xca   : > { %v536_v36 = vrot.slane %v483_v18, 1 }
  0xcb   : > { %v884_v19 = vsel %vm529_vm0, %v882_v13, %v883_v14 }
  0xcc   : > { %v367_v20 = vpop.f32.mrf.mxu0  ;;  %v912_v21 = vadd.f32 %v884_v19, %v742_v17 }
  0xce   : > { %v924_v23 = vadd.f32 %v1634_v10, %v912_v21 }
  0xd0   : > { %vm932_vm2 = vcmp.ge.f32.partialorder %v924_v23, 0.0  ;;  %v940_v24 = vmul.f32 0.01, %v924_v23  ;;  %v833_v25 = vpop.f32.mrf.mxu3 }
  0xd1   : > { %v717_v26 = vpop.f32.mrf.mxu2  ;;  %v485_v29 = vpop.f32.mrf.mxu1  ;;  %v885_v42 = vrot.slane %v833_v25, 1 }
  0xd2   : > { %v948_v28 = vsel %vm932_vm2, %v924_v23, %v940_v24  ;;  %v537_v33 = vrot.slane %v485_v29, 1 }
  0xd3   : > { %v1396_v30 = vpack.c.bf16 %v948_v28, %v947_v27 }
  0xd4   : > { %v369_v31 = vpop.f32.mrf.mxu0  ;;  %v538_v38 = vsel %vm529_vm0, %v536_v36, %v537_v33 }
  0xd5   : > { %1397 = vst [vmem:[%s1643_s20] sm:$0xff] %v1396_v30   ;;  %v564_v40 = vadd.f32 %v538_v38, %v367_v20 }
  0xd7   : > { %v743_v49 = vadd.f32 %v717_v26, %v564_v40 }
  0xd8   : > { %v835_v32 = vpop.f32.mrf.mxu3 }
  0xd9   : > { %v719_v34 = vpop.f32.mrf.mxu2  ;;  %v488_v35 = vpop.f32.mrf.mxu1  ;;  %v886_v39 = vrot.slane %v835_v32, 1 }
  0xda   : > { %v539_v46 = vrot.slane %v488_v35, 1 }
  0xdb   : > { %v887_v45 = vsel %vm529_vm0, %v885_v42, %v886_v39 }
  0xdc   : > { %v371_v37 = vpop.f32.mrf.mxu0  ;;  %v913_v51 = vadd.f32 %v887_v45, %v743_v49 }
  0xde   : > { %v925_v57 = vadd.f32 %v1634_v10, %v913_v51 }
  0xe0   : > { %v838_v41 = vpop.f32.mrf.mxu3  ;;  %v941_v63 = vmul.f32 0.01, %v925_v57  ;;  %vm933_vm3 = vcmp.ge.f32.partialorder %v925_v57, 0.0 }
  0xe1   : > { %v721_v43 = vpop.f32.mrf.mxu2  ;;  %v490_v44 = vpop.f32.mrf.mxu1  ;;  %v888_v54 = vrot.slane %v838_v41, 1 }
  0xe2   : > { %v540_v47 = vrot.slane %v490_v44, 1  ;;  %v949_v4 = vsel %vm933_vm3, %v925_v57, %v941_v63 }
  0xe4   : > { %v373_v48 = vpop.f32.mrf.mxu0  ;;  %v541_v50 = vsel %vm529_vm0, %v539_v46, %v540_v47 }
  0xe5   : > { %v565_v52 = vadd.f32 %v541_v50, %v371_v37 }
  0xe7   : > { %v744_v58 = vadd.f32 %v721_v43, %v565_v52 }
  0xe8   : > { %v840_v53 = vpop.f32.mrf.mxu3 }
  0xe9   : > { %v889_v55 = vrot.slane %v840_v53, 1  ;;  %v723_v56 = vpop.f32.mrf.mxu2  ;;  %v493_v59 = vpop.f32.mrf.mxu1 }
  0xea   : > { %v542_v14 = vrot.slane %v493_v59, 1 }
  0xeb   : > { %v890_v60 = vsel %vm529_vm0, %v888_v54, %v889_v55 }
  0xec   : > { %v375_v61 = vpop.f32.mrf.mxu0  ;;  %v914_v62 = vadd.f32 %v890_v60, %v744_v58 }
  0xee   : > { %v926_v0 = vadd.f32 %v1634_v10, %v914_v62 }
  0xf0   : > { %vm934_vm4 = vcmp.ge.f32.partialorder %v926_v0, 0.0  ;;  %v942_v1 = vmul.f32 0.01, %v926_v0  ;;  %v843_v2 = vpop.f32.mrf.mxu3 }
  0xf1   : > { %v725_v3 = vpop.f32.mrf.mxu2  ;;  %v495_v6 = vpop.f32.mrf.mxu1  ;;  %v891_v20 = vrot.slane %v843_v2, 1 }
  0xf2   : > { %v950_v5 = vsel %vm934_vm4, %v926_v0, %v942_v1  ;;  %v543_v11 = vrot.slane %v495_v6, 1 }
  0xf3   : > { %v1401_v7 = vpack.c.bf16 %v950_v5, %v949_v4 }
  0xf4   : > { %v377_v8 = vpop.f32.mrf.mxu0  ;;  %v544_v16 = vsel %vm529_vm0, %v542_v14, %v543_v11 }
  0xf5   : > { %1413 = vst [vmem:[%s1643_s20 + $0x8] sm:$0xff] %v1401_v7   ;;  %v566_v18 = vadd.f32 %v544_v16, %v375_v61 }
  0xf7   : > { %v745_v27 = vadd.f32 %v725_v3, %v566_v18 }
  0xf8   : > { %v845_v9 = vpop.f32.mrf.mxu3 }
  0xf9   : > { %v727_v12 = vpop.f32.mrf.mxu2  ;;  %v498_v13 = vpop.f32.mrf.mxu1  ;;  %v892_v17 = vrot.slane %v845_v9, 1 }
  0xfa   : > { %v545_v24 = vrot.slane %v498_v13, 1 }
  0xfb   : > { %v893_v23 = vsel %vm529_vm0, %v891_v20, %v892_v17 }
  0xfc   : > { %v379_v15 = vpop.f32.mrf.mxu0  ;;  %v915_v29 = vadd.f32 %v893_v23, %v745_v27 }
  0xfe   : > { %v927_v35 = vadd.f32 %v1634_v10, %v915_v29 }
 0x100   : > { %v848_v19 = vpop.f32.mrf.mxu3  ;;  %v943_v41 = vmul.f32 0.01, %v927_v35  ;;  %vm935_vm5 = vcmp.ge.f32.partialorder %v927_v35, 0.0 }
 0x101   : > { %v729_v21 = vpop.f32.mrf.mxu2  ;;  %v500_v22 = vpop.f32.mrf.mxu1  ;;  %v894_v32 = vrot.slane %v848_v19, 1 }
 0x102   : > { %v546_v25 = vrot.slane %v500_v22, 1  ;;  %v951_v46 = vsel %vm935_vm5, %v927_v35, %v943_v41 }
 0x104   : > { %v381_v26 = vpop.f32.mrf.mxu0  ;;  %v547_v28 = vsel %vm529_vm0, %v545_v24, %v546_v25 }
 0x105   : > { %v567_v30 = vadd.f32 %v547_v28, %v379_v15 }
 0x107   : > { %v746_v36 = vadd.f32 %v729_v21, %v567_v30 }
 0x108   : > { %v850_v31 = vpop.f32.mrf.mxu3 }
 0x109   : > { %v895_v33 = vrot.slane %v850_v31, 1  ;;  %v731_v34 = vpop.f32.mrf.mxu2  ;;  %v503_v37 = vpop.f32.mrf.mxu1 }
 0x10a   : > { %v548_v55 = vrot.slane %v503_v37, 1 }
 0x10b   : > { %v896_v38 = vsel %vm529_vm0, %v894_v32, %v895_v33 }
 0x10c   : > { %v383_v39 = vpop.f32.mrf.mxu0  ;;  %v916_v40 = vadd.f32 %v896_v38, %v746_v36 }
 0x10e   : > { %v928_v42 = vadd.f32 %v1634_v10, %v916_v40 }
 0x110   : > { %vm936_vm6 = vcmp.ge.f32.partialorder %v928_v42, 0.0  ;;  %v944_v43 = vmul.f32 0.01, %v928_v42  ;;  %v853_v44 = vpop.f32.mrf.mxu3 }
 0x111   : > { %v733_v45 = vpop.f32.mrf.mxu2  ;;  %v505_v48 = vpop.f32.mrf.mxu1  ;;  %v897_v61 = vrot.slane %v853_v44, 1 }
 0x112   : > { %v952_v47 = vsel %vm936_vm6, %v928_v42, %v944_v43  ;;  %v549_v52 = vrot.slane %v505_v48, 1 }
 0x113   : > { %v1406_v49 = vpack.c.bf16 %v952_v47, %v951_v46 }
 0x114   : > { %v385_v50 = vpop.f32.mrf.mxu0  ;;  %v550_v57 = vsel %vm529_vm0, %v548_v55, %v549_v52 }
 0x115   : > { %1414 = vst [vmem:[%s1643_s20 + $0x10] sm:$0xff] %v1406_v49   ;;  %v568_v59 = vadd.f32 %v550_v57, %v383_v39 }
 0x117   : > { %v747_v4 = vadd.f32 %v733_v45, %v568_v59 }
 0x118   : > { %v855_v51 = vpop.f32.mrf.mxu3 }
 0x119   : > { %v735_v53 = vpop.f32.mrf.mxu2  ;;  %v508_v54 = vpop.f32.mrf.mxu1  ;;  %v898_v58 = vrot.slane %v855_v51, 1 }
 0x11a   : > { %v551_v1 = vrot.slane %v508_v54, 1 }
 0x11b   : > { %v899_v0 = vsel %vm529_vm0, %v897_v61, %v898_v58 }
 0x11c   : > { %v387_v56 = vpop.f32.mrf.mxu0  ;;  %v917_v6 = vadd.f32 %v899_v0, %v747_v4 }
 0x11e   : > { %v929_v13 = vadd.f32 %v1634_v10, %v917_v6 }
 0x120   : > { %v858_v60 = vpop.f32.mrf.mxu3  ;;  %v945_v17 = vmul.f32 0.01, %v929_v13  ;;  %vm937_vm7 = vcmp.ge.f32.partialorder %v929_v13, 0.0 }
 0x121   : > { %v737_v62 = vpop.f32.mrf.mxu2  ;;  %v510_v63 = vpop.f32.mrf.mxu1  ;;  %v900_v9 = vrot.slane %v858_v60, 1 }
 0x122   : > { %v552_v2 = vrot.slane %v510_v63, 1  ;;  %v953_v20 = vsel %vm937_vm7, %v929_v13, %v945_v17 }
 0x124   : > { %v389_v3 = vpop.f32.mrf.mxu0  ;;  %v553_v5 = vsel %vm529_vm0, %v551_v1, %v552_v2 }
 0x125   : > { %v569_v7 = vadd.f32 %v553_v5, %v387_v56 }
 0x127   : > { %v748_v14 = vadd.f32 %v737_v62, %v569_v7 }
 0x128   : > { %v860_v8 = vpop.f32.mrf.mxu3 }
 0x129   : > { %v901_v11 = vrot.slane %v860_v8, 1  ;;  %v739_v12 = vpop.f32.mrf.mxu2 }
 0x12b   : > { %v902_v15 = vsel %vm529_vm0, %v900_v9, %v901_v11 }
 0x12c   : > { %v918_v16 = vadd.f32 %v902_v15, %v748_v14 }
 0x12e   : > { %v930_v18 = vadd.f32 %v1634_v10, %v918_v16 }
 0x130   : > { %vm938_vm8 = vcmp.ge.f32.partialorder %v930_v18, 0.0  ;;  %v946_v19 = vmul.f32 0.01, %v930_v18 }
 0x132   : > { %v954_v21 = vsel %vm938_vm8, %v930_v18, %v946_v19 }
 0x133   : > { %v1411_v22 = vpack.c.bf16 %v954_v21, %v953_v20 }
 0x135   : > { %1415 = vst [vmem:[%s1643_s20 + $0x18] sm:$0xff] %v1411_v22  }
 0x136 PF: > { %s13_s14 = sadd.s32 1, %s1464_s14   ;;  %s1680_s12 = smov %s1460_s13 }
 0x137   : > { %p10_p5 = scmp.ge.s32.totalorder %s13_s14, 4   ;;  %s1681_s13 = smov %s1683_s15 }
 0x139   :  { %12 = sbr.rel (!%p10_p5) target bundleno = 2 (0x2), region = 72 }

// kernel: gradual_style_block_forward.6
= control target key start
LH: loop header
LB: loop body
LE: loop exit
PB: predicated region body
PF: predicated region fallthrough
CT: control target
= control target key end

     0   :  { %s2826_s12 = smov 0   ;;  %s2828_s13 = smov 0   ;;  %s3384_s0 = inlined_call_operand.vmem [shape: bf16[2,5,8,512], index: 0, kind: input, shape index: {}]   ;;  %s3385_s1 = inlined_call_operand.vmem [shape: bf16[4,512,128], index: 1, kind: input, shape index: {}]   ;;  %s3386_s2 = inlined_call_operand.vmem [shape: f32[1,128], index: 2, kind: input, shape index: {}]   ;;  %s3387_s3 = inlined_call_operand.vmem [shape: bf16[2,4,4,128], index: 3, kind: output, shape index: {}]  }
   0x1   :  { %s2830_s14 = smov 0  }
   0x2 LB: > { %s25_s15 = sadd.s32 1, %s2800_s13  ;;  %p1829_p0 = scmp.ge.s32.totalorder %s2804_s14, 1  ;;  %s2804_s14 = sphi %s2830_s14, %s13_s14   ;;  %s2800_s13 = sphi %s2828_s13, %s3389_s13   ;;  %s2796_s12 = sphi %s2826_s12, %s3388_s12  }
   0x3   : > { %p27_p1 = scmp.ge.s32.totalorder %s25_s15, 2  ;;  %p168_p2 = scmp.lt.s32.totalorder %s2804_s14, 3 }
   0x5   : > { %s3391_s15 = smov (%p27_p1, %s25_s15), 0  ;;  %p169_p3 = pnand %p1829_p0, %p168_p2 }
   0x6   : > { %p202_p4 = scmp.lt.s32.totalorder (!%p169_p3), %s2796_s12, 1 }
   0x7   : > { %172 = sbr.rel (%p169_p3) target bundleno = 314 (0x13a), region = 32 }
   0xc   : > { %v2627_v0 = vld [vmem:[%s3385_s1 + $0x38] sm:$0xff]  ;;  %v2626_v4 = vld [vmem:[%s3385_s1 + $0x30] sm:$0xff]  ;;  %v2625_v8 = vld [vmem:[%s3385_s1 + $0x28] sm:$0xff]  ;;  %s3393_s12 = smov (!%p202_p4, %s2796_s12), 1 }
   0xd   : > { %v2635_v1 = vld [vmem:[%s3385_s1 + $0x78] sm:$0xff]  ;;  %526 = vmatpush.bf16.msra.mxu0 %v2627_v0  ;;  %v2634_v5 = vld [vmem:[%s3385_s1 + $0x70] sm:$0xff]  ;;  %v2633_v9 = vld [vmem:[%s3385_s1 + $0x68] sm:$0xff]  ;;  %s2756_s10 = smul.u32 80, %s3393_s12  ;;  %s2611_s6 = sshll.u32 %s3393_s12, 3 }
   0xe   : > { %v2643_v2 = vld [vmem:[%s3385_s1 + $0xb8] sm:$0xff]  ;;  %545 = vmatpush.bf16.msra.mxu1 %v2635_v1  ;;  %v2642_v6 = vld [vmem:[%s3385_s1 + $0xb0] sm:$0xff]  ;;  %v2641_v10 = vld [vmem:[%s3385_s1 + $0xa8] sm:$0xff]  ;;  %s3358_s8 = scalar_lea.vmem %s3387_s3, %s2611_s6 }
   0xf   : > { %v2651_v3 = vld [vmem:[%s3385_s1 + $0xf8] sm:$0xff]  ;;  %564 = vmatpush.bf16.msra.mxu2 %v2643_v2  ;;  %v2650_v7 = vld [vmem:[%s3385_s1 + $0xf0] sm:$0xff]  ;;  %v2649_v11 = vld [vmem:[%s3385_s1 + $0xe8] sm:$0xff]  ;;  %s2932_s25 = scalar_lea.vmem %s3384_s0, %s2756_s10 }
  0x10   : > { %583 = vmatpush.bf16.msra.mxu3 %v2651_v3  ;;  %v2624_v12 = vld [vmem:[%s3385_s1 + $0x20] sm:$0xff]  ;;  %v2623_v16 = vld [vmem:[%s3385_s1 + $0x18] sm:$0xff]  ;;  %v2622_v20 = vld [vmem:[%s3385_s1 + $0x10] sm:$0xff] }
  0x11   : > { %527 = vmatpush.bf16.msra.mxu0 %v2626_v4  ;;  %v2632_v13 = vld [vmem:[%s3385_s1 + $0x60] sm:$0xff]  ;;  %v2631_v17 = vld [vmem:[%s3385_s1 + $0x58] sm:$0xff]  ;;  %v2630_v21 = vld [vmem:[%s3385_s1 + $0x50] sm:$0xff] }
  0x12   : > { %546 = vmatpush.bf16.msra.mxu1 %v2634_v5  ;;  %v2640_v14 = vld [vmem:[%s3385_s1 + $0xa0] sm:$0xff]  ;;  %v2639_v18 = vld [vmem:[%s3385_s1 + $0x98] sm:$0xff]  ;;  %v2638_v22 = vld [vmem:[%s3385_s1 + $0x90] sm:$0xff] }
  0x13   : > { %565 = vmatpush.bf16.msra.mxu2 %v2642_v6  ;;  %v2648_v15 = vld [vmem:[%s3385_s1 + $0xe0] sm:$0xff]  ;;  %v2647_v19 = vld [vmem:[%s3385_s1 + $0xd8] sm:$0xff]  ;;  %v2646_v23 = vld [vmem:[%s3385_s1 + $0xd0] sm:$0xff] }
  0x14   : > { %584 = vmatpush.bf16.msra.mxu3 %v2650_v7  ;;  %v2621_v24 = vld [vmem:[%s3385_s1 + $0x8] sm:$0xff]  ;;  %v2620_v28 = vld [vmem:[%s3385_s1] sm:$0xff]  ;;  %v2614_v33 = vld [vmem:[%s2932_s25 + $0xc] sm:$0xf0] }
  0x15   : > { %528 = vmatpush.bf16.msra.mxu0 %v2625_v8  ;;  %v2629_v25 = vld [vmem:[%s3385_s1 + $0x48] sm:$0xff]  ;;  %v2628_v29 = vld [vmem:[%s3385_s1 + $0x40] sm:$0xff]  ;;  %v1837_v35 = vld [vmem:[%s2932_s25 + $0x10] sm:$0xf0] }
  0x16   : > { %547 = vmatpush.bf16.msra.mxu1 %v2633_v9  ;;  %v2637_v26 = vld [vmem:[%s3385_s1 + $0x88] sm:$0xff]  ;;  %v2636_v30 = vld [vmem:[%s3385_s1 + $0x80] sm:$0xff]  ;;  %v2615_v37 = vld [vmem:[%s2932_s25 + $0x14] sm:$0xf0] }
  0x17   : > { %566 = vmatpush.bf16.msra.mxu2 %v2641_v10  ;;  %v2645_v27 = vld [vmem:[%s3385_s1 + $0xc8] sm:$0xff]  ;;  %v2644_v31 = vld [vmem:[%s3385_s1 + $0xc0] sm:$0xff]  ;;  %v1845_v39 = vld [vmem:[%s2932_s25 + $0x18] sm:$0xf0] }
  0x18   : > { %585 = vmatpush.bf16.msra.mxu3 %v2649_v11  ;;  %v1835_v32 = vld [vmem:[%s2932_s25] sm:$0xf]  ;;  %v2612_v34 = vld [vmem:[%s2932_s25 + $0x4] sm:$0xf]  ;;  %v1843_v36 = vld [vmem:[%s2932_s25 + $0x8] sm:$0xf] }
  0x19   : > { %529 = vmatpush.bf16.msra.mxu0 %v2624_v12  ;;  %v2613_v38 = vld [vmem:[%s2932_s25 + $0xc] sm:$0xf]  ;;  %v2675_v40 = vld [vmem:[%s3385_s1 + $0x1b8] sm:$0xff]  ;;  %v2966_v42 = vor.u32 %v2614_v33, %v1835_v32  ;;  %v2968_v43 = vor.u32 %v2612_v34, %v1837_v35  ;;  %v2970_v44 = vor.u32 %v2615_v37, %v1843_v36  ;;  %v2674_v48 = vld [vmem:[%s3385_s1 + $0x1b0] sm:$0xff] }
  0x1a   : > { %548 = vmatpush.bf16.msra.mxu1 %v2632_v13  ;;  %v2659_v41 = vld [vmem:[%s3385_s1 + $0x138] sm:$0xff]  ;;  %v2972_v45 = vor.u32 %v2613_v38, %v1845_v39  ;;  %v2658_v49 = vld [vmem:[%s3385_s1 + $0x130] sm:$0xff]  ;;  %v2673_v52 = vld [vmem:[%s3385_s1 + $0x1a8] sm:$0xff] }
  0x1b   : > { %567 = vmatpush.bf16.msra.mxu2 %v2640_v14  ;;  %v2667_v46 = vld [vmem:[%s3385_s1 + $0x178] sm:$0xff]  ;;  %v2666_v50 = vld [vmem:[%s3385_s1 + $0x170] sm:$0xff]  ;;  %v2657_v53 = vld [vmem:[%s3385_s1 + $0x128] sm:$0xff] }
  0x1c   : > { %586 = vmatpush.bf16.msra.mxu3 %v2648_v15  ;;  %v2683_v47 = vld [vmem:[%s3385_s1 + $0x1f8] sm:$0xff]  ;;  %v2682_v51 = vld [vmem:[%s3385_s1 + $0x1f0] sm:$0xff]  ;;  %v2665_v54 = vld [vmem:[%s3385_s1 + $0x168] sm:$0xff] }
  0x1d   : > { %530 = vmatpush.bf16.msra.mxu0 %v2623_v16  ;;  %v2681_v55 = vld [vmem:[%s3385_s1 + $0x1e8] sm:$0xff]  ;;  %v2672_v56 = vld [vmem:[%s3385_s1 + $0x1a0] sm:$0xff]  ;;  %v2618_v61 = vld [vmem:[%s2932_s25 + $0x2c] sm:$0xf0] }
  0x1e   : > { %549 = vmatpush.bf16.msra.mxu1 %v2631_v17  ;;  %v2656_v57 = vld [vmem:[%s3385_s1 + $0x120] sm:$0xff]  ;;  %v1853_v63 = vld [vmem:[%s2932_s25 + $0x30] sm:$0xf0]  ;;  %v1859_v0 = vld [vmem:[%s2932_s25 + $0x28] sm:$0xf] }
  0x1f   : > { %568 = vmatpush.bf16.msra.mxu2 %v2639_v18  ;;  %v2664_v58 = vld [vmem:[%s3385_s1 + $0x160] sm:$0xff]  ;;  %v2619_v1 = vld [vmem:[%s2932_s25 + $0x34] sm:$0xf0]  ;;  %v2617_v2 = vld [vmem:[%s2932_s25 + $0x2c] sm:$0xf] }
  0x20   : > { %587 = vmatpush.bf16.msra.mxu3 %v2647_v19  ;;  %v2680_v59 = vld [vmem:[%s3385_s1 + $0x1e0] sm:$0xff]  ;;  %v1861_v3 = vld [vmem:[%s2932_s25 + $0x38] sm:$0xf0]  ;;  %v3038_v8 = vor.u32 %v2619_v1, %v1859_v0  ;;  %v2670_v12 = vld [vmem:[%s3385_s1 + $0x190] sm:$0xff] }
  0x21   : > { %531 = vmatpush.bf16.msra.mxu0 %v2622_v20  ;;  %v1851_v60 = vld [vmem:[%s2932_s25 + $0x20] sm:$0xf]  ;;  %v2616_v62 = vld [vmem:[%s2932_s25 + $0x24] sm:$0xf]  ;;  %v2671_v4 = vld [vmem:[%s3385_s1 + $0x198] sm:$0xff]  ;;  %v3040_v9 = vor.u32 %v2617_v2, %v1861_v3 }
  0x22   : > { %550 = vmatpush.bf16.msra.mxu1 %v2630_v21  ;;  %v2655_v5 = vld [vmem:[%s3385_s1 + $0x118] sm:$0xff]  ;;  %v3034_v6 = vor.u32 %v2618_v61, %v1851_v60  ;;  %v3036_v7 = vor.u32 %v2616_v62, %v1853_v63  ;;  %v2654_v13 = vld [vmem:[%s3385_s1 + $0x110] sm:$0xff]  ;;  %v2669_v16 = vld [vmem:[%s3385_s1 + $0x188] sm:$0xff] }
  0x23   : > { %569 = vmatpush.bf16.msra.mxu2 %v2638_v22  ;;  %v2663_v10 = vld [vmem:[%s3385_s1 + $0x158] sm:$0xff]  ;;  %v2662_v14 = vld [vmem:[%s3385_s1 + $0x150] sm:$0xff]  ;;  %v2653_v17 = vld [vmem:[%s3385_s1 + $0x108] sm:$0xff] }
  0x24   : > { %588 = vmatpush.bf16.msra.mxu3 %v2646_v23  ;;  %v2679_v11 = vld [vmem:[%s3385_s1 + $0x1d8] sm:$0xff]  ;;  %v2678_v15 = vld [vmem:[%s3385_s1 + $0x1d0] sm:$0xff]  ;;  %v2661_v18 = vld [vmem:[%s3385_s1 + $0x148] sm:$0xff] }
  0x25   : > { %532 = vmatpush.bf16.msra.mxu0 %v2621_v24  ;;  %v2677_v19 = vld [vmem:[%s3385_s1 + $0x1c8] sm:$0xff]  ;;  %v2668_v20 = vld [vmem:[%s3385_s1 + $0x180] sm:$0xff]  ;;  %v2715_v22 = vld [vmem:[%s3385_s1 + $0x2b8] sm:$0xff] }
  0x26   : > { %551 = vmatpush.bf16.msra.mxu1 %v2629_v25  ;;  %v2652_v21 = vld [vmem:[%s3385_s1 + $0x100] sm:$0xff]  ;;  %v2699_v23 = vld [vmem:[%s3385_s1 + $0x238] sm:$0xff]  ;;  %v2713_v32 = vld [vmem:[%s3385_s1 + $0x2a8] sm:$0xff] }
  0x27   : > { %570 = vmatpush.bf16.msra.mxu2 %v2637_v26  ;;  %v2660_v24 = vld [vmem:[%s3385_s1 + $0x140] sm:$0xff]  ;;  %v2707_v26 = vld [vmem:[%s3385_s1 + $0x278] sm:$0xff]  ;;  %v2697_v33 = vld [vmem:[%s3385_s1 + $0x228] sm:$0xff] }
  0x28   : > { %589 = vmatpush.bf16.msra.mxu3 %v2645_v27  ;;  %v2676_v25 = vld [vmem:[%s3385_s1 + $0x1c0] sm:$0xff]  ;;  %v2723_v27 = vld [vmem:[%s3385_s1 + $0x2f8] sm:$0xff]  ;;  %v2705_v34 = vld [vmem:[%s3385_s1 + $0x268] sm:$0xff] }
  0x29   : > { %533 = vmatpush.bf16.msra.mxu0 %v2620_v28  ;;  %v2714_v28 = vld [vmem:[%s3385_s1 + $0x2b0] sm:$0xff]  ;;  %v2721_v35 = vld [vmem:[%s3385_s1 + $0x2e8] sm:$0xff]  ;;  %v2712_v36 = vld [vmem:[%s3385_s1 + $0x2a0] sm:$0xff] }
  0x2a   : > { %552 = vmatpush.bf16.msra.mxu1 %v2628_v29  ;;  %v2698_v29 = vld [vmem:[%s3385_s1 + $0x230] sm:$0xff]  ;;  %v2696_v37 = vld [vmem:[%s3385_s1 + $0x220] sm:$0xff]  ;;  %v2739_v60 = vld [vmem:[%s3385_s1 + $0x378] sm:$0xff] }
  0x2b   : > { %571 = vmatpush.bf16.msra.mxu2 %v2636_v30  ;;  %v2706_v30 = vld [vmem:[%s3385_s1 + $0x270] sm:$0xff]  ;;  %v2704_v38 = vld [vmem:[%s3385_s1 + $0x260] sm:$0xff]  ;;  %v2755_v62 = vld [vmem:[%s3385_s1 + $0x3f8] sm:$0xff] }
  0x2c   : > { %590 = vmatpush.bf16.msra.mxu3 %v2644_v31  ;;  %534 = vmatmul.bf16.vlgmr.msra.gmra.mxu0 %v2966_v42  ;;  %v2722_v31 = vld [vmem:[%s3385_s1 + $0x2f0] sm:$0xff]  ;;  %v2720_v39 = vld [vmem:[%s3385_s1 + $0x2e0] sm:$0xff]  ;;  %v2267_v1 = vld [vmem:[%s2932_s25 + $0x18] sm:$0xf] }
  0x2d   : > { %863 = vmatpush.bf16.msrb.mxu0 %v2659_v41  ;;  %553 = vmatmul.bf16.vlgmr.msra.gmra.mxu1 %v2968_v43  ;;  %v2695_v41 = vld [vmem:[%s3385_s1 + $0x218] sm:$0xff]  ;;  %v2684_v61 = vld [vmem:[%s2932_s25 + $0x14] sm:$0xf]  ;;  %v2261_v0 = vld [vmem:[%s2932_s25 + $0x20] sm:$0xf0] }
  0x2e   : > { %572 = vmatmul.bf16.vlgmr.msra.gmra.mxu2 %v2970_v44  ;;  %882 = vmatpush.bf16.msrb.mxu1 %v2667_v46  ;;  %v2702_v46 = vld [vmem:[%s3385_s1 + $0x250] sm:$0xff]  ;;  %v2687_v2 = vld [vmem:[%s2932_s25 + $0x24] sm:$0xf0]  ;;  %v2685_v3 = vld [vmem:[%s2932_s25 + $0x1c] sm:$0xf] }
  0x2f   : > { %901 = vmatpush.bf16.msrb.mxu2 %v2675_v40  ;;  %591 = vmatmul.bf16.vlgmr.msra.gmra.mxu3 %v2972_v45  ;;  %v2711_v40 = vld [vmem:[%s3385_s1 + $0x298] sm:$0xff]  ;;  %v2746_v63 = vld [vmem:[%s3385_s1 + $0x3b0] sm:$0xff] }
  0x30   : > { %920 = vmatpush.bf16.msrb.mxu3 %v2683_v47  ;;  %v2718_v47 = vld [vmem:[%s3385_s1 + $0x2d0] sm:$0xff] }
  0x31   : > { %864 = vmatpush.bf16.msrb.mxu0 %v2658_v49  ;;  %v2693_v49 = vld [vmem:[%s3385_s1 + $0x208] sm:$0xff] }
  0x32   : > { %883 = vmatpush.bf16.msrb.mxu1 %v2666_v50  ;;  %v2701_v50 = vld [vmem:[%s3385_s1 + $0x248] sm:$0xff] }
  0x33   : > { %902 = vmatpush.bf16.msrb.mxu2 %v2674_v48  ;;  %v2709_v48 = vld [vmem:[%s3385_s1 + $0x288] sm:$0xff] }
  0x34   : > { %921 = vmatpush.bf16.msrb.mxu3 %v2682_v51  ;;  %v2717_v51 = vld [vmem:[%s3385_s1 + $0x2c8] sm:$0xff] }
  0x35   : > { %865 = vmatpush.bf16.msrb.mxu0 %v2657_v53  ;;  %v2747_v53 = vld [vmem:[%s3385_s1 + $0x3b8] sm:$0xff] }
  0x36   : > { %884 = vmatpush.bf16.msrb.mxu1 %v2665_v54  ;;  %v2692_v54 = vld [vmem:[%s3385_s1 + $0x200] sm:$0xff] }
  0x37   : > { %903 = vmatpush.bf16.msrb.mxu2 %v2673_v52  ;;  %v2708_v52 = vld [vmem:[%s3385_s1 + $0x280] sm:$0xff] }
  0x38   : > { %922 = vmatpush.bf16.msrb.mxu3 %v2681_v55  ;;  %v2700_v55 = vld [vmem:[%s3385_s1 + $0x240] sm:$0xff] }
  0x39   : > { %866 = vmatpush.bf16.msrb.mxu0 %v2656_v57  ;;  %v2259_v57 = vld [vmem:[%s2932_s25 + $0x10] sm:$0xf] }
  0x3a   : > { %885 = vmatpush.bf16.msrb.mxu1 %v2664_v58  ;;  %v2686_v58 = vld [vmem:[%s2932_s25 + $0x1c] sm:$0xf0] }
  0x3b   : > { %904 = vmatpush.bf16.msrb.mxu2 %v2672_v56  ;;  %v2716_v56 = vld [vmem:[%s3385_s1 + $0x2c0] sm:$0xff] }
  0x3c   : > { %923 = vmatpush.bf16.msrb.mxu3 %v2680_v59  ;;  %539 = vmatmul.bf16.gmra.mxu0 %v3034_v6  ;;  %v2731_v59 = vld [vmem:[%s3385_s1 + $0x338] sm:$0xff] }
  0x3d   : > { %867 = vmatpush.bf16.msrb.mxu0 %v2655_v5  ;;  %558 = vmatmul.bf16.gmra.mxu1 %v3036_v7  ;;  %v3215_v5 = vor.u32 %v2686_v58, %v2259_v57 }
  0x3e   : > { %577 = vmatmul.bf16.gmra.mxu2 %v3038_v8  ;;  %886 = vmatpush.bf16.msrb.mxu1 %v2663_v10  ;;  %v2730_v10 = vld [vmem:[%s3385_s1 + $0x330] sm:$0xff] }
  0x3f   : > { %905 = vmatpush.bf16.msrb.mxu2 %v2671_v4  ;;  %596 = vmatmul.bf16.gmra.mxu3 %v3040_v9  ;;  %v2269_v4 = vld [vmem:[%s2932_s25 + $0x28] sm:$0xf0] }
  0x40   : > { %924 = vmatpush.bf16.msrb.mxu3 %v2679_v11  ;;  %v2754_v11 = vld [vmem:[%s3385_s1 + $0x3f0] sm:$0xff] }
  0x41   : > { %868 = vmatpush.bf16.msrb.mxu0 %v2654_v13  ;;  %v2737_v13 = vld [vmem:[%s3385_s1 + $0x368] sm:$0xff] }
  0x42   : > { %887 = vmatpush.bf16.msrb.mxu1 %v2662_v14  ;;  %v2729_v14 = vld [vmem:[%s3385_s1 + $0x328] sm:$0xff] }
  0x43   : > { %906 = vmatpush.bf16.msrb.mxu2 %v2670_v12  ;;  %v2745_v12 = vld [vmem:[%s3385_s1 + $0x3a8] sm:$0xff] }
  0x44   : > { %925 = vmatpush.bf16.msrb.mxu3 %v2678_v15  ;;  %v2753_v15 = vld [vmem:[%s3385_s1 + $0x3e8] sm:$0xff] }
  0x45   : > { %869 = vmatpush.bf16.msrb.mxu0 %v2653_v17  ;;  %v2736_v17 = vld [vmem:[%s3385_s1 + $0x360] sm:$0xff] }
  0x46   : > { %888 = vmatpush.bf16.msrb.mxu1 %v2661_v18  ;;  %v2728_v18 = vld [vmem:[%s3385_s1 + $0x320] sm:$0xff] }
  0x47   : > { %907 = vmatpush.bf16.msrb.mxu2 %v2669_v16  ;;  %v2744_v16 = vld [vmem:[%s3385_s1 + $0x3a0] sm:$0xff] }
  0x48   : > { %926 = vmatpush.bf16.msrb.mxu3 %v2677_v19  ;;  %v2752_v19 = vld [vmem:[%s3385_s1 + $0x3e0] sm:$0xff] }
  0x49   : > { %870 = vmatpush.bf16.msrb.mxu0 %v2652_v21  ;;  %v2275_v21 = vld [vmem:[%s2932_s25 + $0x30] sm:$0xf] }
  0x4a   : > { %889 = vmatpush.bf16.msrb.mxu1 %v2660_v24  ;;  %v2688_v24 = vld [vmem:[%s2932_s25 + $0x34] sm:$0xf] }
  0x4b   : > { %908 = vmatpush.bf16.msrb.mxu2 %v2668_v20  ;;  %v2743_v20 = vld [vmem:[%s3385_s1 + $0x398] sm:$0xff] }
  0x4c   : > { %927 = vmatpush.bf16.msrb.mxu3 %v2676_v25  ;;  %871 = vmatmul.bf16.vlgmr.msrb.gmra.mxu0 %v2966_v42  ;;  %v2703_v42 = vld [vmem:[%s3385_s1 + $0x258] sm:$0xff]  ;;  %v2277_v25 = vld [vmem:[%s2932_s25 + $0x40] sm:$0xf0] }
  0x4d   : > { %1261 = vmatpush.bf16.msra.mxu0 %v2699_v23  ;;  %890 = vmatmul.bf16.vlgmr.msrb.gmra.mxu1 %v2968_v43  ;;  %v2719_v43 = vld [vmem:[%s3385_s1 + $0x2d8] sm:$0xff] }
  0x4e   : > { %1280 = vmatpush.bf16.msra.mxu1 %v2707_v26  ;;  %909 = vmatmul.bf16.vlgmr.msrb.gmra.mxu2 %v2970_v44  ;;  %v2710_v44 = vld [vmem:[%s3385_s1 + $0x290] sm:$0xff]  ;;  %v2735_v23 = vld [vmem:[%s3385_s1 + $0x358] sm:$0xff] }
  0x4f   : > { %1299 = vmatpush.bf16.msra.mxu2 %v2715_v22  ;;  %928 = vmatmul.bf16.vlgmr.msrb.gmra.mxu3 %v2972_v45  ;;  %v2694_v45 = vld [vmem:[%s3385_s1 + $0x210] sm:$0xff]  ;;  %v2690_v22 = vld [vmem:[%s2932_s25 + $0x3c] sm:$0xf0]  ;;  %v2283_v26 = vld [vmem:[%s2932_s25 + $0x38] sm:$0xf] }
  0x50   : > { %1318 = vmatpush.bf16.msra.mxu3 %v2723_v27  ;;  %v2691_v27 = vld [vmem:[%s2932_s25 + $0x44] sm:$0xf0] }
  0x51   : > { %1262 = vmatpush.bf16.msra.mxu0 %v2698_v29  ;;  %v2727_v29 = vld [vmem:[%s3385_s1 + $0x318] sm:$0xff] }
  0x52   : > { %1281 = vmatpush.bf16.msra.mxu1 %v2706_v30  ;;  %v2285_v30 = vld [vmem:[%s2932_s25 + $0x48] sm:$0xf0] }
  0x53   : > { %1300 = vmatpush.bf16.msra.mxu2 %v2714_v28  ;;  %v2689_v28 = vld [vmem:[%s2932_s25 + $0x3c] sm:$0xf] }
  0x54   : > { %1319 = vmatpush.bf16.msra.mxu3 %v2722_v31  ;;  %v2751_v31 = vld [vmem:[%s3385_s1 + $0x3d8] sm:$0xff] }
  0x55   : > { %1263 = vmatpush.bf16.msra.mxu0 %v2697_v33  ;;  %v2276_v33 = vor.u32 %v2690_v22, %v2275_v21 }
  0x56   : > { %1282 = vmatpush.bf16.msra.mxu1 %v2705_v34  ;;  %v2734_v34 = vld [vmem:[%s3385_s1 + $0x350] sm:$0xff] }
  0x57   : > { %1301 = vmatpush.bf16.msra.mxu2 %v2713_v32  ;;  %v2742_v32 = vld [vmem:[%s3385_s1 + $0x390] sm:$0xff] }
  0x58   : > { %1320 = vmatpush.bf16.msra.mxu3 %v2721_v35  ;;  %v2280_v35 = vor.u32 %v2688_v24, %v2277_v25 }
  0x59   : > { %1264 = vmatpush.bf16.msra.mxu0 %v2696_v37  ;;  %v2288_v37 = vor.u32 %v2689_v28, %v2285_v30 }
  0x5a   : > { %1283 = vmatpush.bf16.msra.mxu1 %v2704_v38  ;;  %v2726_v38 = vld [vmem:[%s3385_s1 + $0x310] sm:$0xff] }
  0x5b   : > { %1302 = vmatpush.bf16.msra.mxu2 %v2712_v36  ;;  %v2284_v36 = vor.u32 %v2691_v27, %v2283_v26 }
  0x5c   : > { %1321 = vmatpush.bf16.msra.mxu3 %v2720_v39  ;;  %876 = vmatmul.bf16.gmra.mxu0 %v3034_v6  ;;  %v2738_v6 = vld [vmem:[%s3385_s1 + $0x370] sm:$0xff] }
  0x5d   : > { %1265 = vmatpush.bf16.msra.mxu0 %v2695_v41  ;;  %895 = vmatmul.bf16.gmra.mxu1 %v3036_v7  ;;  %v3220_v7 = vor.u32 %v2684_v61, %v2261_v0  ;;  %v2750_v39 = vld [vmem:[%s3385_s1 + $0x3d0] sm:$0xff]  ;;  %v2733_v41 = vld [vmem:[%s3385_s1 + $0x348] sm:$0xff] }
  0x5e   : > { %1284 = vmatpush.bf16.msra.mxu1 %v2703_v42  ;;  %914 = vmatmul.bf16.gmra.mxu2 %v3038_v8  ;;  %v3222_v8 = vor.u32 %v2687_v2, %v2267_v1  ;;  %v2725_v42 = vld [vmem:[%s3385_s1 + $0x308] sm:$0xff] }
  0x5f   : > { %1303 = vmatpush.bf16.msra.mxu2 %v2711_v40  ;;  %933 = vmatmul.bf16.gmra.mxu3 %v3040_v9  ;;  %v3224_v9 = vor.u32 %v2685_v3, %v2269_v4  ;;  %v2741_v40 = vld [vmem:[%s3385_s1 + $0x388] sm:$0xff] }
  0x60   : > { %1322 = vmatpush.bf16.msra.mxu3 %v2719_v43  ;;  %v2749_v43 = vld [vmem:[%s3385_s1 + $0x3c8] sm:$0xff] }
  0x61   : > { %1266 = vmatpush.bf16.msra.mxu0 %v2694_v45  ;;  %v2732_v45 = vld [vmem:[%s3385_s1 + $0x340] sm:$0xff] }
  0x62   : > { %1285 = vmatpush.bf16.msra.mxu1 %v2702_v46  ;;  %v2724_v46 = vld [vmem:[%s3385_s1 + $0x300] sm:$0xff] }
  0x63   : > { %1304 = vmatpush.bf16.msra.mxu2 %v2710_v44  ;;  %v2740_v44 = vld [vmem:[%s3385_s1 + $0x380] sm:$0xff] }
  0x64   : > { %1323 = vmatpush.bf16.msra.mxu3 %v2718_v47  ;;  %v2748_v47 = vld [vmem:[%s3385_s1 + $0x3c0] sm:$0xff] }
  0x65   : > { %1267 = vmatpush.bf16.msra.mxu0 %v2693_v49 }
  0x66   : > { %1286 = vmatpush.bf16.msra.mxu1 %v2701_v50 }
  0x67   : > { %1305 = vmatpush.bf16.msra.mxu2 %v2709_v48 }
  0x68   : > { %1324 = vmatpush.bf16.msra.mxu3 %v2717_v51 }
  0x69   : > { %1268 = vmatpush.bf16.msra.mxu0 %v2692_v54 }
  0x6a   : > { %1287 = vmatpush.bf16.msra.mxu1 %v2700_v55 }
  0x6b   : > { %1306 = vmatpush.bf16.msra.mxu2 %v2708_v52 }
  0x6c   : > { %1325 = vmatpush.bf16.msra.mxu3 %v2716_v56  ;;  %1269 = vmatmul.bf16.vlgmr.msra.gmra.mxu0 %v3215_v5 }
  0x6d   : > { %1598 = vmatpush.bf16.msrb.mxu0 %v2731_v59  ;;  %1288 = vmatmul.bf16.vlgmr.msra.gmra.mxu1 %v3220_v7 }
  0x6e   : > { %1617 = vmatpush.bf16.msrb.mxu1 %v2739_v60  ;;  %1307 = vmatmul.bf16.vlgmr.msra.gmra.mxu2 %v3222_v8 }
  0x6f   : > { %1636 = vmatpush.bf16.msrb.mxu2 %v2747_v53  ;;  %1326 = vmatmul.bf16.vlgmr.msra.gmra.mxu3 %v3224_v9 }
  0x70   : > { %1655 = vmatpush.bf16.msrb.mxu3 %v2755_v62 }
  0x71   : > { %1599 = vmatpush.bf16.msrb.mxu0 %v2730_v10 }
  0x72   : > { %1618 = vmatpush.bf16.msrb.mxu1 %v2738_v6 }
  0x73   : > { %1637 = vmatpush.bf16.msrb.mxu2 %v2746_v63 }
  0x74   : > { %1656 = vmatpush.bf16.msrb.mxu3 %v2754_v11 }
  0x75   : > { %1600 = vmatpush.bf16.msrb.mxu0 %v2729_v14 }
  0x76   : > { %1619 = vmatpush.bf16.msrb.mxu1 %v2737_v13 }
  0x77   : > { %1638 = vmatpush.bf16.msrb.mxu2 %v2745_v12 }
  0x78   : > { %1657 = vmatpush.bf16.msrb.mxu3 %v2753_v15 }
  0x79   : > { %1601 = vmatpush.bf16.msrb.mxu0 %v2728_v18 }
  0x7a   : > { %1620 = vmatpush.bf16.msrb.mxu1 %v2736_v17 }
  0x7b   : > { %1639 = vmatpush.bf16.msrb.mxu2 %v2744_v16 }
  0x7c   : > { %1658 = vmatpush.bf16.msrb.mxu3 %v2752_v19  ;;  %1274 = vmatmul.bf16.gmra.mxu0 %v2276_v33 }
  0x7d   : > { %1602 = vmatpush.bf16.msrb.mxu0 %v2727_v29  ;;  %1293 = vmatmul.bf16.gmra.mxu1 %v2280_v35 }
  0x7e   : > { %1621 = vmatpush.bf16.msrb.mxu1 %v2735_v23  ;;  %1312 = vmatmul.bf16.gmra.mxu2 %v2284_v36 }
  0x7f   : > { %1640 = vmatpush.bf16.msrb.mxu2 %v2743_v20  ;;  %1331 = vmatmul.bf16.gmra.mxu3 %v2288_v37 }
  0x80   : > { %1659 = vmatpush.bf16.msrb.mxu3 %v2751_v31 }
  0x81   : > { %1603 = vmatpush.bf16.msrb.mxu0 %v2726_v38 }
  0x82   : > { %1622 = vmatpush.bf16.msrb.mxu1 %v2734_v34 }
  0x83   : > { %1641 = vmatpush.bf16.msrb.mxu2 %v2742_v32 }
  0x84   : > { %1660 = vmatpush.bf16.msrb.mxu3 %v2750_v39 }
  0x85   : > { %1604 = vmatpush.bf16.msrb.mxu0 %v2725_v42 }
  0x86   : > { %1623 = vmatpush.bf16.msrb.mxu1 %v2733_v41 }
  0x87   : > { %1642 = vmatpush.bf16.msrb.mxu2 %v2741_v40 }
  0x88   : > { %1661 = vmatpush.bf16.msrb.mxu3 %v2749_v43 }
  0x89   : > { %1605 = vmatpush.bf16.msrb.mxu0 %v2724_v46 }
  0x8a   : > { %1624 = vmatpush.bf16.msrb.mxu1 %v2732_v45 }
  0x8b   : > { %1643 = vmatpush.bf16.msrb.mxu2 %v2740_v44 }
  0x8c   : > { %1662 = vmatpush.bf16.msrb.mxu3 %v2748_v47  ;;  %1606 = vmatmul.bf16.vlgmr.msrb.gmra.mxu0 %v3215_v5 }
  0x8d   : > { %1625 = vmatmul.bf16.vlgmr.msrb.gmra.mxu1 %v3220_v7 }
  0x8e   : > { %1644 = vmatmul.bf16.vlgmr.msrb.gmra.mxu2 %v3222_v8 }
  0x8f   : > { %1663 = vmatmul.bf16.vlgmr.msrb.gmra.mxu3 %v3224_v9 }
  0x9c   : > { %1611 = vmatmul.bf16.gmra.mxu0 %v2276_v33 }
  0x9d   : > { %1630 = vmatmul.bf16.gmra.mxu1 %v2280_v35 }
  0x9e   : > { %1649 = vmatmul.bf16.gmra.mxu2 %v2284_v36 }
  0x9f   : > { %1668 = vmatmul.bf16.gmra.mxu3 %v2288_v37 }
  0xa9   : > { %v535_v48 = vpop.f32.mrf.mxu0 }
  0xaa   : > { %v554_v49 = vpop.f32.mrf.mxu1 }
  0xab   : > { %v555_v50 = vadd.f32 %v554_v49, %v535_v48 }
  0xb1   : > { %v573_v51 = vpop.f32.mrf.mxu2  ;;  %v537_v54 = vpop.f32.mrf.mxu0 }
  0xb2   : > { %v592_v52 = vpop.f32.mrf.mxu3  ;;  %v574_v53 = vadd.f32 %v573_v51, %v555_v50  ;;  %v556_v55 = vpop.f32.mrf.mxu1 }
  0xb3   : > { %v557_v56 = vadd.f32 %v556_v55, %v537_v54 }
  0xb4   : > { %v3320_v57 = vadd.f32 %v592_v52, %v574_v53 }
  0xb9   : > { %v575_v58 = vpop.f32.mrf.mxu2  ;;  %v540_v61 = vpop.f32.mrf.mxu0 }
  0xba   : > { %v594_v59 = vpop.f32.mrf.mxu3  ;;  %v576_v60 = vadd.f32 %v575_v58, %v557_v56  ;;  %v559_v62 = vpop.f32.mrf.mxu1 }
  0xbb   : > { %v560_v63 = vadd.f32 %v559_v62, %v540_v61 }
  0xbc   : > { %v3322_v0 = vadd.f32 %v594_v59, %v576_v60 }
  0xc1   : > { %v578_v1 = vpop.f32.mrf.mxu2  ;;  %v542_v4 = vpop.f32.mrf.mxu0 }
  0xc2   : > { %v597_v2 = vpop.f32.mrf.mxu3  ;;  %v579_v3 = vadd.f32 %v578_v1, %v560_v63  ;;  %v561_v5 = vpop.f32.mrf.mxu1 }
  0xc3   : > { %v562_v6 = vadd.f32 %v561_v5, %v542_v4 }
  0xc4   : > { %v3324_v7 = vadd.f32 %v597_v2, %v579_v3 }
  0xc9   : > { %v580_v8 = vpop.f32.mrf.mxu2  ;;  %v872_v11 = vpop.f32.mrf.mxu0 }
  0xca   : > { %v599_v9 = vpop.f32.mrf.mxu3  ;;  %v581_v10 = vadd.f32 %v580_v8, %v562_v6  ;;  %v891_v12 = vpop.f32.mrf.mxu1  ;;  %v3348_v8 = vld [vmem:[%s3386_s2] ss:$0 sm:$0xff] }
  0xcb   : > { %v892_v42 = vadd.f32 %v891_v12, %v872_v11 }
  0xcc   : > { %v3326_v13 = vadd.f32 %v599_v9, %v581_v10 }
  0xd1   : > { %v910_v14 = vpop.f32.mrf.mxu2  ;;  %v874_v16 = vpop.f32.mrf.mxu0 }
  0xd2   : > { %v929_v15 = vpop.f32.mrf.mxu3  ;;  %v893_v17 = vpop.f32.mrf.mxu1  ;;  %v911_v43 = vadd.f32 %v910_v14, %v892_v42 }
  0xd3   : > { %v894_v50 = vadd.f32 %v893_v17, %v874_v16 }
  0xd4   : > { %v930_v49 = vadd.f32 %v929_v15, %v911_v43 }
  0xd6   : > { %v943_v54 = vrot.slane %v930_v49, 1 }
  0xd8   : > { %v951_v2 = vadd.f32 %v943_v54, %v3320_v57 }
  0xd9   : > { %v912_v18 = vpop.f32.mrf.mxu2  ;;  %v877_v20 = vpop.f32.mrf.mxu0 }
  0xda   : > { %v931_v19 = vpop.f32.mrf.mxu3  ;;  %v896_v21 = vpop.f32.mrf.mxu1  ;;  %v913_v53 = vadd.f32 %v912_v18, %v894_v50 }
  0xdb   : > { %v897_v62 = vadd.f32 %v896_v21, %v877_v20 }
  0xdc   : > { %v932_v61 = vadd.f32 %v931_v19, %v913_v53 }
  0xde   : > { %v944_v9 = vrot.slane %v932_v61, 1 }
  0xe0   : > { %v952_v19 = vadd.f32 %v944_v9, %v3322_v0 }
  0xe1   : > { %v915_v22 = vpop.f32.mrf.mxu2  ;;  %v3328_v24 = vpop.f32.mrf.mxu0 }
  0xe2   : > { %v934_v23 = vpop.f32.mrf.mxu3  ;;  %v3330_v25 = vpop.f32.mrf.mxu1  ;;  %v916_v10 = vadd.f32 %v915_v22, %v897_v62 }
  0xe3   : > { %v899_v22 = vadd.f32 %v3330_v25, %v3328_v24 }
  0xe4   : > { %v935_v20 = vadd.f32 %v934_v23, %v916_v10 }
  0xe9   : > { %v3332_v26 = vpop.f32.mrf.mxu2  ;;  %v1270_v28 = vpop.f32.mrf.mxu0 }
  0xea   : > { %v3334_v27 = vpop.f32.mrf.mxu3  ;;  %v1289_v29 = vpop.f32.mrf.mxu1 }
  0xeb   : > { %v1290_v45 = vadd.f32 %v1289_v29, %v1270_v28 }
  0xf1   : > { %v1308_v30 = vpop.f32.mrf.mxu2  ;;  %v1272_v32 = vpop.f32.mrf.mxu0 }
  0xf2   : > { %v1327_v31 = vpop.f32.mrf.mxu3  ;;  %v1291_v33 = vpop.f32.mrf.mxu1  ;;  %v1309_v51 = vadd.f32 %v1308_v30, %v1290_v45 }
  0xf3   : > { %v1292_v63 = vadd.f32 %v1291_v33, %v1272_v32 }
  0xf4   : > { %v1328_v56 = vadd.f32 %v1327_v31, %v1309_v51 }
  0xf6   : > { %v1337_v5 = vadd.f32 %v1328_v56, %v951_v2 }
  0xf9   : > { %v1310_v34 = vpop.f32.mrf.mxu2  ;;  %v1275_v36 = vpop.f32.mrf.mxu0 }
  0xfa   : > { %v1329_v35 = vpop.f32.mrf.mxu3  ;;  %v1294_v37 = vpop.f32.mrf.mxu1  ;;  %v1311_v4 = vadd.f32 %v1310_v34, %v1292_v63  ;;  %v945_v34 = vrot.slane %v935_v20, 1 }
  0xfb   : > { %v1295_v16 = vadd.f32 %v1294_v37, %v1275_v36 }
  0xfc   : > { %v1330_v14 = vadd.f32 %v1329_v35, %v1311_v4  ;;  %v918_v35 = vadd.f32 %v3332_v26, %v899_v22  ;;  %v953_v45 = vadd.f32 %v945_v34, %v3324_v7 }
  0xfe   : > { %v1338_v31 = vadd.f32 %v1330_v14, %v952_v19 }
 0x101   : > { %v1313_v38 = vpop.f32.mrf.mxu2  ;;  %v3336_v40 = vpop.f32.mrf.mxu0 }
 0x102   : > { %v1332_v39 = vpop.f32.mrf.mxu3  ;;  %v3338_v41 = vpop.f32.mrf.mxu1  ;;  %v1314_v32 = vadd.f32 %v1313_v38, %v1295_v16 }
 0x104   : > { %v1333_v43 = vadd.f32 %v1332_v39, %v1314_v32 }
 0x109   : > { %v3340_v44 = vpop.f32.mrf.mxu2  ;;  %v1607_v47 = vpop.f32.mrf.mxu0 }
 0x10a   : > { %v3342_v46 = vpop.f32.mrf.mxu3  ;;  %v1626_v48 = vpop.f32.mrf.mxu1 }
 0x10b   : > { %v1627_v52 = vadd.f32 %v1626_v48, %v1607_v47  ;;  %v937_v47 = vadd.f32 %v3334_v27, %v918_v35  ;;  %v1297_v48 = vadd.f32 %v3338_v41, %v3336_v40 }
 0x10d   : > { %v1316_v39 = vadd.f32 %v3340_v44, %v1297_v48  ;;  %v946_v56 = vrot.slane %v937_v47, 1 }
 0x10f   : > { %v954_v61 = vadd.f32 %v946_v56, %v3326_v13 }
 0x111   : > { %v1645_v55 = vpop.f32.mrf.mxu2  ;;  %v1609_v60 = vpop.f32.mrf.mxu0 }
 0x112   : > { %v1646_v58 = vadd.f32 %v1645_v55, %v1627_v52  ;;  %v1664_v59 = vpop.f32.mrf.mxu3  ;;  %v1628_v1 = vpop.f32.mrf.mxu1  ;;  %v1339_v52 = vadd.f32 %v1333_v43, %v953_v45 }
 0x113   : > { %v1629_v12 = vadd.f32 %v1628_v1, %v1609_v60 }
 0x114   : > { %v1665_v3 = vadd.f32 %v1664_v59, %v1646_v58  ;;  %v1335_v59 = vadd.f32 %v3342_v46, %v1316_v39 }
 0x116   : > { %v1678_v6 = vrot.slane %v1665_v3, 1  ;;  %v1340_v63 = vadd.f32 %v1335_v59, %v954_v61 }
 0x118   : > { %v1686_v11 = vadd.f32 %v1678_v6, %v1337_v5 }
 0x119   : > { %v1647_v15 = vpop.f32.mrf.mxu2  ;;  %v1612_v21 = vpop.f32.mrf.mxu0 }
 0x11a   : > { %v1694_v17 = vadd.f32 %v3348_v8, %v1686_v11  ;;  %v1648_v57 = vadd.f32 %v1647_v15, %v1629_v12  ;;  %v1666_v18 = vpop.f32.mrf.mxu3  ;;  %v1631_v28 = vpop.f32.mrf.mxu1 }
 0x11b   : > { %v1632_v23 = vadd.f32 %v1631_v28, %v1612_v21 }
 0x11c   : > { %vm1698_vm0 = vcmp.ge.f32.partialorder %v1694_v17, 0.0  ;;  %v1702_v29 = vmul.f32 0.01, %v1694_v17  ;;  %v1667_v30 = vadd.f32 %v1666_v18, %v1648_v57 }
 0x11e   : > { %v1706_v33 = vsel %vm1698_vm0, %v1694_v17, %v1702_v29  ;;  %v1679_v0 = vrot.slane %v1667_v30, 1 }
 0x11f   : > { %v1710_v36 = vpack.c.bf16 %v1706_v33, %v1706_v33 }
 0x120   : > { %v1687_v37 = vadd.f32 %v1679_v0, %v1338_v31 }
 0x121   : > { %1714 = vst [vmem:[%s3358_s8] sm:$0x3] %v1710_v36  ;;  %v1650_v42 = vpop.f32.mrf.mxu2  ;;  %v1614_v50 = vpop.f32.mrf.mxu0 }
 0x122   : > { %v1695_v24 = vadd.f32 %v3348_v8, %v1687_v37  ;;  %v1651_v25 = vadd.f32 %v1650_v42, %v1632_v23  ;;  %v1669_v38 = vpop.f32.mrf.mxu3  ;;  %v1633_v51 = vpop.f32.mrf.mxu1 }
 0x123   : > { %v1634_v7 = vadd.f32 %v1633_v51, %v1614_v50 }
 0x124   : > { %vm1699_vm1 = vcmp.ge.f32.partialorder %v1695_v24, 0.0  ;;  %v1703_v49 = vmul.f32 0.01, %v1695_v24  ;;  %v1670_v26 = vadd.f32 %v1669_v38, %v1651_v25 }
 0x126   : > { %v1707_v53 = vsel %vm1699_vm1, %v1695_v24, %v1703_v49  ;;  %v1680_v54 = vrot.slane %v1670_v26, 1 }
 0x127   : > { %v1711_v55 = vpack.c.bf16 %v1707_v53, %v1707_v53 }
 0x128   : > { %v1688_v58 = vadd.f32 %v1680_v54, %v1339_v52 }
 0x129   : > { %1715 = vst [vmem:[%s3358_s8 + $0x2] sm:$0x3] %v1711_v55  ;;  %v1652_v27 = vpop.f32.mrf.mxu2 }
 0x12a   : > { %v1696_v40 = vadd.f32 %v3348_v8, %v1688_v58  ;;  %v1653_v41 = vadd.f32 %v1652_v27, %v1634_v7  ;;  %v1671_v60 = vpop.f32.mrf.mxu3 }
 0x12c   : > { %vm1700_vm2 = vcmp.ge.f32.partialorder %v1696_v40, 0.0  ;;  %v1704_v44 = vmul.f32 0.01, %v1696_v40  ;;  %v1672_v62 = vadd.f32 %v1671_v60, %v1653_v41 }
 0x12e   : > { %v1708_v1 = vsel %vm1700_vm2, %v1696_v40, %v1704_v44  ;;  %v1681_v2 = vrot.slane %v1672_v62, 1 }
 0x12f   : > { %v1712_v3 = vpack.c.bf16 %v1708_v1, %v1708_v1 }
 0x130   : > { %v1689_v4 = vadd.f32 %v1681_v2, %v1340_v63 }
 0x131   : > { %1716 = vst [vmem:[%s3358_s8 + $0x4] sm:$0x3] %v1712_v3 }
 0x132   : > { %v1697_v5 = vadd.f32 %v3348_v8, %v1689_v4 }
 0x134   : > { %vm1701_vm3 = vcmp.ge.f32.partialorder %v1697_v5, 0.0  ;;  %v1705_v46 = vmul.f32 0.01, %v1697_v5 }
 0x136   : > { %v1709_v6 = vsel %vm1701_vm3, %v1697_v5, %v1705_v46 }
 0x137   : > { %v1713_v9 = vpack.c.bf16 %v1709_v6, %v1709_v6 }
 0x139   : > { %1717 = vst [vmem:[%s3358_s8 + $0x6] sm:$0x3] %v1713_v9 }
 0x13a PF: > { %s13_s14 = sadd.s32 1, %s2804_s14   ;;  %s3388_s12 = smov %s2800_s13 }
 0x13b   : > { %p10_p5 = scmp.ge.s32.totalorder %s13_s14, 4   ;;  %s3389_s13 = smov %s3391_s15 }
 0x13d   :  { %12 = sbr.rel (!%p10_p5) target bundleno = 2 (0x2), region = 72 }

// kernel: gradual_style_block_forward.9
= control target key start
LH: loop header
LB: loop body
LE: loop exit
PB: predicated region body
PF: predicated region fallthrough
CT: control target
= control target key end

     0   :  { %s236_s0 = inlined_call_operand.vmem [shape: bf16[2,128], index: 0, kind: input, shape index: {}]   ;;  %s237_s1 = inlined_call_operand.vmem [shape: bf16[128,128], index: 1, kind: input, shape index: {}]   ;;  %s238_s2 = inlined_call_operand.vmem [shape: f32[1,128], index: 2, kind: input, shape index: {}]   ;;  %s239_s3 = inlined_call_operand.hbm [shape: f32[2,128], index: 3, kind: output, shape index: {}]  }
   0x1   :  { %v153_v0 = vld [vmem:[%s237_s1 + $0x38] sm:$0xff]  ;;  %v152_v1 = vld [vmem:[%s237_s1 + $0x30] sm:$0xff] }
   0x2   :  { %84 = vmatpush.bf16.msra.mxu0 %v153_v0 }
   0x3   :  { %8 = vsyncpa [#allocation3], 0  ;;  %v151_v2 = vld [vmem:[%s237_s1 + $0x28] sm:$0xff]  ;;  %v150_v3 = vld [vmem:[%s237_s1 + $0x20] sm:$0xff]  ;;  %s182_s5 = smov [#allocation2]   ;;  %s105_s9 = sshll.u32 %s239_s3, 4  ;;  %s106_s9 = int_to_ptr.hbm [resolvable:$true] %s105_s9 }
   0x4   :  { %v149_v4 = vld [vmem:[%s237_s1 + $0x18] sm:$0xff]  ;;  %v148_v5 = vld [vmem:[%s237_s1 + $0x10] sm:$0xff]  ;;  %v147_v6 = vld [vmem:[%s237_s1 + $0x8] sm:$0xff]  ;;  %s103_s6 = sshll.u32 %s182_s5, 4  ;;  %s104_s6 = int_to_ptr.vmem [resolvable:$true] %s103_s6 }
   0x5   :  { %v146_v7 = vld [vmem:[%s237_s1] sm:$0xff] }
   0x6   :  { %85 = vmatpush.bf16.msra.mxu0 %v152_v1  ;;  %v15_v8 = vld [vmem:[%s236_s0] sm:$0x1] }
   0x7   :  { %v155_v9 = vld [vmem:[%s238_s2] ss:$0 sm:$0xff] }
   0xa   :  { %86 = vmatpush.bf16.msra.mxu0 %v151_v2 }
   0xe   :  { %87 = vmatpush.bf16.msra.mxu0 %v150_v3 }
  0x12   :  { %88 = vmatpush.bf16.msra.mxu0 %v149_v4 }
  0x16   :  { %89 = vmatpush.bf16.msra.mxu0 %v148_v5 }
  0x1a   :  { %90 = vmatpush.bf16.msra.mxu0 %v147_v6 }
  0x1e   :  { %91 = vmatpush.bf16.msra.mxu0 %v146_v7 }
  0x21   :  { %92 = vmatmul.bf16.vlgmr.msra.gmra.mxu0 %v15_v8 }
  0x9e   :  { %v93_v10 = vpop.f32.mrf.mxu0 }
  0x9f   :  { %v94_v11 = vadd.f32 %v155_v9, %v93_v10 }
  0xa1   :  { %97 = vst [vmem:[#allocation2] sm:$0x3] %v94_v11 }
  0xa2   :  { %108 = dma.vmem_to_hbm [thread:$0]  %s104_s6, 32, %s106_s9, [#allocation3]  }
  0xa6   :  { %v95_v12 = vpop.f32.mrf.mxu0 }
  0xa7   :  { %180 = dma.done.wait [#allocation3], 32  }
  0xa8   :  { %181 = vsyncadd [#allocation3], 4294967264 }
  0xa9   :  { %113 = vsyncpa [#allocation3], 1 }

// kernel: gradual_style_block_forward.7
= control target key start
LH: loop header
LB: loop body
LE: loop exit
PB: predicated region body
PF: predicated region fallthrough
CT: control target
= control target key end

     0   :  { %s2612_s12 = smov 0   ;;  %s2614_s13 = smov 0   ;;  %s3090_s0 = inlined_call_operand.vmem [shape: bf16[2,3,8,512], index: 0, kind: input, shape index: {}]   ;;  %s3091_s1 = inlined_call_operand.vmem [shape: bf16[4,512,128], index: 1, kind: input, shape index: {}]   ;;  %s3092_s2 = inlined_call_operand.vmem [shape: f32[1,128], index: 2, kind: input, shape index: {}]   ;;  %s3093_s3 = inlined_call_operand.vmem [shape: bf16[2,2,2,128], index: 3, kind: output, shape index: {}]  }
   0x1   :  { %s2616_s14 = smov 0  }
   0x2 LB: > { %s25_s15 = sadd.s32 1, %s2586_s13  ;;  %p1661_p0 = scmp.ge.s32.totalorder %s2590_s14, 1  ;;  %s2590_s14 = sphi %s2616_s14, %s13_s14   ;;  %s2586_s13 = sphi %s2614_s13, %s3095_s13   ;;  %s2582_s12 = sphi %s2612_s12, %s3094_s12  }
   0x3   : > { %p27_p1 = scmp.ge.s32.totalorder %s25_s15, 2  ;;  %p168_p2 = scmp.lt.s32.totalorder %s2590_s14, 3 }
   0x5   : > { %s3097_s15 = smov (%p27_p1, %s25_s15), 0  ;;  %p169_p3 = pnand %p1661_p0, %p168_p2 }
   0x6   : > { %p201_p4 = scmp.lt.s32.totalorder (!%p169_p3), %s2582_s12, 1 }
   0x7   : > { %172 = sbr.rel (%p169_p3) target bundleno = 298 (0x12a), region = 32 }
   0xc   : > { %v2417_v0 = vld [vmem:[%s3091_s1 + $0x38] sm:$0xff]  ;;  %v2416_v4 = vld [vmem:[%s3091_s1 + $0x30] sm:$0xff]  ;;  %v2415_v8 = vld [vmem:[%s3091_s1 + $0x28] sm:$0xff]  ;;  %s3099_s12 = smov (!%p201_p4, %s2582_s12), 1 }
   0xd   : > { %v2425_v1 = vld [vmem:[%s3091_s1 + $0x78] sm:$0xff]  ;;  %500 = vmatpush.bf16.msra.mxu0 %v2417_v0  ;;  %v2424_v5 = vld [vmem:[%s3091_s1 + $0x70] sm:$0xff]  ;;  %v2423_v9 = vld [vmem:[%s3091_s1 + $0x68] sm:$0xff]  ;;  %s2542_s18 = smul.u32 48, %s3099_s12  ;;  %s1663_s4 = sshll.u32 %s3099_s12, 1 }
   0xe   : > { %v2433_v2 = vld [vmem:[%s3091_s1 + $0xb8] sm:$0xff]  ;;  %514 = vmatpush.bf16.msra.mxu1 %v2425_v1  ;;  %v2432_v6 = vld [vmem:[%s3091_s1 + $0xb0] sm:$0xff]  ;;  %v2431_v10 = vld [vmem:[%s3091_s1 + $0xa8] sm:$0xff]  ;;  %s219_s7 = scalar_lea.vmem %s3093_s3, %s1663_s4 }
   0xf   : > { %v2441_v3 = vld [vmem:[%s3091_s1 + $0xf8] sm:$0xff]  ;;  %528 = vmatpush.bf16.msra.mxu2 %v2433_v2  ;;  %v2440_v7 = vld [vmem:[%s3091_s1 + $0xf0] sm:$0xff]  ;;  %v2439_v11 = vld [vmem:[%s3091_s1 + $0xe8] sm:$0xff]  ;;  %s2724_s29 = scalar_lea.vmem %s3090_s0, %s2542_s18 }
  0x10   : > { %542 = vmatpush.bf16.msra.mxu3 %v2441_v3  ;;  %v2414_v12 = vld [vmem:[%s3091_s1 + $0x20] sm:$0xff]  ;;  %v2413_v16 = vld [vmem:[%s3091_s1 + $0x18] sm:$0xff]  ;;  %v2412_v20 = vld [vmem:[%s3091_s1 + $0x10] sm:$0xff] }
  0x11   : > { %501 = vmatpush.bf16.msra.mxu0 %v2416_v4  ;;  %v2422_v13 = vld [vmem:[%s3091_s1 + $0x60] sm:$0xff]  ;;  %v2421_v17 = vld [vmem:[%s3091_s1 + $0x58] sm:$0xff]  ;;  %v2420_v21 = vld [vmem:[%s3091_s1 + $0x50] sm:$0xff] }
  0x12   : > { %515 = vmatpush.bf16.msra.mxu1 %v2424_v5  ;;  %v2430_v14 = vld [vmem:[%s3091_s1 + $0xa0] sm:$0xff]  ;;  %v2429_v18 = vld [vmem:[%s3091_s1 + $0x98] sm:$0xff]  ;;  %v2428_v22 = vld [vmem:[%s3091_s1 + $0x90] sm:$0xff] }
  0x13   : > { %529 = vmatpush.bf16.msra.mxu2 %v2432_v6  ;;  %v2438_v15 = vld [vmem:[%s3091_s1 + $0xe0] sm:$0xff]  ;;  %v2437_v19 = vld [vmem:[%s3091_s1 + $0xd8] sm:$0xff]  ;;  %v2436_v23 = vld [vmem:[%s3091_s1 + $0xd0] sm:$0xff] }
  0x14   : > { %543 = vmatpush.bf16.msra.mxu3 %v2440_v7  ;;  %v2411_v24 = vld [vmem:[%s3091_s1 + $0x8] sm:$0xff]  ;;  %v2410_v28 = vld [vmem:[%s3091_s1] sm:$0xff]  ;;  %v2449_v32 = vld [vmem:[%s3091_s1 + $0x138] sm:$0xff] }
  0x15   : > { %502 = vmatpush.bf16.msra.mxu0 %v2415_v8  ;;  %v2419_v25 = vld [vmem:[%s3091_s1 + $0x48] sm:$0xff]  ;;  %v2418_v29 = vld [vmem:[%s3091_s1 + $0x40] sm:$0xff]  ;;  %v2457_v33 = vld [vmem:[%s3091_s1 + $0x178] sm:$0xff] }
  0x16   : > { %516 = vmatpush.bf16.msra.mxu1 %v2423_v9  ;;  %v2427_v26 = vld [vmem:[%s3091_s1 + $0x88] sm:$0xff]  ;;  %v2426_v30 = vld [vmem:[%s3091_s1 + $0x80] sm:$0xff]  ;;  %v2409_v35 = vld [vmem:[%s2724_s29 + $0x14] sm:$0xf0] }
  0x17   : > { %530 = vmatpush.bf16.msra.mxu2 %v2431_v10  ;;  %v2435_v27 = vld [vmem:[%s3091_s1 + $0xc8] sm:$0xff]  ;;  %v2434_v31 = vld [vmem:[%s3091_s1 + $0xc0] sm:$0xff]  ;;  %v1676_v37 = vld [vmem:[%s2724_s29 + $0x18] sm:$0xf0] }
  0x18   : > { %544 = vmatpush.bf16.msra.mxu3 %v2439_v11  ;;  %v1674_v34 = vld [vmem:[%s2724_s29 + $0x8] sm:$0xf]  ;;  %v2407_v36 = vld [vmem:[%s2724_s29 + $0xc] sm:$0xf]  ;;  %v1666_v38 = vld [vmem:[%s2724_s29] sm:$0xf] }
  0x19   : > { %503 = vmatpush.bf16.msra.mxu0 %v2414_v12  ;;  %v2408_v39 = vld [vmem:[%s2724_s29 + $0xc] sm:$0xf0]  ;;  %v2406_v40 = vld [vmem:[%s2724_s29 + $0x4] sm:$0xf]  ;;  %v1668_v41 = vld [vmem:[%s2724_s29 + $0x10] sm:$0xf0]  ;;  %v2758_v44 = vor.u32 %v2409_v35, %v1674_v34  ;;  %v2760_v45 = vor.u32 %v2407_v36, %v1676_v37 }
  0x1a   : > { %517 = vmatpush.bf16.msra.mxu1 %v2422_v13  ;;  %v2465_v42 = vld [vmem:[%s3091_s1 + $0x1b8] sm:$0xff]  ;;  %v2762_v46 = vor.u32 %v2408_v39, %v1666_v38  ;;  %v2764_v47 = vor.u32 %v2406_v40, %v1668_v41  ;;  %v2448_v48 = vld [vmem:[%s3091_s1 + $0x130] sm:$0xff]  ;;  %v2447_v52 = vld [vmem:[%s3091_s1 + $0x128] sm:$0xff] }
  0x1b   : > { %531 = vmatpush.bf16.msra.mxu2 %v2430_v14  ;;  %v2473_v43 = vld [vmem:[%s3091_s1 + $0x1f8] sm:$0xff]  ;;  %v2456_v49 = vld [vmem:[%s3091_s1 + $0x170] sm:$0xff]  ;;  %v2455_v53 = vld [vmem:[%s3091_s1 + $0x168] sm:$0xff] }
  0x1c   : > { %545 = vmatpush.bf16.msra.mxu3 %v2438_v15  ;;  %v2464_v50 = vld [vmem:[%s3091_s1 + $0x1b0] sm:$0xff]  ;;  %v2463_v54 = vld [vmem:[%s3091_s1 + $0x1a8] sm:$0xff]  ;;  %v2446_v56 = vld [vmem:[%s3091_s1 + $0x120] sm:$0xff] }
  0x1d   : > { %504 = vmatpush.bf16.msra.mxu0 %v2413_v16  ;;  %v2472_v51 = vld [vmem:[%s3091_s1 + $0x1f0] sm:$0xff]  ;;  %v2471_v55 = vld [vmem:[%s3091_s1 + $0x1e8] sm:$0xff]  ;;  %v2454_v57 = vld [vmem:[%s3091_s1 + $0x160] sm:$0xff] }
  0x1e   : > { %518 = vmatpush.bf16.msra.mxu1 %v2421_v17  ;;  %v2462_v58 = vld [vmem:[%s3091_s1 + $0x1a0] sm:$0xff]  ;;  %v2445_v60 = vld [vmem:[%s3091_s1 + $0x118] sm:$0xff]  ;;  %v2444_v0 = vld [vmem:[%s3091_s1 + $0x110] sm:$0xff] }
  0x1f   : > { %532 = vmatpush.bf16.msra.mxu2 %v2429_v18  ;;  %v2470_v59 = vld [vmem:[%s3091_s1 + $0x1e0] sm:$0xff]  ;;  %v2453_v61 = vld [vmem:[%s3091_s1 + $0x158] sm:$0xff]  ;;  %v2452_v1 = vld [vmem:[%s3091_s1 + $0x150] sm:$0xff] }
  0x20   : > { %546 = vmatpush.bf16.msra.mxu3 %v2437_v19  ;;  %v2461_v62 = vld [vmem:[%s3091_s1 + $0x198] sm:$0xff]  ;;  %v2460_v2 = vld [vmem:[%s3091_s1 + $0x190] sm:$0xff]  ;;  %v2443_v4 = vld [vmem:[%s3091_s1 + $0x108] sm:$0xff] }
  0x21   : > { %505 = vmatpush.bf16.msra.mxu0 %v2412_v20  ;;  %v2469_v63 = vld [vmem:[%s3091_s1 + $0x1d8] sm:$0xff]  ;;  %v2468_v3 = vld [vmem:[%s3091_s1 + $0x1d0] sm:$0xff]  ;;  %v2451_v5 = vld [vmem:[%s3091_s1 + $0x148] sm:$0xff] }
  0x22   : > { %519 = vmatpush.bf16.msra.mxu1 %v2420_v21  ;;  %v2459_v6 = vld [vmem:[%s3091_s1 + $0x188] sm:$0xff]  ;;  %v2442_v8 = vld [vmem:[%s3091_s1 + $0x100] sm:$0xff]  ;;  %v2485_v12 = vld [vmem:[%s3091_s1 + $0x238] sm:$0xff] }
  0x23   : > { %533 = vmatpush.bf16.msra.mxu2 %v2428_v22  ;;  %v2467_v7 = vld [vmem:[%s3091_s1 + $0x1c8] sm:$0xff]  ;;  %v2450_v9 = vld [vmem:[%s3091_s1 + $0x140] sm:$0xff]  ;;  %v2493_v13 = vld [vmem:[%s3091_s1 + $0x278] sm:$0xff] }
  0x24   : > { %547 = vmatpush.bf16.msra.mxu3 %v2436_v23  ;;  %v2458_v10 = vld [vmem:[%s3091_s1 + $0x180] sm:$0xff]  ;;  %v2501_v14 = vld [vmem:[%s3091_s1 + $0x2b8] sm:$0xff]  ;;  %v2484_v16 = vld [vmem:[%s3091_s1 + $0x230] sm:$0xff] }
  0x25   : > { %506 = vmatpush.bf16.msra.mxu0 %v2411_v24  ;;  %v2466_v11 = vld [vmem:[%s3091_s1 + $0x1c0] sm:$0xff]  ;;  %v2509_v15 = vld [vmem:[%s3091_s1 + $0x2f8] sm:$0xff]  ;;  %v2492_v17 = vld [vmem:[%s3091_s1 + $0x270] sm:$0xff] }
  0x26   : > { %520 = vmatpush.bf16.msra.mxu1 %v2419_v25  ;;  %v2500_v18 = vld [vmem:[%s3091_s1 + $0x2b0] sm:$0xff]  ;;  %v2483_v20 = vld [vmem:[%s3091_s1 + $0x228] sm:$0xff]  ;;  %v2482_v24 = vld [vmem:[%s3091_s1 + $0x220] sm:$0xff] }
  0x27   : > { %534 = vmatpush.bf16.msra.mxu2 %v2427_v26  ;;  %v2508_v19 = vld [vmem:[%s3091_s1 + $0x2f0] sm:$0xff]  ;;  %v2491_v21 = vld [vmem:[%s3091_s1 + $0x268] sm:$0xff]  ;;  %v2490_v25 = vld [vmem:[%s3091_s1 + $0x260] sm:$0xff] }
  0x28   : > { %548 = vmatpush.bf16.msra.mxu3 %v2435_v27  ;;  %v2499_v22 = vld [vmem:[%s3091_s1 + $0x2a8] sm:$0xff]  ;;  %v2498_v26 = vld [vmem:[%s3091_s1 + $0x2a0] sm:$0xff]  ;;  %v2496_v34 = vld [vmem:[%s3091_s1 + $0x290] sm:$0xff] }
  0x29   : > { %507 = vmatpush.bf16.msra.mxu0 %v2410_v28  ;;  %v2507_v23 = vld [vmem:[%s3091_s1 + $0x2e8] sm:$0xff]  ;;  %v2506_v27 = vld [vmem:[%s3091_s1 + $0x2e0] sm:$0xff]  ;;  %v2481_v28 = vld [vmem:[%s3091_s1 + $0x218] sm:$0xff] }
  0x2a   : > { %521 = vmatpush.bf16.msra.mxu1 %v2418_v29  ;;  %v2489_v29 = vld [vmem:[%s3091_s1 + $0x258] sm:$0xff]  ;;  %v2504_v35 = vld [vmem:[%s3091_s1 + $0x2d0] sm:$0xff]  ;;  %v2479_v36 = vld [vmem:[%s3091_s1 + $0x208] sm:$0xff] }
  0x2b   : > { %535 = vmatpush.bf16.msra.mxu2 %v2426_v30  ;;  %v2497_v30 = vld [vmem:[%s3091_s1 + $0x298] sm:$0xff]  ;;  %v2487_v37 = vld [vmem:[%s3091_s1 + $0x248] sm:$0xff]  ;;  %v2478_v40 = vld [vmem:[%s3091_s1 + $0x200] sm:$0xff] }
  0x2c   : > { %549 = vmatpush.bf16.msra.mxu3 %v2434_v31  ;;  %508 = vmatmul.bf16.vlgmr.msra.gmra.mxu0 %v2762_v46  ;;  %v2505_v31 = vld [vmem:[%s3091_s1 + $0x2d8] sm:$0xff]  ;;  %v2495_v38 = vld [vmem:[%s3091_s1 + $0x288] sm:$0xff]  ;;  %v2486_v41 = vld [vmem:[%s3091_s1 + $0x240] sm:$0xff] }
  0x2d   : > { %815 = vmatpush.bf16.msrb.mxu0 %v2449_v32  ;;  %522 = vmatmul.bf16.vlgmr.msra.gmra.mxu1 %v2764_v47  ;;  %v2480_v32 = vld [vmem:[%s3091_s1 + $0x210] sm:$0xff]  ;;  %v2503_v39 = vld [vmem:[%s3091_s1 + $0x2c8] sm:$0xff] }
  0x2e   : > { %829 = vmatpush.bf16.msrb.mxu1 %v2457_v33  ;;  %536 = vmatmul.bf16.vlgmr.msra.gmra.mxu2 %v2758_v44  ;;  %v2488_v33 = vld [vmem:[%s3091_s1 + $0x250] sm:$0xff] }
  0x2f   : > { %843 = vmatpush.bf16.msrb.mxu2 %v2465_v42  ;;  %550 = vmatmul.bf16.vlgmr.msra.gmra.mxu3 %v2760_v45  ;;  %v2494_v42 = vld [vmem:[%s3091_s1 + $0x280] sm:$0xff] }
  0x30   : > { %857 = vmatpush.bf16.msrb.mxu3 %v2473_v43  ;;  %v2502_v43 = vld [vmem:[%s3091_s1 + $0x2c0] sm:$0xff] }
  0x31   : > { %816 = vmatpush.bf16.msrb.mxu0 %v2448_v48  ;;  %v2475_v48 = vld [vmem:[%s2724_s29 + $0x1c] sm:$0xf] }
  0x32   : > { %830 = vmatpush.bf16.msrb.mxu1 %v2456_v49  ;;  %v2080_v49 = vld [vmem:[%s2724_s29 + $0x28] sm:$0xf0] }
  0x33   : > { %844 = vmatpush.bf16.msrb.mxu2 %v2464_v50  ;;  %v2070_v50 = vld [vmem:[%s2724_s29 + $0x10] sm:$0xf] }
  0x34   : > { %858 = vmatpush.bf16.msrb.mxu3 %v2472_v51  ;;  %v2476_v51 = vld [vmem:[%s2724_s29 + $0x1c] sm:$0xf0] }
  0x35   : > { %817 = vmatpush.bf16.msrb.mxu0 %v2447_v52  ;;  %v2474_v52 = vld [vmem:[%s2724_s29 + $0x14] sm:$0xf] }
  0x36   : > { %831 = vmatpush.bf16.msrb.mxu1 %v2455_v53  ;;  %v2072_v53 = vld [vmem:[%s2724_s29 + $0x20] sm:$0xf0] }
  0x37   : > { %845 = vmatpush.bf16.msrb.mxu2 %v2463_v54  ;;  %v2533_v54 = vld [vmem:[%s3091_s1 + $0x3b8] sm:$0xff] }
  0x38   : > { %859 = vmatpush.bf16.msrb.mxu3 %v2471_v55  ;;  %v2541_v55 = vld [vmem:[%s3091_s1 + $0x3f8] sm:$0xff] }
  0x39   : > { %818 = vmatpush.bf16.msrb.mxu0 %v2446_v56 }
  0x3a   : > { %832 = vmatpush.bf16.msrb.mxu1 %v2454_v57  ;;  %v2976_v57 = vor.u32 %v2475_v48, %v2080_v49 }
  0x3b   : > { %846 = vmatpush.bf16.msrb.mxu2 %v2462_v58  ;;  %v2978_v58 = vor.u32 %v2476_v51, %v2070_v50 }
  0x3c   : > { %860 = vmatpush.bf16.msrb.mxu3 %v2470_v59  ;;  %v2980_v59 = vor.u32 %v2474_v52, %v2072_v53 }
  0x3d   : > { %819 = vmatpush.bf16.msrb.mxu0 %v2445_v60  ;;  %v2516_v60 = vld [vmem:[%s3091_s1 + $0x330] sm:$0xff] }
  0x3e   : > { %833 = vmatpush.bf16.msrb.mxu1 %v2453_v61  ;;  %v2524_v61 = vld [vmem:[%s3091_s1 + $0x370] sm:$0xff] }
  0x3f   : > { %847 = vmatpush.bf16.msrb.mxu2 %v2461_v62  ;;  %v2532_v62 = vld [vmem:[%s3091_s1 + $0x3b0] sm:$0xff] }
  0x40   : > { %861 = vmatpush.bf16.msrb.mxu3 %v2469_v63  ;;  %v2540_v63 = vld [vmem:[%s3091_s1 + $0x3f0] sm:$0xff] }
  0x41   : > { %820 = vmatpush.bf16.msrb.mxu0 %v2444_v0  ;;  %v2515_v0 = vld [vmem:[%s3091_s1 + $0x328] sm:$0xff] }
  0x42   : > { %834 = vmatpush.bf16.msrb.mxu1 %v2452_v1  ;;  %v2523_v1 = vld [vmem:[%s3091_s1 + $0x368] sm:$0xff] }
  0x43   : > { %848 = vmatpush.bf16.msrb.mxu2 %v2460_v2  ;;  %v2531_v2 = vld [vmem:[%s3091_s1 + $0x3a8] sm:$0xff] }
  0x44   : > { %862 = vmatpush.bf16.msrb.mxu3 %v2468_v3  ;;  %v2539_v3 = vld [vmem:[%s3091_s1 + $0x3e8] sm:$0xff] }
  0x45   : > { %821 = vmatpush.bf16.msrb.mxu0 %v2443_v4  ;;  %v2514_v4 = vld [vmem:[%s3091_s1 + $0x320] sm:$0xff] }
  0x46   : > { %835 = vmatpush.bf16.msrb.mxu1 %v2451_v5  ;;  %v2522_v5 = vld [vmem:[%s3091_s1 + $0x360] sm:$0xff] }
  0x47   : > { %849 = vmatpush.bf16.msrb.mxu2 %v2459_v6  ;;  %v2530_v6 = vld [vmem:[%s3091_s1 + $0x3a0] sm:$0xff] }
  0x48   : > { %863 = vmatpush.bf16.msrb.mxu3 %v2467_v7  ;;  %v2538_v7 = vld [vmem:[%s3091_s1 + $0x3e0] sm:$0xff] }
  0x49   : > { %822 = vmatpush.bf16.msrb.mxu0 %v2442_v8  ;;  %v2513_v8 = vld [vmem:[%s3091_s1 + $0x318] sm:$0xff] }
  0x4a   : > { %836 = vmatpush.bf16.msrb.mxu1 %v2450_v9  ;;  %v2521_v9 = vld [vmem:[%s3091_s1 + $0x358] sm:$0xff] }
  0x4b   : > { %850 = vmatpush.bf16.msrb.mxu2 %v2458_v10  ;;  %v2529_v10 = vld [vmem:[%s3091_s1 + $0x398] sm:$0xff] }
  0x4c   : > { %864 = vmatpush.bf16.msrb.mxu3 %v2466_v11  ;;  %823 = vmatmul.bf16.vlgmr.msrb.gmra.mxu0 %v2762_v46  ;;  %v2078_v46 = vld [vmem:[%s2724_s29 + $0x18] sm:$0xf] }
  0x4d   : > { %1161 = vmatpush.bf16.msra.mxu0 %v2485_v12  ;;  %837 = vmatmul.bf16.vlgmr.msrb.gmra.mxu1 %v2764_v47  ;;  %v2477_v47 = vld [vmem:[%s2724_s29 + $0x24] sm:$0xf0]  ;;  %v2537_v11 = vld [vmem:[%s3091_s1 + $0x3d8] sm:$0xff]  ;;  %v2512_v12 = vld [vmem:[%s3091_s1 + $0x310] sm:$0xff] }
  0x4e   : > { %1175 = vmatpush.bf16.msra.mxu1 %v2493_v13  ;;  %851 = vmatmul.bf16.vlgmr.msrb.gmra.mxu2 %v2758_v44  ;;  %v2517_v44 = vld [vmem:[%s3091_s1 + $0x338] sm:$0xff]  ;;  %v2974_v56 = vor.u32 %v2477_v47, %v2078_v46  ;;  %v2520_v13 = vld [vmem:[%s3091_s1 + $0x350] sm:$0xff] }
  0x4f   : > { %1189 = vmatpush.bf16.msra.mxu2 %v2501_v14  ;;  %865 = vmatmul.bf16.vlgmr.msrb.gmra.mxu3 %v2760_v45  ;;  %v2525_v45 = vld [vmem:[%s3091_s1 + $0x378] sm:$0xff]  ;;  %v2528_v14 = vld [vmem:[%s3091_s1 + $0x390] sm:$0xff] }
  0x50   : > { %1203 = vmatpush.bf16.msra.mxu3 %v2509_v15  ;;  %v2536_v15 = vld [vmem:[%s3091_s1 + $0x3d0] sm:$0xff] }
  0x51   : > { %1162 = vmatpush.bf16.msra.mxu0 %v2484_v16  ;;  %v2511_v16 = vld [vmem:[%s3091_s1 + $0x308] sm:$0xff] }
  0x52   : > { %1176 = vmatpush.bf16.msra.mxu1 %v2492_v17  ;;  %v2519_v17 = vld [vmem:[%s3091_s1 + $0x348] sm:$0xff] }
  0x53   : > { %1190 = vmatpush.bf16.msra.mxu2 %v2500_v18  ;;  %v2527_v18 = vld [vmem:[%s3091_s1 + $0x388] sm:$0xff] }
  0x54   : > { %1204 = vmatpush.bf16.msra.mxu3 %v2508_v19  ;;  %v2535_v19 = vld [vmem:[%s3091_s1 + $0x3c8] sm:$0xff] }
  0x55   : > { %1163 = vmatpush.bf16.msra.mxu0 %v2483_v20  ;;  %v2510_v20 = vld [vmem:[%s3091_s1 + $0x300] sm:$0xff] }
  0x56   : > { %1177 = vmatpush.bf16.msra.mxu1 %v2491_v21  ;;  %v2518_v21 = vld [vmem:[%s3091_s1 + $0x340] sm:$0xff] }
  0x57   : > { %1191 = vmatpush.bf16.msra.mxu2 %v2499_v22  ;;  %v2526_v22 = vld [vmem:[%s3091_s1 + $0x380] sm:$0xff] }
  0x58   : > { %1205 = vmatpush.bf16.msra.mxu3 %v2507_v23  ;;  %v2534_v23 = vld [vmem:[%s3091_s1 + $0x3c0] sm:$0xff] }
  0x59   : > { %1164 = vmatpush.bf16.msra.mxu0 %v2482_v24 }
  0x5a   : > { %1178 = vmatpush.bf16.msra.mxu1 %v2490_v25 }
  0x5b   : > { %1192 = vmatpush.bf16.msra.mxu2 %v2498_v26 }
  0x5c   : > { %1206 = vmatpush.bf16.msra.mxu3 %v2506_v27 }
  0x5d   : > { %1165 = vmatpush.bf16.msra.mxu0 %v2481_v28 }
  0x5e   : > { %1179 = vmatpush.bf16.msra.mxu1 %v2489_v29 }
  0x5f   : > { %1193 = vmatpush.bf16.msra.mxu2 %v2497_v30 }
  0x60   : > { %1207 = vmatpush.bf16.msra.mxu3 %v2505_v31 }
  0x61   : > { %1166 = vmatpush.bf16.msra.mxu0 %v2480_v32 }
  0x62   : > { %1180 = vmatpush.bf16.msra.mxu1 %v2488_v33 }
  0x63   : > { %1194 = vmatpush.bf16.msra.mxu2 %v2496_v34 }
  0x64   : > { %1208 = vmatpush.bf16.msra.mxu3 %v2504_v35 }
  0x65   : > { %1167 = vmatpush.bf16.msra.mxu0 %v2479_v36 }
  0x66   : > { %1181 = vmatpush.bf16.msra.mxu1 %v2487_v37 }
  0x67   : > { %1195 = vmatpush.bf16.msra.mxu2 %v2495_v38 }
  0x68   : > { %1209 = vmatpush.bf16.msra.mxu3 %v2503_v39 }
  0x69   : > { %1168 = vmatpush.bf16.msra.mxu0 %v2478_v40 }
  0x6a   : > { %1182 = vmatpush.bf16.msra.mxu1 %v2486_v41 }
  0x6b   : > { %1196 = vmatpush.bf16.msra.mxu2 %v2494_v42 }
  0x6c   : > { %1210 = vmatpush.bf16.msra.mxu3 %v2502_v43  ;;  %1169 = vmatmul.bf16.vlgmr.msra.gmra.mxu0 %v2978_v58 }
  0x6d   : > { %1476 = vmatpush.bf16.msrb.mxu0 %v2517_v44  ;;  %1183 = vmatmul.bf16.vlgmr.msra.gmra.mxu1 %v2980_v59 }
  0x6e   : > { %1490 = vmatpush.bf16.msrb.mxu1 %v2525_v45  ;;  %1197 = vmatmul.bf16.vlgmr.msra.gmra.mxu2 %v2974_v56 }
  0x6f   : > { %1504 = vmatpush.bf16.msrb.mxu2 %v2533_v54  ;;  %1211 = vmatmul.bf16.vlgmr.msra.gmra.mxu3 %v2976_v57 }
  0x70   : > { %1518 = vmatpush.bf16.msrb.mxu3 %v2541_v55 }
  0x71   : > { %1477 = vmatpush.bf16.msrb.mxu0 %v2516_v60 }
  0x72   : > { %1491 = vmatpush.bf16.msrb.mxu1 %v2524_v61 }
  0x73   : > { %1505 = vmatpush.bf16.msrb.mxu2 %v2532_v62 }
  0x74   : > { %1519 = vmatpush.bf16.msrb.mxu3 %v2540_v63 }
  0x75   : > { %1478 = vmatpush.bf16.msrb.mxu0 %v2515_v0 }
  0x76   : > { %1492 = vmatpush.bf16.msrb.mxu1 %v2523_v1 }
  0x77   : > { %1506 = vmatpush.bf16.msrb.mxu2 %v2531_v2 }
  0x78   : > { %1520 = vmatpush.bf16.msrb.mxu3 %v2539_v3 }
  0x79   : > { %1479 = vmatpush.bf16.msrb.mxu0 %v2514_v4 }
  0x7a   : > { %1493 = vmatpush.bf16.msrb.mxu1 %v2522_v5 }
  0x7b   : > { %1507 = vmatpush.bf16.msrb.mxu2 %v2530_v6 }
  0x7c   : > { %1521 = vmatpush.bf16.msrb.mxu3 %v2538_v7 }
  0x7d   : > { %1480 = vmatpush.bf16.msrb.mxu0 %v2513_v8 }
  0x7e   : > { %1494 = vmatpush.bf16.msrb.mxu1 %v2521_v9 }
  0x7f   : > { %1508 = vmatpush.bf16.msrb.mxu2 %v2529_v10 }
  0x80   : > { %1522 = vmatpush.bf16.msrb.mxu3 %v2537_v11 }
  0x81   : > { %1481 = vmatpush.bf16.msrb.mxu0 %v2512_v12 }
  0x82   : > { %1495 = vmatpush.bf16.msrb.mxu1 %v2520_v13  ;;  %v2567_v13 = vld [vmem:[%s3092_s2] ss:$0 sm:$0xff] }
  0x83   : > { %1509 = vmatpush.bf16.msrb.mxu2 %v2528_v14 }
  0x84   : > { %1523 = vmatpush.bf16.msrb.mxu3 %v2536_v15 }
  0x85   : > { %1482 = vmatpush.bf16.msrb.mxu0 %v2511_v16 }
  0x86   : > { %1496 = vmatpush.bf16.msrb.mxu1 %v2519_v17 }
  0x87   : > { %1510 = vmatpush.bf16.msrb.mxu2 %v2527_v18 }
  0x88   : > { %1524 = vmatpush.bf16.msrb.mxu3 %v2535_v19 }
  0x89   : > { %1483 = vmatpush.bf16.msrb.mxu0 %v2510_v20 }
  0x8a   : > { %1497 = vmatpush.bf16.msrb.mxu1 %v2518_v21 }
  0x8b   : > { %1511 = vmatpush.bf16.msrb.mxu2 %v2526_v22 }
  0x8c   : > { %1525 = vmatpush.bf16.msrb.mxu3 %v2534_v23  ;;  %1484 = vmatmul.bf16.vlgmr.msrb.gmra.mxu0 %v2978_v58 }
  0x8d   : > { %1498 = vmatmul.bf16.vlgmr.msrb.gmra.mxu1 %v2980_v59 }
  0x8e   : > { %1512 = vmatmul.bf16.vlgmr.msrb.gmra.mxu2 %v2974_v56 }
  0x8f   : > { %1526 = vmatmul.bf16.vlgmr.msrb.gmra.mxu3 %v2976_v57 }
  0xa9   : > { %v509_v24 = vpop.f32.mrf.mxu0 }
  0xaa   : > { %v523_v25 = vpop.f32.mrf.mxu1 }
  0xab   : > { %v524_v48 = vadd.f32 %v523_v25, %v509_v24 }
  0xb1   : > { %v537_v26 = vpop.f32.mrf.mxu2  ;;  %v511_v28 = vpop.f32.mrf.mxu0 }
  0xb2   : > { %v551_v27 = vpop.f32.mrf.mxu3  ;;  %v525_v29 = vpop.f32.mrf.mxu1  ;;  %v538_v56 = vadd.f32 %v537_v26, %v524_v48 }
  0xb3   : > { %v526_v0 = vadd.f32 %v525_v29, %v511_v28 }
  0xb4   : > { %v552_v61 = vadd.f32 %v551_v27, %v538_v56 }
  0xb9   : > { %v539_v30 = vpop.f32.mrf.mxu2 }
  0xba   : > { %v553_v31 = vpop.f32.mrf.mxu3  ;;  %v540_v9 = vadd.f32 %v539_v30, %v526_v0 }
  0xbc   : > { %v554_v18 = vadd.f32 %v553_v31, %v540_v9 }
  0xc9   : > { %v824_v32 = vpop.f32.mrf.mxu0 }
  0xca   : > { %v838_v33 = vpop.f32.mrf.mxu1 }
  0xcb   : > { %v839_v46 = vadd.f32 %v838_v33, %v824_v32 }
  0xd1   : > { %v852_v34 = vpop.f32.mrf.mxu2  ;;  %v826_v36 = vpop.f32.mrf.mxu0 }
  0xd2   : > { %v866_v35 = vpop.f32.mrf.mxu3  ;;  %v840_v37 = vpop.f32.mrf.mxu1  ;;  %v853_v47 = vadd.f32 %v852_v34, %v839_v46 }
  0xd3   : > { %v841_v55 = vadd.f32 %v840_v37, %v826_v36 }
  0xd4   : > { %v867_v54 = vadd.f32 %v866_v35, %v853_v47 }
  0xd6   : > { %v873_v59 = vrot.slane %v867_v54, 1 }
  0xd8   : > { %v877_v4 = vadd.f32 %v873_v59, %v552_v61 }
  0xd9   : > { %v854_v38 = vpop.f32.mrf.mxu2 }
  0xda   : > { %v868_v39 = vpop.f32.mrf.mxu3  ;;  %v855_v60 = vadd.f32 %v854_v38, %v841_v55 }
  0xdc   : > { %v869_v5 = vadd.f32 %v868_v39, %v855_v60 }
  0xde   : > { %v874_v14 = vrot.slane %v869_v5, 1 }
  0xe0   : > { %v878_v23 = vadd.f32 %v874_v14, %v554_v18 }
  0xe9   : > { %v1170_v40 = vpop.f32.mrf.mxu0 }
  0xea   : > { %v1184_v41 = vpop.f32.mrf.mxu1 }
  0xeb   : > { %v1185_v51 = vadd.f32 %v1184_v41, %v1170_v40 }
  0xf1   : > { %v1198_v42 = vpop.f32.mrf.mxu2  ;;  %v1172_v44 = vpop.f32.mrf.mxu0 }
  0xf2   : > { %v1212_v43 = vpop.f32.mrf.mxu3  ;;  %v1186_v45 = vpop.f32.mrf.mxu1  ;;  %v1199_v57 = vadd.f32 %v1198_v42, %v1185_v51 }
  0xf3   : > { %v1187_v2 = vadd.f32 %v1186_v45, %v1172_v44 }
  0xf4   : > { %v1213_v1 = vadd.f32 %v1212_v43, %v1199_v57 }
  0xf6   : > { %v1217_v10 = vadd.f32 %v1213_v1, %v877_v4 }
  0xf9   : > { %v1200_v49 = vpop.f32.mrf.mxu2 }
  0xfa   : > { %v1214_v50 = vpop.f32.mrf.mxu3  ;;  %v1201_v11 = vadd.f32 %v1200_v49, %v1187_v2 }
  0xfc   : > { %v1215_v19 = vadd.f32 %v1214_v50, %v1201_v11 }
  0xfe   : > { %v1218_v26 = vadd.f32 %v1215_v19, %v878_v23 }
 0x109   : > { %v1485_v52 = vpop.f32.mrf.mxu0 }
 0x10a   : > { %v1499_v53 = vpop.f32.mrf.mxu1 }
 0x10b   : > { %v1500_v58 = vadd.f32 %v1499_v53, %v1485_v52 }
 0x111   : > { %v1513_v62 = vpop.f32.mrf.mxu2  ;;  %v1487_v7 = vpop.f32.mrf.mxu0 }
 0x112   : > { %v1527_v63 = vpop.f32.mrf.mxu3  ;;  %v1514_v3 = vadd.f32 %v1513_v62, %v1500_v58  ;;  %v1501_v8 = vpop.f32.mrf.mxu1 }
 0x113   : > { %v1502_v16 = vadd.f32 %v1501_v8, %v1487_v7 }
 0x114   : > { %v1528_v6 = vadd.f32 %v1527_v63, %v1514_v3 }
 0x116   : > { %v1534_v12 = vrot.slane %v1528_v6, 1 }
 0x118   : > { %v1538_v15 = vadd.f32 %v1534_v12, %v1217_v10 }
 0x119   : > { %v1515_v17 = vpop.f32.mrf.mxu2 }
 0x11a   : > { %v1544_v20 = vadd.f32 %v2567_v13, %v1538_v15  ;;  %v1516_v21 = vadd.f32 %v1515_v17, %v1502_v16  ;;  %v1529_v22 = vpop.f32.mrf.mxu3 }
 0x11c   : > { %vm1546_vm0 = vcmp.ge.f32.partialorder %v1544_v20, 0.0  ;;  %v1548_v24 = vmul.f32 0.01, %v1544_v20  ;;  %v1530_v25 = vadd.f32 %v1529_v22, %v1516_v21 }
 0x11e   : > { %v1550_v27 = vsel %vm1546_vm0, %v1544_v20, %v1548_v24  ;;  %v1535_v28 = vrot.slane %v1530_v25, 1 }
 0x11f   : > { %v1552_v29 = vpack.c.bf16 %v1550_v27, %v1550_v27 }
 0x120   : > { %v1539_v30 = vadd.f32 %v1535_v28, %v1218_v26 }
 0x121   : > { %1554 = vst [vmem:[%s219_s7] sm:$0x1] %v1552_v29 }
 0x122   : > { %v1545_v31 = vadd.f32 %v2567_v13, %v1539_v30 }
 0x124   : > { %vm1547_vm1 = vcmp.ge.f32.partialorder %v1545_v31, 0.0  ;;  %v1549_v32 = vmul.f32 0.01, %v1545_v31 }
 0x126   : > { %v1551_v33 = vsel %vm1547_vm1, %v1545_v31, %v1549_v32 }
 0x127   : > { %v1553_v34 = vpack.c.bf16 %v1551_v33, %v1551_v33 }
 0x129   : > { %1555 = vst [vmem:[%s219_s7 + $0x1] sm:$0x1] %v1553_v34 }
 0x12a PF: > { %s13_s14 = sadd.s32 1, %s2590_s14   ;;  %s3094_s12 = smov %s2586_s13 }
 0x12b   : > { %p10_p5 = scmp.ge.s32.totalorder %s13_s14, 4   ;;  %s3095_s13 = smov %s3097_s15 }
 0x12d   :  { %12 = sbr.rel (!%p10_p5) target bundleno = 2 (0x2), region = 72 }

// kernel: gradual_style_block_forward.8
= control target key start
LH: loop header
LB: loop body
LE: loop exit
PB: predicated region body
PF: predicated region fallthrough
CT: control target
= control target key end

     0   :  { %s2515_s12 = smov 0   ;;  %s2517_s13 = smov 0   ;;  %s2981_s0 = inlined_call_operand.vmem [shape: bf16[2,2,8,512], index: 0, kind: input, shape index: {}]   ;;  %s2982_s1 = inlined_call_operand.vmem [shape: bf16[4,512,128], index: 1, kind: input, shape index: {}]   ;;  %s2983_s2 = inlined_call_operand.vmem [shape: f32[1,128], index: 2, kind: input, shape index: {}]   ;;  %s2984_s3 = inlined_call_operand.vmem [shape: bf16[2,1,1,128], index: 3, kind: output, shape index: {}]  }
   0x1   :  { %s2519_s14 = smov 0  }
   0x2 LB: > { %s25_s15 = sadd.s32 1, %s2489_s13  ;;  %p1607_p0 = scmp.ge.s32.totalorder %s2493_s14, 1  ;;  %s2493_s14 = sphi %s2519_s14, %s13_s14   ;;  %s2489_s13 = sphi %s2517_s13, %s2986_s13   ;;  %s2485_s12 = sphi %s2515_s12, %s2985_s12  }
   0x3   : > { %p27_p1 = scmp.ge.s32.totalorder %s25_s15, 2  ;;  %p168_p2 = scmp.lt.s32.totalorder %s2493_s14, 3 }
   0x5   : > { %s2988_s15 = smov (%p27_p1, %s25_s15), 0  ;;  %p169_p3 = pnand %p1607_p0, %p168_p2 }
   0x6   : > { %p200_p4 = scmp.lt.s32.totalorder (!%p169_p3), %s2485_s12, 1 }
   0x7   : > { %172 = sbr.rel (%p169_p3) target bundleno = 291 (0x123), region = 32 }
   0xc   : > { %v2326_v0 = vld [vmem:[%s2982_s1 + $0x38] sm:$0xff]  ;;  %v2325_v4 = vld [vmem:[%s2982_s1 + $0x30] sm:$0xff]  ;;  %v2324_v8 = vld [vmem:[%s2982_s1 + $0x28] sm:$0xff]  ;;  %s2990_s12 = smov (!%p200_p4, %s2485_s12), 1  ;;  %vm1502_vm0 = vcmask 1040384  }
   0xd   : > { %v2334_v1 = vld [vmem:[%s2982_s1 + $0x78] sm:$0xff]  ;;  %490 = vmatpush.bf16.msra.mxu0 %v2326_v0  ;;  %v2333_v5 = vld [vmem:[%s2982_s1 + $0x70] sm:$0xff]  ;;  %v2332_v9 = vld [vmem:[%s2982_s1 + $0x68] sm:$0xff]  ;;  %s2318_s6 = sshll.u32 %s2990_s12, 5  ;;  %vm1503_vm1 = vsmask.f32 256 }
   0xe   : > { %v2342_v2 = vld [vmem:[%s2982_s1 + $0xb8] sm:$0xff]  ;;  %503 = vmatpush.bf16.msra.mxu1 %v2334_v1  ;;  %v2341_v6 = vld [vmem:[%s2982_s1 + $0xb0] sm:$0xff]  ;;  %v2340_v10 = vld [vmem:[%s2982_s1 + $0xa8] sm:$0xff]  ;;  %s2615_s21 = scalar_lea.vmem %s2981_s0, %s2318_s6 }
   0xf   : > { %v2350_v3 = vld [vmem:[%s2982_s1 + $0xf8] sm:$0xff]  ;;  %516 = vmatpush.bf16.msra.mxu2 %v2342_v2  ;;  %v2349_v7 = vld [vmem:[%s2982_s1 + $0xf0] sm:$0xff]  ;;  %v2348_v11 = vld [vmem:[%s2982_s1 + $0xe8] sm:$0xff] }
  0x10   : > { %529 = vmatpush.bf16.msra.mxu3 %v2350_v3  ;;  %v2323_v12 = vld [vmem:[%s2982_s1 + $0x20] sm:$0xff]  ;;  %v2322_v16 = vld [vmem:[%s2982_s1 + $0x18] sm:$0xff]  ;;  %v2321_v20 = vld [vmem:[%s2982_s1 + $0x10] sm:$0xff] }
  0x11   : > { %491 = vmatpush.bf16.msra.mxu0 %v2325_v4  ;;  %v2331_v13 = vld [vmem:[%s2982_s1 + $0x60] sm:$0xff]  ;;  %v2330_v17 = vld [vmem:[%s2982_s1 + $0x58] sm:$0xff]  ;;  %v2329_v21 = vld [vmem:[%s2982_s1 + $0x50] sm:$0xff] }
  0x12   : > { %504 = vmatpush.bf16.msra.mxu1 %v2333_v5  ;;  %v2339_v14 = vld [vmem:[%s2982_s1 + $0xa0] sm:$0xff]  ;;  %v2338_v18 = vld [vmem:[%s2982_s1 + $0x98] sm:$0xff]  ;;  %v2337_v22 = vld [vmem:[%s2982_s1 + $0x90] sm:$0xff] }
  0x13   : > { %517 = vmatpush.bf16.msra.mxu2 %v2341_v6  ;;  %v2347_v15 = vld [vmem:[%s2982_s1 + $0xe0] sm:$0xff]  ;;  %v2346_v19 = vld [vmem:[%s2982_s1 + $0xd8] sm:$0xff]  ;;  %v2345_v23 = vld [vmem:[%s2982_s1 + $0xd0] sm:$0xff] }
  0x14   : > { %530 = vmatpush.bf16.msra.mxu3 %v2349_v7  ;;  %v2320_v24 = vld [vmem:[%s2982_s1 + $0x8] sm:$0xff]  ;;  %v218_v29 = vld [vmem:[%s2615_s21] sm:$0xff]  ;;  %v2358_v38 = vld [vmem:[%s2982_s1 + $0x138] sm:$0xff] }
  0x15   : > { %492 = vmatpush.bf16.msra.mxu0 %v2324_v8  ;;  %v2328_v25 = vld [vmem:[%s2982_s1 + $0x48] sm:$0xff]  ;;  %v2319_v30 = vld [vmem:[%s2982_s1] sm:$0xff]  ;;  %v286_v36 = vunpack.c.l.b16 %v218_v29  ;;  %v287_v37 = vunpack.c.h.b16 %v218_v29  ;;  %v2366_v39 = vld [vmem:[%s2982_s1 + $0x178] sm:$0xff] }
  0x16   : > { %505 = vmatpush.bf16.msra.mxu1 %v2332_v9  ;;  %v2336_v26 = vld [vmem:[%s2982_s1 + $0x88] sm:$0xff]  ;;  %v2327_v31 = vld [vmem:[%s2982_s1 + $0x40] sm:$0xff]  ;;  %v2374_v40 = vld [vmem:[%s2982_s1 + $0x1b8] sm:$0xff] }
  0x17   : > { %518 = vmatpush.bf16.msra.mxu2 %v2340_v10  ;;  %v2344_v27 = vld [vmem:[%s2982_s1 + $0xc8] sm:$0xff]  ;;  %v2335_v34 = vld [vmem:[%s2982_s1 + $0x80] sm:$0xff]  ;;  %v2382_v41 = vld [vmem:[%s2982_s1 + $0x1f8] sm:$0xff]  ;;  %v2659_v44 = vpack.c.b16 %v286_v36, %v286_v36  ;;  %v2661_v45 = vpack.c.b16 %v287_v37, %v287_v37 }
  0x18   : > { %531 = vmatpush.bf16.msra.mxu3 %v2348_v11  ;;  %v219_v28 = vld [vmem:[%s2615_s21 + $0x8] sm:$0xff]  ;;  %v2343_v35 = vld [vmem:[%s2982_s1 + $0xc0] sm:$0xff]  ;;  %v2357_v46 = vld [vmem:[%s2982_s1 + $0x130] sm:$0xff] }
  0x19   : > { %493 = vmatpush.bf16.msra.mxu0 %v2323_v12  ;;  %v288_v32 = vunpack.c.l.b16 %v219_v28  ;;  %v289_v33 = vunpack.c.h.b16 %v219_v28  ;;  %v2365_v47 = vld [vmem:[%s2982_s1 + $0x170] sm:$0xff]  ;;  %v2356_v50 = vld [vmem:[%s2982_s1 + $0x128] sm:$0xff]  ;;  %v2355_v54 = vld [vmem:[%s2982_s1 + $0x120] sm:$0xff] }
  0x1a   : > { %506 = vmatpush.bf16.msra.mxu1 %v2331_v13  ;;  %v2373_v48 = vld [vmem:[%s2982_s1 + $0x1b0] sm:$0xff]  ;;  %v2364_v51 = vld [vmem:[%s2982_s1 + $0x168] sm:$0xff]  ;;  %v2363_v55 = vld [vmem:[%s2982_s1 + $0x160] sm:$0xff] }
  0x1b   : > { %519 = vmatpush.bf16.msra.mxu2 %v2339_v14  ;;  %v2655_v42 = vpack.c.b16 %v288_v32, %v288_v32  ;;  %v2657_v43 = vpack.c.b16 %v289_v33, %v289_v33  ;;  %v2381_v49 = vld [vmem:[%s2982_s1 + $0x1f0] sm:$0xff]  ;;  %v2372_v52 = vld [vmem:[%s2982_s1 + $0x1a8] sm:$0xff]  ;;  %v2371_v56 = vld [vmem:[%s2982_s1 + $0x1a0] sm:$0xff] }
  0x1c   : > { %532 = vmatpush.bf16.msra.mxu3 %v2347_v15  ;;  %v2380_v53 = vld [vmem:[%s2982_s1 + $0x1e8] sm:$0xff]  ;;  %v2379_v57 = vld [vmem:[%s2982_s1 + $0x1e0] sm:$0xff]  ;;  %v2354_v58 = vld [vmem:[%s2982_s1 + $0x118] sm:$0xff] }
  0x1d   : > { %494 = vmatpush.bf16.msra.mxu0 %v2322_v16  ;;  %v2362_v59 = vld [vmem:[%s2982_s1 + $0x158] sm:$0xff]  ;;  %v2353_v62 = vld [vmem:[%s2982_s1 + $0x110] sm:$0xff]  ;;  %v2352_v2 = vld [vmem:[%s2982_s1 + $0x108] sm:$0xff] }
  0x1e   : > { %507 = vmatpush.bf16.msra.mxu1 %v2330_v17  ;;  %v2370_v60 = vld [vmem:[%s2982_s1 + $0x198] sm:$0xff]  ;;  %v2361_v63 = vld [vmem:[%s2982_s1 + $0x150] sm:$0xff]  ;;  %v2360_v3 = vld [vmem:[%s2982_s1 + $0x148] sm:$0xff] }
  0x1f   : > { %520 = vmatpush.bf16.msra.mxu2 %v2338_v18  ;;  %v2378_v61 = vld [vmem:[%s2982_s1 + $0x1d8] sm:$0xff]  ;;  %v2369_v0 = vld [vmem:[%s2982_s1 + $0x190] sm:$0xff]  ;;  %v2368_v4 = vld [vmem:[%s2982_s1 + $0x188] sm:$0xff] }
  0x20   : > { %533 = vmatpush.bf16.msra.mxu3 %v2346_v19  ;;  %v2377_v1 = vld [vmem:[%s2982_s1 + $0x1d0] sm:$0xff]  ;;  %v2376_v5 = vld [vmem:[%s2982_s1 + $0x1c8] sm:$0xff]  ;;  %v2351_v6 = vld [vmem:[%s2982_s1 + $0x100] sm:$0xff] }
  0x21   : > { %495 = vmatpush.bf16.msra.mxu0 %v2321_v20  ;;  %v2359_v7 = vld [vmem:[%s2982_s1 + $0x140] sm:$0xff]  ;;  %v2390_v10 = vld [vmem:[%s2982_s1 + $0x238] sm:$0xff]  ;;  %v2389_v14 = vld [vmem:[%s2982_s1 + $0x230] sm:$0xff] }
  0x22   : > { %508 = vmatpush.bf16.msra.mxu1 %v2329_v21  ;;  %v2367_v8 = vld [vmem:[%s2982_s1 + $0x180] sm:$0xff]  ;;  %v2398_v11 = vld [vmem:[%s2982_s1 + $0x278] sm:$0xff]  ;;  %v2397_v15 = vld [vmem:[%s2982_s1 + $0x270] sm:$0xff] }
  0x23   : > { %521 = vmatpush.bf16.msra.mxu2 %v2337_v22  ;;  %v2375_v9 = vld [vmem:[%s2982_s1 + $0x1c0] sm:$0xff]  ;;  %v2406_v12 = vld [vmem:[%s2982_s1 + $0x2b8] sm:$0xff]  ;;  %v2405_v16 = vld [vmem:[%s2982_s1 + $0x2b0] sm:$0xff] }
  0x24   : > { %534 = vmatpush.bf16.msra.mxu3 %v2345_v23  ;;  %v2414_v13 = vld [vmem:[%s2982_s1 + $0x2f8] sm:$0xff]  ;;  %v2413_v17 = vld [vmem:[%s2982_s1 + $0x2f0] sm:$0xff]  ;;  %v2388_v18 = vld [vmem:[%s2982_s1 + $0x228] sm:$0xff] }
  0x25   : > { %496 = vmatpush.bf16.msra.mxu0 %v2320_v24  ;;  %v2396_v19 = vld [vmem:[%s2982_s1 + $0x268] sm:$0xff]  ;;  %v2387_v22 = vld [vmem:[%s2982_s1 + $0x220] sm:$0xff]  ;;  %v2402_v28 = vld [vmem:[%s2982_s1 + $0x298] sm:$0xff] }
  0x26   : > { %509 = vmatpush.bf16.msra.mxu1 %v2328_v25  ;;  %v2404_v20 = vld [vmem:[%s2982_s1 + $0x2a8] sm:$0xff]  ;;  %v2395_v23 = vld [vmem:[%s2982_s1 + $0x260] sm:$0xff]  ;;  %v2410_v29 = vld [vmem:[%s2982_s1 + $0x2d8] sm:$0xff] }
  0x27   : > { %522 = vmatpush.bf16.msra.mxu2 %v2336_v26  ;;  %v2412_v21 = vld [vmem:[%s2982_s1 + $0x2e8] sm:$0xff]  ;;  %v2403_v24 = vld [vmem:[%s2982_s1 + $0x2a0] sm:$0xff]  ;;  %v2386_v26 = vld [vmem:[%s2982_s1 + $0x218] sm:$0xff] }
  0x28   : > { %535 = vmatpush.bf16.msra.mxu3 %v2344_v27  ;;  %v2411_v25 = vld [vmem:[%s2982_s1 + $0x2e0] sm:$0xff]  ;;  %v2394_v27 = vld [vmem:[%s2982_s1 + $0x258] sm:$0xff]  ;;  %v2401_v32 = vld [vmem:[%s2982_s1 + $0x290] sm:$0xff] }
  0x29   : > { %497 = vmatpush.bf16.msra.mxu0 %v2319_v30  ;;  %v2385_v30 = vld [vmem:[%s2982_s1 + $0x210] sm:$0xff]  ;;  %v2400_v36 = vld [vmem:[%s2982_s1 + $0x288] sm:$0xff]  ;;  %vm1504_vm3 = vmand %vm1502_vm0, %vm1503_vm1 }
  0x2a   : > { %510 = vmatpush.bf16.msra.mxu1 %v2327_v31  ;;  %v2393_v31 = vld [vmem:[%s2982_s1 + $0x250] sm:$0xff]  ;;  %v2408_v37 = vld [vmem:[%s2982_s1 + $0x2c8] sm:$0xff] }
  0x2b   : > { %523 = vmatpush.bf16.msra.mxu2 %v2335_v34  ;;  %v2409_v33 = vld [vmem:[%s2982_s1 + $0x2d0] sm:$0xff]  ;;  %v2384_v34 = vld [vmem:[%s2982_s1 + $0x208] sm:$0xff] }
  0x2c   : > { %536 = vmatpush.bf16.msra.mxu3 %v2343_v35  ;;  %498 = vmatmul.bf16.vlgmr.msra.gmra.mxu0 %v2659_v44  ;;  %v2392_v35 = vld [vmem:[%s2982_s1 + $0x248] sm:$0xff] }
  0x2d   : > { %800 = vmatpush.bf16.msrb.mxu0 %v2358_v38  ;;  %511 = vmatmul.bf16.vlgmr.msra.gmra.mxu1 %v2661_v45  ;;  %v1931_v38 = vld [vmem:[%s2615_s21 + $0x18] sm:$0xff] }
  0x2e   : > { %813 = vmatpush.bf16.msrb.mxu1 %v2366_v39  ;;  %524 = vmatmul.bf16.vlgmr.msra.gmra.mxu2 %v2655_v42  ;;  %v1930_v39 = vld [vmem:[%s2615_s21 + $0x10] sm:$0xff]  ;;  %s217_s21 = scalar_lea.vmem %s2984_s3, %s2990_s12 }
  0x2f   : > { %826 = vmatpush.bf16.msrb.mxu2 %v2374_v40  ;;  %537 = vmatmul.bf16.vlgmr.msra.gmra.mxu3 %v2657_v43  ;;  %v2383_v40 = vld [vmem:[%s2982_s1 + $0x200] sm:$0xff] }
  0x30   : > { %839 = vmatpush.bf16.msrb.mxu3 %v2382_v41  ;;  %v2391_v41 = vld [vmem:[%s2982_s1 + $0x240] sm:$0xff] }
  0x31   : > { %801 = vmatpush.bf16.msrb.mxu0 %v2357_v46  ;;  %v926_v46 = vunpack.c.l.b16 %v1930_v39 }
  0x32   : > { %814 = vmatpush.bf16.msrb.mxu1 %v2365_v47  ;;  %v927_v47 = vunpack.c.h.b16 %v1930_v39 }
  0x33   : > { %827 = vmatpush.bf16.msrb.mxu2 %v2373_v48  ;;  %v2422_v48 = vld [vmem:[%s2982_s1 + $0x338] sm:$0xff] }
  0x34   : > { %840 = vmatpush.bf16.msrb.mxu3 %v2381_v49  ;;  %v2430_v49 = vld [vmem:[%s2982_s1 + $0x378] sm:$0xff] }
  0x35   : > { %802 = vmatpush.bf16.msrb.mxu0 %v2356_v50  ;;  %v2438_v50 = vld [vmem:[%s2982_s1 + $0x3b8] sm:$0xff] }
  0x36   : > { %815 = vmatpush.bf16.msrb.mxu1 %v2364_v51  ;;  %v2446_v51 = vld [vmem:[%s2982_s1 + $0x3f8] sm:$0xff] }
  0x37   : > { %828 = vmatpush.bf16.msrb.mxu2 %v2372_v52 }
  0x38   : > { %841 = vmatpush.bf16.msrb.mxu3 %v2380_v53 }
  0x39   : > { %803 = vmatpush.bf16.msrb.mxu0 %v2355_v54  ;;  %v2869_v54 = vpack.c.b16 %v926_v46, %v926_v46 }
  0x3a   : > { %816 = vmatpush.bf16.msrb.mxu1 %v2363_v55  ;;  %v2871_v55 = vpack.c.b16 %v927_v47, %v927_v47 }
  0x3b   : > { %829 = vmatpush.bf16.msrb.mxu2 %v2371_v56  ;;  %v2421_v56 = vld [vmem:[%s2982_s1 + $0x330] sm:$0xff] }
  0x3c   : > { %842 = vmatpush.bf16.msrb.mxu3 %v2379_v57  ;;  %v2429_v57 = vld [vmem:[%s2982_s1 + $0x370] sm:$0xff] }
  0x3d   : > { %804 = vmatpush.bf16.msrb.mxu0 %v2354_v58  ;;  %v2437_v58 = vld [vmem:[%s2982_s1 + $0x3b0] sm:$0xff] }
  0x3e   : > { %817 = vmatpush.bf16.msrb.mxu1 %v2362_v59  ;;  %v2445_v59 = vld [vmem:[%s2982_s1 + $0x3f0] sm:$0xff] }
  0x3f   : > { %830 = vmatpush.bf16.msrb.mxu2 %v2370_v60  ;;  %v2420_v60 = vld [vmem:[%s2982_s1 + $0x328] sm:$0xff] }
  0x40   : > { %843 = vmatpush.bf16.msrb.mxu3 %v2378_v61  ;;  %v2428_v61 = vld [vmem:[%s2982_s1 + $0x368] sm:$0xff] }
  0x41   : > { %805 = vmatpush.bf16.msrb.mxu0 %v2353_v62  ;;  %v2436_v62 = vld [vmem:[%s2982_s1 + $0x3a8] sm:$0xff] }
  0x42   : > { %818 = vmatpush.bf16.msrb.mxu1 %v2361_v63  ;;  %v2444_v63 = vld [vmem:[%s2982_s1 + $0x3e8] sm:$0xff] }
  0x43   : > { %831 = vmatpush.bf16.msrb.mxu2 %v2369_v0  ;;  %v2419_v0 = vld [vmem:[%s2982_s1 + $0x320] sm:$0xff] }
  0x44   : > { %844 = vmatpush.bf16.msrb.mxu3 %v2377_v1  ;;  %v2427_v1 = vld [vmem:[%s2982_s1 + $0x360] sm:$0xff] }
  0x45   : > { %806 = vmatpush.bf16.msrb.mxu0 %v2352_v2  ;;  %v2435_v2 = vld [vmem:[%s2982_s1 + $0x3a0] sm:$0xff] }
  0x46   : > { %819 = vmatpush.bf16.msrb.mxu1 %v2360_v3  ;;  %v2443_v3 = vld [vmem:[%s2982_s1 + $0x3e0] sm:$0xff] }
  0x47   : > { %832 = vmatpush.bf16.msrb.mxu2 %v2368_v4  ;;  %v2418_v4 = vld [vmem:[%s2982_s1 + $0x318] sm:$0xff] }
  0x48   : > { %845 = vmatpush.bf16.msrb.mxu3 %v2376_v5  ;;  %v2426_v5 = vld [vmem:[%s2982_s1 + $0x358] sm:$0xff] }
  0x49   : > { %807 = vmatpush.bf16.msrb.mxu0 %v2351_v6  ;;  %v2434_v6 = vld [vmem:[%s2982_s1 + $0x398] sm:$0xff] }
  0x4a   : > { %820 = vmatpush.bf16.msrb.mxu1 %v2359_v7  ;;  %v2442_v7 = vld [vmem:[%s2982_s1 + $0x3d8] sm:$0xff] }
  0x4b   : > { %833 = vmatpush.bf16.msrb.mxu2 %v2367_v8  ;;  %v2417_v8 = vld [vmem:[%s2982_s1 + $0x310] sm:$0xff] }
  0x4c   : > { %846 = vmatpush.bf16.msrb.mxu3 %v2375_v9  ;;  %808 = vmatmul.bf16.vlgmr.msrb.gmra.mxu0 %v2659_v44  ;;  %v2399_v44 = vld [vmem:[%s2982_s1 + $0x280] sm:$0xff]  ;;  %v2425_v9 = vld [vmem:[%s2982_s1 + $0x350] sm:$0xff] }
  0x4d   : > { %1130 = vmatpush.bf16.msra.mxu0 %v2390_v10  ;;  %821 = vmatmul.bf16.vlgmr.msrb.gmra.mxu1 %v2661_v45  ;;  %v2407_v45 = vld [vmem:[%s2982_s1 + $0x2c0] sm:$0xff]  ;;  %v2433_v10 = vld [vmem:[%s2982_s1 + $0x390] sm:$0xff] }
  0x4e   : > { %1143 = vmatpush.bf16.msra.mxu1 %v2398_v11  ;;  %834 = vmatmul.bf16.vlgmr.msrb.gmra.mxu2 %v2655_v42  ;;  %v928_v42 = vunpack.c.l.b16 %v1931_v38  ;;  %v2441_v11 = vld [vmem:[%s2982_s1 + $0x3d0] sm:$0xff] }
  0x4f   : > { %1156 = vmatpush.bf16.msra.mxu2 %v2406_v12  ;;  %847 = vmatmul.bf16.vlgmr.msrb.gmra.mxu3 %v2657_v43  ;;  %v929_v43 = vunpack.c.h.b16 %v1931_v38  ;;  %v2416_v12 = vld [vmem:[%s2982_s1 + $0x308] sm:$0xff] }
  0x50   : > { %1169 = vmatpush.bf16.msra.mxu3 %v2414_v13  ;;  %v2865_v52 = vpack.c.b16 %v928_v42, %v928_v42  ;;  %v2424_v13 = vld [vmem:[%s2982_s1 + $0x348] sm:$0xff] }
  0x51   : > { %1131 = vmatpush.bf16.msra.mxu0 %v2389_v14  ;;  %v2867_v53 = vpack.c.b16 %v929_v43, %v929_v43  ;;  %v2432_v14 = vld [vmem:[%s2982_s1 + $0x388] sm:$0xff] }
  0x52   : > { %1144 = vmatpush.bf16.msra.mxu1 %v2397_v15  ;;  %v2440_v15 = vld [vmem:[%s2982_s1 + $0x3c8] sm:$0xff] }
  0x53   : > { %1157 = vmatpush.bf16.msra.mxu2 %v2405_v16  ;;  %v2415_v16 = vld [vmem:[%s2982_s1 + $0x300] sm:$0xff] }
  0x54   : > { %1170 = vmatpush.bf16.msra.mxu3 %v2413_v17  ;;  %v2423_v17 = vld [vmem:[%s2982_s1 + $0x340] sm:$0xff] }
  0x55   : > { %1132 = vmatpush.bf16.msra.mxu0 %v2388_v18  ;;  %v2431_v18 = vld [vmem:[%s2982_s1 + $0x380] sm:$0xff] }
  0x56   : > { %1145 = vmatpush.bf16.msra.mxu1 %v2396_v19  ;;  %v2439_v19 = vld [vmem:[%s2982_s1 + $0x3c0] sm:$0xff] }
  0x57   : > { %1158 = vmatpush.bf16.msra.mxu2 %v2404_v20 }
  0x58   : > { %1171 = vmatpush.bf16.msra.mxu3 %v2412_v21 }
  0x59   : > { %1133 = vmatpush.bf16.msra.mxu0 %v2387_v22 }
  0x5a   : > { %1146 = vmatpush.bf16.msra.mxu1 %v2395_v23 }
  0x5b   : > { %1159 = vmatpush.bf16.msra.mxu2 %v2403_v24 }
  0x5c   : > { %1172 = vmatpush.bf16.msra.mxu3 %v2411_v25 }
  0x5d   : > { %1134 = vmatpush.bf16.msra.mxu0 %v2386_v26 }
  0x5e   : > { %1147 = vmatpush.bf16.msra.mxu1 %v2394_v27 }
  0x5f   : > { %1160 = vmatpush.bf16.msra.mxu2 %v2402_v28 }
  0x60   : > { %1173 = vmatpush.bf16.msra.mxu3 %v2410_v29 }
  0x61   : > { %1135 = vmatpush.bf16.msra.mxu0 %v2385_v30 }
  0x62   : > { %1148 = vmatpush.bf16.msra.mxu1 %v2393_v31 }
  0x63   : > { %1161 = vmatpush.bf16.msra.mxu2 %v2401_v32 }
  0x64   : > { %1174 = vmatpush.bf16.msra.mxu3 %v2409_v33 }
  0x65   : > { %1136 = vmatpush.bf16.msra.mxu0 %v2384_v34 }
  0x66   : > { %1149 = vmatpush.bf16.msra.mxu1 %v2392_v35 }
  0x67   : > { %1162 = vmatpush.bf16.msra.mxu2 %v2400_v36 }
  0x68   : > { %1175 = vmatpush.bf16.msra.mxu3 %v2408_v37 }
  0x69   : > { %1137 = vmatpush.bf16.msra.mxu0 %v2383_v40 }
  0x6a   : > { %1150 = vmatpush.bf16.msra.mxu1 %v2391_v41 }
  0x6b   : > { %1163 = vmatpush.bf16.msra.mxu2 %v2399_v44 }
  0x6c   : > { %1176 = vmatpush.bf16.msra.mxu3 %v2407_v45  ;;  %1138 = vmatmul.bf16.vlgmr.msra.gmra.mxu0 %v2869_v54 }
  0x6d   : > { %1440 = vmatpush.bf16.msrb.mxu0 %v2422_v48  ;;  %1151 = vmatmul.bf16.vlgmr.msra.gmra.mxu1 %v2871_v55 }
  0x6e   : > { %1453 = vmatpush.bf16.msrb.mxu1 %v2430_v49  ;;  %1164 = vmatmul.bf16.vlgmr.msra.gmra.mxu2 %v2865_v52 }
  0x6f   : > { %1466 = vmatpush.bf16.msrb.mxu2 %v2438_v50  ;;  %1177 = vmatmul.bf16.vlgmr.msra.gmra.mxu3 %v2867_v53 }
  0x70   : > { %1479 = vmatpush.bf16.msrb.mxu3 %v2446_v51 }
  0x71   : > { %1441 = vmatpush.bf16.msrb.mxu0 %v2421_v56 }
  0x72   : > { %1454 = vmatpush.bf16.msrb.mxu1 %v2429_v57 }
  0x73   : > { %1467 = vmatpush.bf16.msrb.mxu2 %v2437_v58 }
  0x74   : > { %1480 = vmatpush.bf16.msrb.mxu3 %v2445_v59 }
  0x75   : > { %1442 = vmatpush.bf16.msrb.mxu0 %v2420_v60 }
  0x76   : > { %1455 = vmatpush.bf16.msrb.mxu1 %v2428_v61 }
  0x77   : > { %1468 = vmatpush.bf16.msrb.mxu2 %v2436_v62 }
  0x78   : > { %1481 = vmatpush.bf16.msrb.mxu3 %v2444_v63 }
  0x79   : > { %1443 = vmatpush.bf16.msrb.mxu0 %v2419_v0 }
  0x7a   : > { %1456 = vmatpush.bf16.msrb.mxu1 %v2427_v1 }
  0x7b   : > { %1469 = vmatpush.bf16.msrb.mxu2 %v2435_v2  ;;  %v1496_v2 = vld [vmem:[%s2983_s2] sm:$0x1] }
  0x7c   : > { %1482 = vmatpush.bf16.msrb.mxu3 %v2443_v3 }
  0x7d   : > { %1444 = vmatpush.bf16.msrb.mxu0 %v2418_v4 }
  0x7e   : > { %1457 = vmatpush.bf16.msrb.mxu1 %v2426_v5 }
  0x7f   : > { %1470 = vmatpush.bf16.msrb.mxu2 %v2434_v6 }
  0x80   : > { %1483 = vmatpush.bf16.msrb.mxu3 %v2442_v7 }
  0x81   : > { %1445 = vmatpush.bf16.msrb.mxu0 %v2417_v8  ;;  %v1505_v8 = vld [vmem:[%s217_s21] sm:$0x1] }
  0x82   : > { %1458 = vmatpush.bf16.msrb.mxu1 %v2425_v9 }
  0x83   : > { %1471 = vmatpush.bf16.msrb.mxu2 %v2433_v10 }
  0x84   : > { %1484 = vmatpush.bf16.msrb.mxu3 %v2441_v11 }
  0x85   : > { %1446 = vmatpush.bf16.msrb.mxu0 %v2416_v12 }
  0x86   : > { %1459 = vmatpush.bf16.msrb.mxu1 %v2424_v13 }
  0x87   : > { %1472 = vmatpush.bf16.msrb.mxu2 %v2432_v14 }
  0x88   : > { %1485 = vmatpush.bf16.msrb.mxu3 %v2440_v15 }
  0x89   : > { %1447 = vmatpush.bf16.msrb.mxu0 %v2415_v16 }
  0x8a   : > { %1460 = vmatpush.bf16.msrb.mxu1 %v2423_v17 }
  0x8b   : > { %1473 = vmatpush.bf16.msrb.mxu2 %v2431_v18 }
  0x8c   : > { %1486 = vmatpush.bf16.msrb.mxu3 %v2439_v19  ;;  %1448 = vmatmul.bf16.vlgmr.msrb.gmra.mxu0 %v2869_v54 }
  0x8d   : > { %1461 = vmatmul.bf16.vlgmr.msrb.gmra.mxu1 %v2871_v55 }
  0x8e   : > { %1474 = vmatmul.bf16.vlgmr.msrb.gmra.mxu2 %v2865_v52 }
  0x8f   : > { %1487 = vmatmul.bf16.vlgmr.msrb.gmra.mxu3 %v2867_v53 }
  0xa9   : > { %v499_v20 = vpop.f32.mrf.mxu0 }
  0xaa   : > { %v512_v21 = vpop.f32.mrf.mxu1 }
  0xab   : > { %v513_v22 = vadd.f32 %v512_v21, %v499_v20 }
  0xb1   : > { %v525_v23 = vpop.f32.mrf.mxu2  ;;  %v501_v27 = vpop.f32.mrf.mxu0 }
  0xb2   : > { %v538_v24 = vpop.f32.mrf.mxu3  ;;  %v526_v25 = vadd.f32 %v525_v23, %v513_v22  ;;  %v514_v28 = vpop.f32.mrf.mxu1 }
  0xb4   : > { %v539_v26 = vadd.f32 %v538_v24, %v526_v25 }
  0xb9   : > { %v527_v29 = vpop.f32.mrf.mxu2 }
  0xba   : > { %v540_v30 = vpop.f32.mrf.mxu3 }
  0xc9   : > { %v809_v31 = vpop.f32.mrf.mxu0 }
  0xca   : > { %v822_v32 = vpop.f32.mrf.mxu1 }
  0xcb   : > { %v823_v47 = vadd.f32 %v822_v32, %v809_v31 }
  0xd1   : > { %v835_v33 = vpop.f32.mrf.mxu2  ;;  %v811_v35 = vpop.f32.mrf.mxu0 }
  0xd2   : > { %v848_v34 = vpop.f32.mrf.mxu3  ;;  %v824_v36 = vpop.f32.mrf.mxu1  ;;  %v836_v48 = vadd.f32 %v835_v33, %v823_v47 }
  0xd4   : > { %v849_v52 = vadd.f32 %v848_v34, %v836_v48 }
  0xd6   : > { %v853_v55 = vrot.slane %v849_v52, 1 }
  0xd8   : > { %v855_v62 = vadd.f32 %v853_v55, %v539_v26 }
  0xd9   : > { %v837_v37 = vpop.f32.mrf.mxu2 }
  0xda   : > { %v850_v38 = vpop.f32.mrf.mxu3 }
  0xe9   : > { %v1139_v39 = vpop.f32.mrf.mxu0 }
  0xea   : > { %v1152_v40 = vpop.f32.mrf.mxu1 }
  0xeb   : > { %v1153_v49 = vadd.f32 %v1152_v40, %v1139_v39 }
  0xf1   : > { %v1165_v41 = vpop.f32.mrf.mxu2  ;;  %v1141_v43 = vpop.f32.mrf.mxu0 }
  0xf2   : > { %v1178_v42 = vpop.f32.mrf.mxu3  ;;  %v1154_v44 = vpop.f32.mrf.mxu1  ;;  %v1166_v53 = vadd.f32 %v1165_v41, %v1153_v49 }
  0xf4   : > { %v1179_v58 = vadd.f32 %v1178_v42, %v1166_v53 }
  0xf6   : > { %v1182_v0 = vadd.f32 %v1179_v58, %v855_v62 }
  0xf9   : > { %v1167_v45 = vpop.f32.mrf.mxu2 }
  0xfa   : > { %v1180_v46 = vpop.f32.mrf.mxu3 }
 0x109   : > { %v1449_v50 = vpop.f32.mrf.mxu0 }
 0x10a   : > { %v1462_v51 = vpop.f32.mrf.mxu1 }
 0x10b   : > { %v1463_v54 = vadd.f32 %v1462_v51, %v1449_v50 }
 0x111   : > { %v1475_v56 = vpop.f32.mrf.mxu2  ;;  %v1451_v60 = vpop.f32.mrf.mxu0 }
 0x112   : > { %v1488_v57 = vpop.f32.mrf.mxu3  ;;  %v1476_v59 = vadd.f32 %v1475_v56, %v1463_v54  ;;  %v1464_v61 = vpop.f32.mrf.mxu1 }
 0x114   : > { %v1489_v63 = vadd.f32 %v1488_v57, %v1476_v59 }
 0x116   : > { %v1493_v1 = vrot.slane %v1489_v63, 1 }
 0x118   : > { %v1495_v3 = vadd.f32 %v1493_v1, %v1182_v0 }
 0x119   : > { %v1477_v4 = vpop.f32.mrf.mxu2 }
 0x11a   : > { %v1490_v5 = vpop.f32.mrf.mxu3  ;;  %v1497_v6 = vadd.f32 %v1496_v2, %v1495_v3 }
 0x11c   : > { %vm1498_vm2 = vcmp.ge.f32.partialorder %v1497_v6, 0.0  ;;  %v1499_v7 = vmul.f32 0.01, %v1497_v6 }
 0x11e   : > { %v1500_v9 = vsel %vm1498_vm2, %v1497_v6, %v1499_v7 }
 0x11f   : > { %v1501_v10 = vpack.c.bf16 %v1500_v9, %v1500_v9 }
 0x121   : > { %v1506_v11 = vsel %vm1504_vm3, %v1501_v10, %v1505_v8 }
 0x122   : > { %1507 = vst [vmem:[%s217_s21] sm:$0x1] %v1506_v11 }
 0x123 PF: > { %s13_s14 = sadd.s32 1, %s2493_s14   ;;  %s2985_s12 = smov %s2489_s13 }
 0x124   : > { %p10_p5 = scmp.ge.s32.totalorder %s13_s14, 4   ;;  %s2986_s13 = smov %s2988_s15 }
 0x126   :  { %12 = sbr.rel (!%p10_p5) target bundleno = 2 (0x2), region = 72 }

</bundles_post_ra>
